<compile_context>
chip_gen: v5e
topology: v5e:2x2
jax: 0.10.0
libtpu: 0.0.40
codegen_flags: <defaults>
</compile_context>

<pallas_src>
import functools

import jax
import jax.numpy as jnp
from jax.experimental import pallas as pl
from jax.experimental.pallas import tpu as pltpu


def _round_up(x, m):
    return ((x + m - 1) // m) * m


def _softplus(x):
    # numerically stable log(1 + exp(x))
    return jnp.maximum(x, 0.0) + jnp.log1p(jnp.exp(-jnp.abs(x)))


def _vmem_cap_bytes():
    # Generation-aware cap: ~3/4 of physical VMEM (≈48 MiB on v7x's 64 MiB/TC,
    # ≈96 MiB on v5e/v6e's 128 MiB), clamped to a sane range.
    try:
        cap = int(pltpu.get_tpu_info().vmem_capacity_bytes) * 3 // 4
    except Exception:
        cap = 48 << 20
    return max(16 << 20, min(cap, 96 << 20))


def vae_kernel(
    x_ref, eps_ref,
    enc_w_ref, enc_b_ref,
    musg_w_ref, musg_b_ref,
    d1_w_ref, d1_b_ref,
    d2_w_ref, d2_b_ref,
    lat_ref, xhat_ref,
    *, z_pad, approx_sigmoid,
):
    wdt = enc_w_ref.dtype  # matmul input dtype (bf16 or f32); accum always f32

    # ---- Encoder: h = relu(x @ W_enc + b_enc) ----
    h = jnp.dot(x_ref[...].astype(wdt), enc_w_ref[...],
                preferred_element_type=jnp.float32)
    h = jnp.maximum(h + enc_b_ref[...], 0.0)

    # ---- Fused mean / sigma heads: one lane-dense [TB, 2*Zp] matmul ----
    ms = jnp.dot(h.astype(wdt), musg_w_ref[...],
                 preferred_element_type=jnp.float32)
    ms = ms + musg_b_ref[...]
    mean = ms[:, :z_pad]
    logvar = _softplus(ms[:, z_pad:])          # f32 elementwise (v5e-safe)

    # ---- Reparameterization: z = mean + exp(0.5 * logvar) * eps ----
    z = mean + jnp.exp(0.5 * logvar) * eps_ref[...].astype(jnp.float32)

    # ---- Decoder ----
    h2 = jnp.dot(z.astype(wdt), d1_w_ref[...],
                 preferred_element_type=jnp.float32)
    h2 = jnp.maximum(h2 + d1_b_ref[...], 0.0)
    logits = jnp.dot(h2.astype(wdt), d2_w_ref[...],
                     preferred_element_type=jnp.float32)
    logits = logits + d2_b_ref[...]
    if approx_sigmoid:
        # reciprocal on the (otherwise idle) EUP slot
        x_hat = pl.reciprocal(1.0 + jnp.exp(-logits), approx=True)
    else:
        x_hat = 1.0 / (1.0 + jnp.exp(-logits))

    # ---- Lane-dense packed latent slab via 128-aligned slice stores ----
    # (no jnp.concatenate temporary -> fewer live vregs / VMEM copies)
    lat_ref[:, :z_pad] = mean
    lat_ref[:, z_pad:2 * z_pad] = logvar
    lat_ref[:, 2 * z_pad:] = z
    xhat_ref[...] = x_hat.astype(xhat_ref.dtype)


def prepare_params(params, *, matmul_dtype=jnp.bfloat16):
    """One-time weight prep (hoisted out of the per-call path).

    Pads feature dims to the 128-lane width, fuses the mu/sigma heads into one
    [Hp, 2*Zp] weight, and casts weights to the matmul dtype (bf16 default:
    single-pass MXU + half the resident/streamed weight bytes).
    """
    C, H = params["enc_w"].shape
    Z = params["mu_w"].shape[1]
    Cp, Hp, Zp = _round_up(C, 128), _round_up(H, 128), _round_up(Z, 128)

    def pad_w(w, rows, cols):
        return jnp.pad(w, ((0, rows - w.shape[0]), (0, cols - w.shape[1])))

    def pad_b(b, cols):
        return jnp.pad(b, ((0, 0), (0, cols - b.shape[1])))

    enc_w = pad_w(params["enc_w"], Cp, Hp).astype(matmul_dtype)
    enc_b = pad_b(params["enc_b"], Hp).astype(jnp.float32)
    musg_w = jnp.concatenate(
        [pad_w(params["mu_w"], Hp, Zp), pad_w(params["sg_w"], Hp, Zp)], axis=1
    ).astype(matmul_dtype)
    musg_b = jnp.concatenate(
        [pad_b(params["mu_b"], Zp), pad_b(params["sg_b"], Zp)], axis=1
    ).astype(jnp.float32)
    d1_w = pad_w(params["d1_w"], Zp, Hp).astype(matmul_dtype)
    d1_b = pad_b(params["d1_b"], Hp).astype(jnp.float32)
    d2_w = pad_w(params["d2_w"], Hp, Cp).astype(matmul_dtype)
    d2_b = pad_b(params["d2_b"], Cp).astype(jnp.float32)

    weights = (enc_w, enc_b, musg_w, musg_b, d1_w, d1_b, d2_w, d2_b)
    return dict(weights=weights, dims=(C, H, Z, Cp, Hp, Zp),
                matmul_dtype=jnp.dtype(matmul_dtype))


def vae_forward(x, eps, prep, *, batch_tile=256, approx_sigmoid=True):
    """Full VAE forward pass in one pipelined Pallas call.

    x:    [B, C] float32
    eps:  [B, Z] float32 standard-normal noise (torch.randn in z_sample is
          sampled outside the kernel so the kernel stays deterministic).
    prep: output of prepare_params (padded / fused / cast weights).
    Returns (mean, logvar, z, x_hat), matching the PyTorch module.
    """
    C, H, Z, Cp, Hp, Zp = prep["dims"]
    weights = prep["weights"]
    mdt = prep["matmul_dtype"]
    B = x.shape[0]
    assert x.shape == (B, C) and eps.shape == (B, Z)

    # Batch tile: clamp to [128, 512], multiple of 128 (256+ fills the v6e/v7x
    # 256-wide MXU M-dimension), but never bigger than the padded batch needs.
    TB = max(128, min(int(batch_tile), 512))
    TB = _round_up(TB, 128)
    TB = min(TB, max(128, _round_up(B, 128)))

    n_blocks = -(-B // TB)
    if n_blocks > 1 and n_blocks % 2:
        n_blocks += 1          # even split of the "parallel" axis across v7x's 2 TCs
    Bp = n_blocks * TB

    # Activations enter the kernel in the matmul dtype (halves streaming DMA
    # on the bf16 path); all post-matmul math stays f32.
    xp = jnp.pad(x.astype(mdt), ((0, Bp - B), (0, Cp - C)))
    epsp = jnp.pad(eps.astype(mdt), ((0, Bp - B), (0, Zp - Z)))

    def batch_spec(cols):
        return pl.BlockSpec((TB, cols), lambda i: (i, 0))

    out_specs = (batch_spec(3 * Zp), batch_spec(Cp))
    out_shape = (
        jax.ShapeDtypeStruct((Bp, 3 * Zp), jnp.float32),  # packed [mean|logvar|z]
        jax.ShapeDtypeStruct((Bp, Cp), jnp.float32),      # x_hat
    )

    weight_bytes = sum(int(a.size) * a.dtype.itemsize for a in weights)
    act_in_bytes = TB * (Cp + Zp) * jnp.dtype(mdt).itemsize
    act_out_bytes = TB * (3 * Zp + Cp) * 4
    interm_bytes = TB * (2 * Hp + 2 * Zp) * 4
    vmem_cap = _vmem_cap_bytes()

    kern = functools.partial(vae_kernel, z_pad=Zp, approx_sigmoid=approx_sigmoid)

    out, last_err = None, None
    # Prefer single-buffered resident weights (constant index_map never
    # changes); fall back to default double buffering if rejected.
    for wbuf in (1, 2):
        try:
            if wbuf == 1:
                resident = [pl.BlockSpec(a.shape, lambda i: (0, 0),
                                         pipeline_mode=pl.Buffered(1))
                            for a in weights]
            else:
                resident = [pl.BlockSpec(a.shape, lambda i: (0, 0))
                            for a in weights]
            in_specs = [batch_spec(Cp), batch_spec(Zp)] + resident

            need = (wbuf * weight_bytes + 2 * (act_in_bytes + act_out_bytes)
                    + interm_bytes + (4 << 20))
            vmem_limit = max(16 << 20, min(vmem_cap, int(need)))

            out = pl.pallas_call(
                kern,
                grid=(n_blocks,),
                in_specs=in_specs,
                out_specs=out_specs,
                out_shape=out_shape,
                compiler_params=pltpu.CompilerParams(
                    dimension_semantics=("parallel",),   # megacore split
                    vmem_limit_bytes=vmem_limit,
                ),
            )(xp, epsp, *weights)
            break
        except Exception as e:  # e.g. Buffered(1) unsupported on this version
            last_err = e
    if out is None:
        raise last_err
    lat, xhat = out

    mean = lat[:B, :Z]
    logvar = lat[:B, Zp:Zp + Z]
    z = lat[:B, 2 * Zp:2 * Zp + Z]
    x_hat = xhat[:B, :C]
    return mean, logvar, z, x_hat


def init_params(key, channel, n_hidden, z_dim):
    """Deterministic synthetic parameter init (PyTorch-Linear-style uniform)."""
    keys = jax.random.split(key, 10)

    def linear(kw, kb, fan_in, fan_out):
        bound = 1.0 / jnp.sqrt(fan_in)
        # stored as [in, out] (pre-transposed relative to torch's [out, in])
        w = jax.random.uniform(kw, (fan_in, fan_out), jnp.float32, -bound, bound)
        b = jax.random.uniform(kb, (1, fan_out), jnp.float32, -bound, bound)
        return w, b

    enc_w, enc_b = linear(keys[0], keys[1], channel, n_hidden)
    mu_w, mu_b = linear(keys[2], keys[3], n_hidden, z_dim)
    sg_w, sg_b = linear(keys[4], keys[5], n_hidden, z_dim)
    d1_w, d1_b = linear(keys[6], keys[7], z_dim, n_hidden)
    d2_w, d2_b = linear(keys[8], keys[9], n_hidden, channel)

    return dict(
        enc_w=enc_w, enc_b=enc_b,
        mu_w=mu_w, mu_b=mu_b,
        sg_w=sg_w, sg_b=sg_b,
        d1_w=d1_w, d1_b=d1_b,
        d2_w=d2_w, d2_b=d2_b,
    )


def reference_forward(x, eps, p):
    """Pure-JAX reference matching the PyTorch module exactly."""
    h = jax.nn.relu(x @ p["enc_w"] + p["enc_b"])
    mean = h @ p["mu_w"] + p["mu_b"]
    logvar = jax.nn.softplus(h @ p["sg_w"] + p["sg_b"])
    z = mean + jnp.exp(0.5 * logvar) * eps
    h2 = jax.nn.relu(z @ p["d1_w"] + p["d1_b"])
    x_hat = jax.nn.sigmoid(h2 @ p["d2_w"] + p["d2_b"])
    return mean, logvar, z, x_hat


if __name__ == "__main__":
    # Small shapes consistent with the module: x is [batch, channel].
    # batch=37 exercises batch padding; the tile floor of 128 keeps the MXU
    # M-dimension filled (no more caller-driven tiny tiles).
    batch, channel, n_hidden, z_dim = 37, 64, 128, 32

    key = jax.random.PRNGKey(0)
    k_x, k_eps, k_params = jax.random.split(key, 3)

    x = jax.random.normal(k_x, (batch, channel), jnp.float32)
    # eps is sampled outside the kernel (torch.randn in z_sample), passed in
    # so the kernel stays deterministic.
    eps = jax.random.normal(k_eps, (batch, z_dim), jnp.float32)

    params = init_params(k_params, channel, n_hidden, z_dim)
    refs = reference_forward(x, eps, params)

    # --- default fast path: bf16 matmul inputs + approx-EUP sigmoid ---
    prep_bf16 = prepare_params(params)              # bf16 is the default now
    outs = jax.block_until_ready(vae_forward(x, eps, prep_bf16))
    for name, got, want in zip(("mean", "logvar", "z", "x_hat"), outs, refs):
        assert got.shape == want.shape, f"{name} shape mismatch"
        assert jnp.allclose(got, want, atol=5e-2, rtol=5e-2), f"{name} mismatch (bf16)"

    # --- exact path: f32 matmuls, exact sigmoid (tight tolerance) ---
    prep_f32 = prepare_params(params, matmul_dtype=jnp.float32)
    outs32 = jax.block_until_ready(
        vae_forward(x, eps, prep_f32, approx_sigmoid=False))
    for name, got, want in zip(("mean", "logvar", "z", "x_hat"), outs32, refs):
        assert got.shape == want.shape, f"{name} shape mismatch"
        assert jnp.allclose(got, want, atol=5e-3, rtol=5e-3), f"{name} mismatch (f32)"

    print("KERNEL_OK")
</pallas_src>

<mosaic_0001>
module attributes {stable_mosaic.version = 11 : i64} {
  func.func @vae_kernel(%arg0: i32, %arg1: memref<128x128xbf16, #tpu.memory_space<vmem>>, %arg2: memref<128x128xbf16, #tpu.memory_space<vmem>>, %arg3: memref<128x128xbf16, #tpu.memory_space<vmem>>, %arg4: memref<1x128xf32, #tpu.memory_space<vmem>>, %arg5: memref<128x256xbf16, #tpu.memory_space<vmem>>, %arg6: memref<1x256xf32, #tpu.memory_space<vmem>>, %arg7: memref<128x128xbf16, #tpu.memory_space<vmem>>, %arg8: memref<1x128xf32, #tpu.memory_space<vmem>>, %arg9: memref<128x128xbf16, #tpu.memory_space<vmem>>, %arg10: memref<1x128xf32, #tpu.memory_space<vmem>>, %arg11: memref<128x384xf32, #tpu.memory_space<vmem>>, %arg12: memref<128x128xf32, #tpu.memory_space<vmem>>) attributes {dimension_semantics = [#tpu.dimension_semantics<parallel>], iteration_bounds = array<i64: 1>, scalar_prefetch = 0 : i64, scratch_operands = 0 : i64, tpu.core_type = #tpu.core_type<tc>, window_params = [{transform_indices = @transform_0, window_bounds = array<i64: 128, 128>}, {transform_indices = @transform_1, window_bounds = array<i64: 128, 128>}, {pipeline_mode = #tpu.pipeline_mode<synchronous>, transform_indices = @transform_2, window_bounds = array<i64: 128, 128>}, {pipeline_mode = #tpu.pipeline_mode<synchronous>, transform_indices = @transform_3, window_bounds = array<i64: 1, 128>}, {pipeline_mode = #tpu.pipeline_mode<synchronous>, transform_indices = @transform_4, window_bounds = array<i64: 128, 256>}, {pipeline_mode = #tpu.pipeline_mode<synchronous>, transform_indices = @transform_5, window_bounds = array<i64: 1, 256>}, {pipeline_mode = #tpu.pipeline_mode<synchronous>, transform_indices = @transform_6, window_bounds = array<i64: 128, 128>}, {pipeline_mode = #tpu.pipeline_mode<synchronous>, transform_indices = @transform_7, window_bounds = array<i64: 1, 128>}, {pipeline_mode = #tpu.pipeline_mode<synchronous>, transform_indices = @transform_8, window_bounds = array<i64: 128, 128>}, {pipeline_mode = #tpu.pipeline_mode<synchronous>, transform_indices = @transform_9, window_bounds = array<i64: 1, 128>}, {transform_indices = @transform_10, window_bounds = array<i64: 128, 384>}, {transform_indices = @transform_11, window_bounds = array<i64: 128, 128>}]} {
    %c0 = arith.constant 0 : index
    %c0_0 = arith.constant 0 : index
    %0 = vector.load %arg1[%c0, %c0_0] : memref<128x128xbf16, #tpu.memory_space<vmem>>, vector<128x128xbf16>
    %c0_1 = arith.constant 0 : index
    %c0_2 = arith.constant 0 : index
    %1 = vector.load %arg3[%c0_1, %c0_2] : memref<128x128xbf16, #tpu.memory_space<vmem>>, vector<128x128xbf16>
    %cst = arith.constant dense<0.000000e+00> : vector<128x128xf32>
    %2 = tpu.matmul %0, %1, %cst {dimension_numbers = #tpu.dot_dimension_numbers<[1], [0], [0], [1], [0, 0, 1, 1], [], []>} : vector<128x128xbf16>, vector<128x128xbf16>, vector<128x128xf32> -> vector<128x128xf32>
    %c0_3 = arith.constant 0 : index
    %c0_4 = arith.constant 0 : index
    %3 = vector.load %arg4[%c0_3, %c0_4] : memref<1x128xf32, #tpu.memory_space<vmem>>, vector<1x128xf32>
    %4 = vector.broadcast %3 : vector<1x128xf32> to vector<128x128xf32>
    %5 = arith.addf %2, %4 : vector<128x128xf32>
    %cst_5 = arith.constant 0.000000e+00 : f32
    %6 = vector.broadcast %cst_5 : f32 to vector<128x128xf32>
    %7 = arith.maximumf %5, %6 : vector<128x128xf32>
    %8 = arith.truncf %7 : vector<128x128xf32> to vector<128x128xbf16>
    %c0_6 = arith.constant 0 : index
    %c0_7 = arith.constant 0 : index
    %9 = vector.load %arg5[%c0_6, %c0_7] : memref<128x256xbf16, #tpu.memory_space<vmem>>, vector<128x256xbf16>
    %cst_8 = arith.constant dense<0.000000e+00> : vector<128x256xf32>
    %10 = tpu.matmul %8, %9, %cst_8 {dimension_numbers = #tpu.dot_dimension_numbers<[1], [0], [0], [1], [0, 0, 1, 1], [], []>} : vector<128x128xbf16>, vector<128x256xbf16>, vector<128x256xf32> -> vector<128x256xf32>
    %c0_9 = arith.constant 0 : index
    %c0_10 = arith.constant 0 : index
    %11 = vector.load %arg6[%c0_9, %c0_10] : memref<1x256xf32, #tpu.memory_space<vmem>>, vector<1x256xf32>
    %12 = vector.broadcast %11 : vector<1x256xf32> to vector<128x256xf32>
    %13 = arith.addf %10, %12 : vector<128x256xf32>
    %14 = vector.extract_strided_slice %13 {offsets = [0, 0], sizes = [128, 128], strides = [1, 1]} : vector<128x256xf32> to vector<128x128xf32>
    %15 = vector.extract_strided_slice %13 {offsets = [0, 128], sizes = [128, 128], strides = [1, 1]} : vector<128x256xf32> to vector<128x128xf32>
    %cst_11 = arith.constant 0.000000e+00 : f32
    %16 = vector.broadcast %cst_11 : f32 to vector<128x128xf32>
    %17 = arith.maximumf %15, %16 : vector<128x128xf32>
    %18 = math.absf %15 : vector<128x128xf32>
    %cst_12 = arith.constant 0.000000e+00 : f32
    %19 = vector.broadcast %cst_12 : f32 to vector<128x128xf32>
    %20 = arith.subf %19, %18 : vector<128x128xf32>
    %21 = math.exp %20 : vector<128x128xf32>
    %22 = math.log1p %21 : vector<128x128xf32>
    %23 = arith.addf %17, %22 : vector<128x128xf32>
    %cst_13 = arith.constant 5.000000e-01 : f32
    %24 = vector.broadcast %cst_13 : f32 to vector<128x128xf32>
    %25 = arith.mulf %24, %23 : vector<128x128xf32>
    %26 = math.exp %25 : vector<128x128xf32>
    %c0_14 = arith.constant 0 : index
    %c0_15 = arith.constant 0 : index
    %27 = vector.load %arg2[%c0_14, %c0_15] : memref<128x128xbf16, #tpu.memory_space<vmem>>, vector<128x128xbf16>
    %28 = arith.extf %27 : vector<128x128xbf16> to vector<128x128xf32>
    %29 = arith.mulf %26, %28 : vector<128x128xf32>
    %30 = arith.addf %14, %29 : vector<128x128xf32>
    %31 = arith.truncf %30 : vector<128x128xf32> to vector<128x128xbf16>
    %c0_16 = arith.constant 0 : index
    %c0_17 = arith.constant 0 : index
    %32 = vector.load %arg7[%c0_16, %c0_17] : memref<128x128xbf16, #tpu.memory_space<vmem>>, vector<128x128xbf16>
    %cst_18 = arith.constant dense<0.000000e+00> : vector<128x128xf32>
    %33 = tpu.matmul %31, %32, %cst_18 {dimension_numbers = #tpu.dot_dimension_numbers<[1], [0], [0], [1], [0, 0, 1, 1], [], []>} : vector<128x128xbf16>, vector<128x128xbf16>, vector<128x128xf32> -> vector<128x128xf32>
    %c0_19 = arith.constant 0 : index
    %c0_20 = arith.constant 0 : index
    %34 = vector.load %arg8[%c0_19, %c0_20] : memref<1x128xf32, #tpu.memory_space<vmem>>, vector<1x128xf32>
    %35 = vector.broadcast %34 : vector<1x128xf32> to vector<128x128xf32>
    %36 = arith.addf %33, %35 : vector<128x128xf32>
    %cst_21 = arith.constant 0.000000e+00 : f32
    %37 = vector.broadcast %cst_21 : f32 to vector<128x128xf32>
    %38 = arith.maximumf %36, %37 : vector<128x128xf32>
    %39 = arith.truncf %38 : vector<128x128xf32> to vector<128x128xbf16>
    %c0_22 = arith.constant 0 : index
    %c0_23 = arith.constant 0 : index
    %40 = vector.load %arg9[%c0_22, %c0_23] : memref<128x128xbf16, #tpu.memory_space<vmem>>, vector<128x128xbf16>
    %cst_24 = arith.constant dense<0.000000e+00> : vector<128x128xf32>
    %41 = tpu.matmul %39, %40, %cst_24 {dimension_numbers = #tpu.dot_dimension_numbers<[1], [0], [0], [1], [0, 0, 1, 1], [], []>} : vector<128x128xbf16>, vector<128x128xbf16>, vector<128x128xf32> -> vector<128x128xf32>
    %c0_25 = arith.constant 0 : index
    %c0_26 = arith.constant 0 : index
    %42 = vector.load %arg10[%c0_25, %c0_26] : memref<1x128xf32, #tpu.memory_space<vmem>>, vector<1x128xf32>
    %43 = vector.broadcast %42 : vector<1x128xf32> to vector<128x128xf32>
    %44 = arith.addf %41, %43 : vector<128x128xf32>
    %cst_27 = arith.constant 0.000000e+00 : f32
    %45 = vector.broadcast %cst_27 : f32 to vector<128x128xf32>
    %46 = arith.subf %45, %44 : vector<128x128xf32>
    %47 = math.exp %46 : vector<128x128xf32>
    %cst_28 = arith.constant 1.000000e+00 : f32
    %48 = vector.broadcast %cst_28 : f32 to vector<128x128xf32>
    %49 = arith.addf %48, %47 : vector<128x128xf32>
    %50 = tpu.reciprocal %49 {approx = true} : vector<128x128xf32> -> vector<128x128xf32>
    %c0_29 = arith.constant 0 : index
    %c0_30 = arith.constant 0 : index
    %51 = vector.load %arg11[%c0_29, %c0_30] : memref<128x384xf32, #tpu.memory_space<vmem>>, vector<128x128xf32>
    tpu.vector_store %arg11[%c0_29, %c0_30], %14 {strides = array<i32>} : memref<128x384xf32, #tpu.memory_space<vmem>>, vector<128x128xf32>,
    %c0_31 = arith.constant 0 : index
    %c128 = arith.constant 128 : index
    %52 = vector.load %arg11[%c0_31, %c128] : memref<128x384xf32, #tpu.memory_space<vmem>>, vector<128x128xf32>
    tpu.vector_store %arg11[%c0_31, %c128], %23 {strides = array<i32>} : memref<128x384xf32, #tpu.memory_space<vmem>>, vector<128x128xf32>,
    %c0_32 = arith.constant 0 : index
    %c256 = arith.constant 256 : index
    %53 = vector.load %arg11[%c0_32, %c256] : memref<128x384xf32, #tpu.memory_space<vmem>>, vector<128x128xf32>
    tpu.vector_store %arg11[%c0_32, %c256], %30 {strides = array<i32>} : memref<128x384xf32, #tpu.memory_space<vmem>>, vector<128x128xf32>,
    %c0_33 = arith.constant 0 : index
    %c0_34 = arith.constant 0 : index
    %54 = vector.load %arg12[%c0_33, %c0_34] : memref<128x128xf32, #tpu.memory_space<vmem>>, vector<128x128xf32>
    tpu.vector_store %arg12[%c0_33, %c0_34], %50 {strides = array<i32>} : memref<128x128xf32, #tpu.memory_space<vmem>>, vector<128x128xf32>,
    return
  }
  func.func @transform_0(%arg0: i32) -> (i32, i32) {
    %c0_i32 = arith.constant 0 : i32
    %c0_i32_0 = arith.constant 0 : i32
    return %arg0, %c0_i32 : i32, i32
  }
  func.func @transform_1(%arg0: i32) -> (i32, i32) {
    %c0_i32 = arith.constant 0 : i32
    %c0_i32_0 = arith.constant 0 : i32
    return %arg0, %c0_i32 : i32, i32
  }
  func.func @transform_2(%arg0: i32) -> (i32, i32) {
    %c0_i32 = arith.constant 0 : i32
    %c0_i32_0 = arith.constant 0 : i32
    %c0_i32_1 = arith.constant 0 : i32
    return %c0_i32, %c0_i32_0 : i32, i32
  }
  func.func @transform_3(%arg0: i32) -> (i32, i32) {
    %c0_i32 = arith.constant 0 : i32
    %c0_i32_0 = arith.constant 0 : i32
    %c0_i32_1 = arith.constant 0 : i32
    return %c0_i32, %c0_i32_0 : i32, i32
  }
  func.func @transform_4(%arg0: i32) -> (i32, i32) {
    %c0_i32 = arith.constant 0 : i32
    %c0_i32_0 = arith.constant 0 : i32
    %c0_i32_1 = arith.constant 0 : i32
    return %c0_i32, %c0_i32_0 : i32, i32
  }
  func.func @transform_5(%arg0: i32) -> (i32, i32) {
    %c0_i32 = arith.constant 0 : i32
    %c0_i32_0 = arith.constant 0 : i32
    %c0_i32_1 = arith.constant 0 : i32
    return %c0_i32, %c0_i32_0 : i32, i32
  }
  func.func @transform_6(%arg0: i32) -> (i32, i32) {
    %c0_i32 = arith.constant 0 : i32
    %c0_i32_0 = arith.constant 0 : i32
    %c0_i32_1 = arith.constant 0 : i32
    return %c0_i32, %c0_i32_0 : i32, i32
  }
  func.func @transform_7(%arg0: i32) -> (i32, i32) {
    %c0_i32 = arith.constant 0 : i32
    %c0_i32_0 = arith.constant 0 : i32
    %c0_i32_1 = arith.constant 0 : i32
    return %c0_i32, %c0_i32_0 : i32, i32
  }
  func.func @transform_8(%arg0: i32) -> (i32, i32) {
    %c0_i32 = arith.constant 0 : i32
    %c0_i32_0 = arith.constant 0 : i32
    %c0_i32_1 = arith.constant 0 : i32
    return %c0_i32, %c0_i32_0 : i32, i32
  }
  func.func @transform_9(%arg0: i32) -> (i32, i32) {
    %c0_i32 = arith.constant 0 : i32
    %c0_i32_0 = arith.constant 0 : i32
    %c0_i32_1 = arith.constant 0 : i32
    return %c0_i32, %c0_i32_0 : i32, i32
  }
  func.func @transform_10(%arg0: i32) -> (i32, i32) {
    %c0_i32 = arith.constant 0 : i32
    %c0_i32_0 = arith.constant 0 : i32
    return %arg0, %c0_i32 : i32, i32
  }
  func.func @transform_11(%arg0: i32) -> (i32, i32) {
    %c0_i32 = arith.constant 0 : i32
    %c0_i32_0 = arith.constant 0 : i32
    return %arg0, %c0_i32 : i32, i32
  }
}

module attributes {stable_mosaic.version = 11 : i64} {
  func.func @vae_kernel(%arg0: i32, %arg1: memref<128x128xbf16, #tpu.memory_space<vmem>>, %arg2: memref<128x128xbf16, #tpu.memory_space<vmem>>, %arg3: memref<128x128xbf16, #tpu.memory_space<vmem>>, %arg4: memref<1x128xf32, #tpu.memory_space<vmem>>, %arg5: memref<128x256xbf16, #tpu.memory_space<vmem>>, %arg6: memref<1x256xf32, #tpu.memory_space<vmem>>, %arg7: memref<128x128xbf16, #tpu.memory_space<vmem>>, %arg8: memref<1x128xf32, #tpu.memory_space<vmem>>, %arg9: memref<128x128xbf16, #tpu.memory_space<vmem>>, %arg10: memref<1x128xf32, #tpu.memory_space<vmem>>, %arg11: memref<128x384xf32, #tpu.memory_space<vmem>>, %arg12: memref<128x128xf32, #tpu.memory_space<vmem>>) attributes {dimension_semantics = [#tpu.dimension_semantics<parallel>], iteration_bounds = array<i64: 1>, scalar_prefetch = 0 : i64, scratch_operands = 0 : i64, tpu.core_type = #tpu.core_type<tc>, window_params = [{transform_indices = @transform_0, window_bounds = array<i64: 128, 128>}, {transform_indices = @transform_1, window_bounds = array<i64: 128, 128>}, {pipeline_mode = #tpu.pipeline_mode<synchronous>, transform_indices = @transform_2, window_bounds = array<i64: 128, 128>}, {pipeline_mode = #tpu.pipeline_mode<synchronous>, transform_indices = @transform_3, window_bounds = array<i64: 1, 128>}, {pipeline_mode = #tpu.pipeline_mode<synchronous>, transform_indices = @transform_4, window_bounds = array<i64: 128, 256>}, {pipeline_mode = #tpu.pipeline_mode<synchronous>, transform_indices = @transform_5, window_bounds = array<i64: 1, 256>}, {pipeline_mode = #tpu.pipeline_mode<synchronous>, transform_indices = @transform_6, window_bounds = array<i64: 128, 128>}, {pipeline_mode = #tpu.pipeline_mode<synchronous>, transform_indices = @transform_7, window_bounds = array<i64: 1, 128>}, {pipeline_mode = #tpu.pipeline_mode<synchronous>, transform_indices = @transform_8, window_bounds = array<i64: 128, 128>}, {pipeline_mode = #tpu.pipeline_mode<synchronous>, transform_indices = @transform_9, window_bounds = array<i64: 1, 128>}, {transform_indices = @transform_10, window_bounds = array<i64: 128, 384>}, {transform_indices = @transform_11, window_bounds = array<i64: 128, 128>}]} {
    %c0 = arith.constant 0 : index
    %c0_0 = arith.constant 0 : index
    %0 = vector.load %arg1[%c0, %c0_0] : memref<128x128xbf16, #tpu.memory_space<vmem>>, vector<128x128xbf16>
    %c0_1 = arith.constant 0 : index
    %c0_2 = arith.constant 0 : index
    %1 = vector.load %arg3[%c0_1, %c0_2] : memref<128x128xbf16, #tpu.memory_space<vmem>>, vector<128x128xbf16>
    %cst = arith.constant dense<0.000000e+00> : vector<128x128xf32>
    %2 = tpu.matmul %0, %1, %cst {dimension_numbers = #tpu.dot_dimension_numbers<[1], [0], [0], [1], [0, 0, 1, 1], [], []>} : vector<128x128xbf16>, vector<128x128xbf16>, vector<128x128xf32> -> vector<128x128xf32>
    %c0_3 = arith.constant 0 : index
    %c0_4 = arith.constant 0 : index
    %3 = vector.load %arg4[%c0_3, %c0_4] : memref<1x128xf32, #tpu.memory_space<vmem>>, vector<1x128xf32>
    %4 = vector.broadcast %3 : vector<1x128xf32> to vector<128x128xf32>
    %5 = arith.addf %2, %4 : vector<128x128xf32>
    %cst_5 = arith.constant 0.000000e+00 : f32
    %6 = vector.broadcast %cst_5 : f32 to vector<128x128xf32>
    %7 = arith.maximumf %5, %6 : vector<128x128xf32>
    %8 = arith.truncf %7 : vector<128x128xf32> to vector<128x128xbf16>
    %c0_6 = arith.constant 0 : index
    %c0_7 = arith.constant 0 : index
    %9 = vector.load %arg5[%c0_6, %c0_7] : memref<128x256xbf16, #tpu.memory_space<vmem>>, vector<128x256xbf16>
    %cst_8 = arith.constant dense<0.000000e+00> : vector<128x256xf32>
    %10 = tpu.matmul %8, %9, %cst_8 {dimension_numbers = #tpu.dot_dimension_numbers<[1], [0], [0], [1], [0, 0, 1, 1], [], []>} : vector<128x128xbf16>, vector<128x256xbf16>, vector<128x256xf32> -> vector<128x256xf32>
    %c0_9 = arith.constant 0 : index
    %c0_10 = arith.constant 0 : index
    %11 = vector.load %arg6[%c0_9, %c0_10] : memref<1x256xf32, #tpu.memory_space<vmem>>, vector<1x256xf32>
    %12 = vector.broadcast %11 : vector<1x256xf32> to vector<128x256xf32>
    %13 = arith.addf %10, %12 : vector<128x256xf32>
    %14 = vector.extract_strided_slice %13 {offsets = [0, 0], sizes = [128, 128], strides = [1, 1]} : vector<128x256xf32> to vector<128x128xf32>
    %15 = vector.extract_strided_slice %13 {offsets = [0, 128], sizes = [128, 128], strides = [1, 1]} : vector<128x256xf32> to vector<128x128xf32>
    %cst_11 = arith.constant 0.000000e+00 : f32
    %16 = vector.broadcast %cst_11 : f32 to vector<128x128xf32>
    %17 = arith.maximumf %15, %16 : vector<128x128xf32>
    %18 = math.absf %15 : vector<128x128xf32>
    %cst_12 = arith.constant 0.000000e+00 : f32
    %19 = vector.broadcast %cst_12 : f32 to vector<128x128xf32>
    %20 = arith.subf %19, %18 : vector<128x128xf32>
    %21 = math.exp %20 : vector<128x128xf32>
    %22 = math.log1p %21 : vector<128x128xf32>
    %23 = arith.addf %17, %22 : vector<128x128xf32>
    %cst_13 = arith.constant 5.000000e-01 : f32
    %24 = vector.broadcast %cst_13 : f32 to vector<128x128xf32>
    %25 = arith.mulf %24, %23 : vector<128x128xf32>
    %26 = math.exp %25 : vector<128x128xf32>
    %c0_14 = arith.constant 0 : index
    %c0_15 = arith.constant 0 : index
    %27 = vector.load %arg2[%c0_14, %c0_15] : memref<128x128xbf16, #tpu.memory_space<vmem>>, vector<128x128xbf16>
    %28 = arith.extf %27 : vector<128x128xbf16> to vector<128x128xf32>
    %29 = arith.mulf %26, %28 : vector<128x128xf32>
    %30 = arith.addf %14, %29 : vector<128x128xf32>
    %31 = arith.truncf %30 : vector<128x128xf32> to vector<128x128xbf16>
    %c0_16 = arith.constant 0 : index
    %c0_17 = arith.constant 0 : index
    %32 = vector.load %arg7[%c0_16, %c0_17] : memref<128x128xbf16, #tpu.memory_space<vmem>>, vector<128x128xbf16>
    %cst_18 = arith.constant dense<0.000000e+00> : vector<128x128xf32>
    %33 = tpu.matmul %31, %32, %cst_18 {dimension_numbers = #tpu.dot_dimension_numbers<[1], [0], [0], [1], [0, 0, 1, 1], [], []>} : vector<128x128xbf16>, vector<128x128xbf16>, vector<128x128xf32> -> vector<128x128xf32>
    %c0_19 = arith.constant 0 : index
    %c0_20 = arith.constant 0 : index
    %34 = vector.load %arg8[%c0_19, %c0_20] : memref<1x128xf32, #tpu.memory_space<vmem>>, vector<1x128xf32>
    %35 = vector.broadcast %34 : vector<1x128xf32> to vector<128x128xf32>
    %36 = arith.addf %33, %35 : vector<128x128xf32>
    %cst_21 = arith.constant 0.000000e+00 : f32
    %37 = vector.broadcast %cst_21 : f32 to vector<128x128xf32>
    %38 = arith.maximumf %36, %37 : vector<128x128xf32>
    %39 = arith.truncf %38 : vector<128x128xf32> to vector<128x128xbf16>
    %c0_22 = arith.constant 0 : index
    %c0_23 = arith.constant 0 : index
    %40 = vector.load %arg9[%c0_22, %c0_23] : memref<128x128xbf16, #tpu.memory_space<vmem>>, vector<128x128xbf16>
    %cst_24 = arith.constant dense<0.000000e+00> : vector<128x128xf32>
    %41 = tpu.matmul %39, %40, %cst_24 {dimension_numbers = #tpu.dot_dimension_numbers<[1], [0], [0], [1], [0, 0, 1, 1], [], []>} : vector<128x128xbf16>, vector<128x128xbf16>, vector<128x128xf32> -> vector<128x128xf32>
    %c0_25 = arith.constant 0 : index
    %c0_26 = arith.constant 0 : index
    %42 = vector.load %arg10[%c0_25, %c0_26] : memref<1x128xf32, #tpu.memory_space<vmem>>, vector<1x128xf32>
    %43 = vector.broadcast %42 : vector<1x128xf32> to vector<128x128xf32>
    %44 = arith.addf %41, %43 : vector<128x128xf32>
    %cst_27 = arith.constant 0.000000e+00 : f32
    %45 = vector.broadcast %cst_27 : f32 to vector<128x128xf32>
    %46 = arith.subf %45, %44 : vector<128x128xf32>
    %47 = math.exp %46 : vector<128x128xf32>
    %cst_28 = arith.constant 1.000000e+00 : f32
    %48 = vector.broadcast %cst_28 : f32 to vector<128x128xf32>
    %49 = arith.addf %48, %47 : vector<128x128xf32>
    %50 = tpu.reciprocal %49 {approx = true} : vector<128x128xf32> -> vector<128x128xf32>
    %c0_29 = arith.constant 0 : index
    %c0_30 = arith.constant 0 : index
    %51 = vector.load %arg11[%c0_29, %c0_30] : memref<128x384xf32, #tpu.memory_space<vmem>>, vector<128x128xf32>
    tpu.vector_store %arg11[%c0_29, %c0_30], %14 {strides = array<i32>} : memref<128x384xf32, #tpu.memory_space<vmem>>, vector<128x128xf32>,
    %c0_31 = arith.constant 0 : index
    %c128 = arith.constant 128 : index
    %52 = vector.load %arg11[%c0_31, %c128] : memref<128x384xf32, #tpu.memory_space<vmem>>, vector<128x128xf32>
    tpu.vector_store %arg11[%c0_31, %c128], %23 {strides = array<i32>} : memref<128x384xf32, #tpu.memory_space<vmem>>, vector<128x128xf32>,
    %c0_32 = arith.constant 0 : index
    %c256 = arith.constant 256 : index
    %53 = vector.load %arg11[%c0_32, %c256] : memref<128x384xf32, #tpu.memory_space<vmem>>, vector<128x128xf32>
    tpu.vector_store %arg11[%c0_32, %c256], %30 {strides = array<i32>} : memref<128x384xf32, #tpu.memory_space<vmem>>, vector<128x128xf32>,
    %c0_33 = arith.constant 0 : index
    %c0_34 = arith.constant 0 : index
    %54 = vector.load %arg12[%c0_33, %c0_34] : memref<128x128xf32, #tpu.memory_space<vmem>>, vector<128x128xf32>
    tpu.vector_store %arg12[%c0_33, %c0_34], %50 {strides = array<i32>} : memref<128x128xf32, #tpu.memory_space<vmem>>, vector<128x128xf32>,
    return
  }
  func.func @transform_0(%arg0: i32) -> (i32, i32) {
    %c0_i32 = arith.constant 0 : i32
    %c0_i32_0 = arith.constant 0 : i32
    return %arg0, %c0_i32 : i32, i32
  }
  func.func @transform_1(%arg0: i32) -> (i32, i32) {
    %c0_i32 = arith.constant 0 : i32
    %c0_i32_0 = arith.constant 0 : i32
    return %arg0, %c0_i32 : i32, i32
  }
  func.func @transform_2(%arg0: i32) -> (i32, i32) {
    %c0_i32 = arith.constant 0 : i32
    %c0_i32_0 = arith.constant 0 : i32
    %c0_i32_1 = arith.constant 0 : i32
    return %c0_i32, %c0_i32_0 : i32, i32
  }
  func.func @transform_3(%arg0: i32) -> (i32, i32) {
    %c0_i32 = arith.constant 0 : i32
    %c0_i32_0 = arith.constant 0 : i32
    %c0_i32_1 = arith.constant 0 : i32
    return %c0_i32, %c0_i32_0 : i32, i32
  }
  func.func @transform_4(%arg0: i32) -> (i32, i32) {
    %c0_i32 = arith.constant 0 : i32
    %c0_i32_0 = arith.constant 0 : i32
    %c0_i32_1 = arith.constant 0 : i32
    return %c0_i32, %c0_i32_0 : i32, i32
  }
  func.func @transform_5(%arg0: i32) -> (i32, i32) {
    %c0_i32 = arith.constant 0 : i32
    %c0_i32_0 = arith.constant 0 : i32
    %c0_i32_1 = arith.constant 0 : i32
    return %c0_i32, %c0_i32_0 : i32, i32
  }
  func.func @transform_6(%arg0: i32) -> (i32, i32) {
    %c0_i32 = arith.constant 0 : i32
    %c0_i32_0 = arith.constant 0 : i32
    %c0_i32_1 = arith.constant 0 : i32
    return %c0_i32, %c0_i32_0 : i32, i32
  }
  func.func @transform_7(%arg0: i32) -> (i32, i32) {
    %c0_i32 = arith.constant 0 : i32
    %c0_i32_0 = arith.constant 0 : i32
    %c0_i32_1 = arith.constant 0 : i32
    return %c0_i32, %c0_i32_0 : i32, i32
  }
  func.func @transform_8(%arg0: i32) -> (i32, i32) {
    %c0_i32 = arith.constant 0 : i32
    %c0_i32_0 = arith.constant 0 : i32
    %c0_i32_1 = arith.constant 0 : i32
    return %c0_i32, %c0_i32_0 : i32, i32
  }
  func.func @transform_9(%arg0: i32) -> (i32, i32) {
    %c0_i32 = arith.constant 0 : i32
    %c0_i32_0 = arith.constant 0 : i32
    %c0_i32_1 = arith.constant 0 : i32
    return %c0_i32, %c0_i32_0 : i32, i32
  }
  func.func @transform_10(%arg0: i32) -> (i32, i32) {
    %c0_i32 = arith.constant 0 : i32
    %c0_i32_0 = arith.constant 0 : i32
    return %arg0, %c0_i32 : i32, i32
  }
  func.func @transform_11(%arg0: i32) -> (i32, i32) {
    %c0_i32 = arith.constant 0 : i32
    %c0_i32_0 = arith.constant 0 : i32
    return %arg0, %c0_i32 : i32, i32
  }
}

</mosaic_0001>

<bundles_post_ra>
// kernel: tpu_custom_call.1
= control target key start
LH: loop header
LB: loop body
LE: loop exit
PB: predicated region body
PF: predicated region fallthrough
CT: control target
= control target key end

     0   :  { %17 = vsyncpa [#allocation3], 0  ;;  %s2351_s0 = inlined_call_operand.hbm [shape: bf16[128,128], index: 0, kind: input, shape index: {}]   ;;  %s2352_s1 = inlined_call_operand.hbm [shape: bf16[128,128], index: 1, kind: input, shape index: {}]   ;;  %s2353_s2 = inlined_call_operand.hbm [shape: bf16[128,128], index: 2, kind: input, shape index: {}]   ;;  %s2354_s3 = inlined_call_operand.vmem [shape: f32[1,128], index: 3, kind: input, shape index: {}]   ;;  %s2355_s4 = inlined_call_operand.hbm [shape: bf16[128,256], index: 4, kind: input, shape index: {}]   ;;  %s2356_s5 = inlined_call_operand.vmem [shape: f32[1,256], index: 5, kind: input, shape index: {}]   ;;  %s2357_s6 = inlined_call_operand.hbm [shape: bf16[128,128], index: 6, kind: input, shape index: {}]   ;;  %s2358_s7 = inlined_call_operand.vmem [shape: f32[1,128], index: 7, kind: input, shape index: {}]   ;;  %s2359_s8 = inlined_call_operand.hbm [shape: bf16[128,128], index: 8, kind: input, shape index: {}]   ;;  %s2360_s9 = inlined_call_operand.vmem [shape: f32[1,128], index: 9, kind: input, shape index: {}]   ;;  %s2361_s10 = inlined_call_operand.hbm [shape: f32[128,384], index: 10, kind: output, shape index: {0}]   ;;  %s2362_s11 = inlined_call_operand.hbm [shape: f32[128,128], index: 11, kind: output, shape index: {1}]  }
   0x1   :  { %18 = vsyncpa [#allocation6], 0 }
   0x2   :  { %19 = vsyncpa [#allocation9], 0 }
   0x3   :  { %20 = vsyncpa [#allocation12], 0 }
   0x4   :  { %21 = vsyncpa [#allocation4], 0 }
   0x5   :  { %22 = vsyncpa [#allocation15], 0  ;;  %s40_s19 = sshll.u32 %s2352_s1, 4  ;;  %s2024_s20 = smov [#allocation5]   ;;  %s41_s19 = int_to_ptr.hbm [resolvable:$true] %s40_s19 }
   0x6   :  { %s42_s21 = sshll.u32 %s2024_s20, 4  ;;  %s68_s24 = sshll.u32 %s2355_s4, 4  ;;  %s43_s21 = int_to_ptr.vmem [resolvable:$true] %s42_s21  ;;  %s69_s24 = int_to_ptr.hbm [resolvable:$true] %s68_s24 }
   0x7   :  { %s2025_s25 = smov 64   ;;  %s2026_s26 = smov 4  }
   0x8   :  { %48 = dma.hbm_to_vmem [thread:$0]  %s41_s19, 1024, %s43_s21, [#allocation6], %s2025_s25, %s2025_s25, %s2026_s26  }
   0x9   :  { %s2027_s27 = smov [#allocation8]   ;;  %s2028_s29 = smov 128  }
   0xa   :  { %s70_s28 = sshll.u32 %s2027_s27, 4  ;;  %s2029_s1 = smov 8   ;;  %s71_s28 = int_to_ptr.vmem [resolvable:$true] %s70_s28 }
   0xb   :  { %76 = dma.hbm_to_vmem [thread:$0]  %s69_s24, 2048, %s71_s28, [#allocation9], %s2028_s29, %s2028_s29, %s2029_s1  }
   0xc   :  { %s27_s4 = sshll.u32 %s2351_s0, 4  ;;  %s2030_s13 = smov [#allocation2]   ;;  %s28_s4 = int_to_ptr.hbm [resolvable:$true] %s27_s4 }
   0xd   :  { %s29_s14 = sshll.u32 %s2030_s13, 4  ;;  %s53_s17 = sshll.u32 %s2353_s2, 4  ;;  %s30_s14 = int_to_ptr.vmem [resolvable:$true] %s29_s14  ;;  %s54_s17 = int_to_ptr.hbm [resolvable:$true] %s53_s17 }
   0xe   :  { %35 = dma.hbm_to_vmem [thread:$0]  %s28_s4, 1024, %s30_s14, [#allocation3], %s2025_s25, %s2025_s25, %s2026_s26  }
   0xf   :  { %s2031_s18 = smov [#allocation7]   ;;  %s83_s22 = sshll.u32 %s2357_s6, 4  ;;  %s84_s22 = int_to_ptr.hbm [resolvable:$true] %s83_s22 }
  0x10   :  { %s55_s19 = sshll.u32 %s2031_s18, 4  ;;  %s98_s2 = sshll.u32 %s2359_s8, 4  ;;  %s56_s19 = int_to_ptr.vmem [resolvable:$true] %s55_s19  ;;  %s99_s2 = int_to_ptr.hbm [resolvable:$true] %s98_s2 }
  0x11   :  { %61 = dma.hbm_to_vmem [thread:$0]  %s54_s17, 1024, %s56_s19, [#allocation6], %s2025_s25, %s2025_s25, %s2026_s26  }
  0x12   :  { %s2032_s24 = smov [#allocation10]   ;;  %s2033_s28 = smov [#allocation11]  }
  0x13   :  { %s85_s27 = sshll.u32 %s2032_s24, 4  ;;  %s100_s6 = sshll.u32 %s2033_s28, 4  ;;  %s86_s27 = int_to_ptr.vmem [resolvable:$true] %s85_s27  ;;  %s101_s6 = int_to_ptr.vmem [resolvable:$true] %s100_s6 }
  0x14   :  { %91 = dma.hbm_to_vmem [thread:$0]  %s84_s22, 1024, %s86_s27, [#allocation9], %s2025_s25, %s2025_s25, %s2026_s26  }
  0x15   :  { %106 = dma.hbm_to_vmem [thread:$0]  %s99_s2, 1024, %s101_s6, [#allocation12], %s2025_s25, %s2025_s25, %s2026_s26  }
  0x16   :  { %2012 = dma.done.wait [#allocation3], 1024  }
  0x17   :  { %2013 = vsyncadd [#allocation3], 4294966272 }
  0x18   :  { %2014 = dma.done.wait [#allocation6], 2048  }
  0x19   :  { %2015 = vsyncadd [#allocation6], 4294965248 }
  0x1a   :  { %2016 = dma.done.wait [#allocation9], 3072  }
  0x1b   :  { %2017 = vsyncadd [#allocation9], 4294964224 }
  0x1c   :  { %2018 = dma.done.wait [#allocation12], 1024  }
  0x1d   :  { %2019 = vsyncadd [#allocation12], 4294966272  ;;  %v1547_v0 = vld [vmem:[#allocation7 + $0x38] sm:$0xff]  ;;  %v1546_v1 = vld [vmem:[#allocation7 + $0x30] sm:$0xff]  ;;  %s1306_s14 = sshll.u32 %s2361_s10, 4  ;;  %s2035_s16 = smov 384   ;;  %s1307_s14 = int_to_ptr.hbm [resolvable:$true] %s1306_s14 }
  0x1e   :  { %265 = vmatpush.bf16.msra.mxu0 %v1547_v0  ;;  %1619 = vmatpush.bf16.msra.mxu1 %v1547_v0  ;;  %v1545_v2 = vld [vmem:[#allocation7 + $0x28] sm:$0xff]  ;;  %v1544_v3 = vld [vmem:[#allocation7 + $0x20] sm:$0xff]  ;;  %v1543_v4 = vld [vmem:[#allocation7 + $0x18] sm:$0xff]  ;;  %s2036_s17 = smov 24   ;;  %s2037_s10 = smov [#allocation14]  }
  0x1f   :  { %1620 = vmatpush.bf16.msra.mxu2 %v1547_v0  ;;  %1621 = vmatpush.bf16.msra.mxu3 %v1547_v0  ;;  %v1542_v5 = vld [vmem:[#allocation7 + $0x10] sm:$0xff]  ;;  %v1541_v6 = vld [vmem:[#allocation7 + $0x8] sm:$0xff]  ;;  %v1464_v8 = vld [vmem:[#allocation8 + $0x78] sm:$0xf0]  ;;  %s1317_s18 = sshll.u32 %s2037_s10, 4  ;;  %s1319_s21 = sshll.u32 %s2362_s11, 4  ;;  %s1318_s18 = int_to_ptr.vmem [resolvable:$true] %s1317_s18  ;;  %s1320_s21 = int_to_ptr.hbm [resolvable:$true] %s1319_s21 }
  0x20   :  { %v1562_v7 = vld [vmem:[#allocation8 + $0x74] sm:$0xf]  ;;  %v1462_v9 = vld [vmem:[#allocation8 + $0x70] sm:$0xf]  ;;  %v1563_v10 = vld [vmem:[#allocation8 + $0x74] sm:$0xf0] }
  0x21   :  { %v1540_v11 = vld [vmem:[#allocation7] sm:$0xff]  ;;  %v1534_v13 = vld [vmem:[#allocation2 + $0x10] sm:$0xff]  ;;  %v1467_v14 = vor.u32 %v1562_v7, %v1464_v8  ;;  %v1463_v15 = vor.u32 %v1563_v10, %v1462_v9  ;;  %v1456_v17 = vld [vmem:[#allocation8 + $0x68] sm:$0xf0] }
  0x22   :  { %266 = vmatpush.bf16.msra.mxu0 %v1546_v1  ;;  %1622 = vmatpush.bf16.msra.mxu1 %v1546_v1  ;;  %v1532_v12 = vld [vmem:[#allocation2] sm:$0xff]  ;;  %v1561_v19 = vld [vmem:[#allocation8 + $0x64] sm:$0xf0]  ;;  %v1538_v21 = vld [vmem:[#allocation2 + $0x30] sm:$0xff] }
  0x23   :  { %1623 = vmatpush.bf16.msra.mxu2 %v1546_v1  ;;  %1624 = vmatpush.bf16.msra.mxu3 %v1546_v1  ;;  %v1560_v16 = vld [vmem:[#allocation8 + $0x64] sm:$0xf]  ;;  %v1454_v18 = vld [vmem:[#allocation8 + $0x60] sm:$0xf]  ;;  %v1558_v24 = vld [vmem:[#allocation8 + $0x54] sm:$0xf] }
  0x24   :  { %v1536_v20 = vld [vmem:[#allocation2 + $0x20] sm:$0xff]  ;;  %v1459_v22 = vor.u32 %v1560_v16, %v1456_v17  ;;  %v1455_v23 = vor.u32 %v1561_v19, %v1454_v18  ;;  %v1448_v25 = vld [vmem:[#allocation8 + $0x58] sm:$0xf0]  ;;  %v1446_v26 = vld [vmem:[#allocation8 + $0x50] sm:$0xf] }
  0x25   :  { %v1559_v27 = vld [vmem:[#allocation8 + $0x54] sm:$0xf0]  ;;  %v1451_v28 = vor.u32 %v1558_v24, %v1448_v25  ;;  %v1556_v30 = vld [vmem:[#allocation8 + $0x44] sm:$0xf]  ;;  %v1440_v31 = vld [vmem:[#allocation8 + $0x48] sm:$0xf0] }
  0x26   :  { %267 = vmatpush.bf16.msra.mxu0 %v1545_v2  ;;  %1625 = vmatpush.bf16.msra.mxu1 %v1545_v2  ;;  %v1447_v29 = vor.u32 %v1559_v27, %v1446_v26  ;;  %v1438_v32 = vld [vmem:[#allocation8 + $0x40] sm:$0xf]  ;;  %v1557_v33 = vld [vmem:[#allocation8 + $0x44] sm:$0xf0]  ;;  %v1443_v34 = vor.u32 %v1556_v30, %v1440_v31  ;;  %v1554_v36 = vld [vmem:[#allocation8 + $0x34] sm:$0xf] }
  0x27   :  { %1626 = vmatpush.bf16.msra.mxu2 %v1545_v2  ;;  %1627 = vmatpush.bf16.msra.mxu3 %v1545_v2  ;;  %v1439_v35 = vor.u32 %v1557_v33, %v1438_v32  ;;  %v1432_v37 = vld [vmem:[#allocation8 + $0x38] sm:$0xf0]  ;;  %v1533_v39 = vld [vmem:[#allocation2 + $0x8] sm:$0xff]  ;;  %v1430_v43 = vld [vmem:[#allocation8 + $0x30] sm:$0xf] }
  0x28   :  { %v1435_v38 = vor.u32 %v1554_v36, %v1432_v37  ;;  %v1535_v40 = vld [vmem:[#allocation2 + $0x18] sm:$0xff]  ;;  %v1537_v41 = vld [vmem:[#allocation2 + $0x28] sm:$0xff]  ;;  %v1552_v46 = vld [vmem:[#allocation8 + $0x24] sm:$0xf] }
  0x29   :  { %v1539_v42 = vld [vmem:[#allocation2 + $0x38] sm:$0xff]  ;;  %v1424_v47 = vld [vmem:[#allocation8 + $0x28] sm:$0xf0]  ;;  %v1422_v48 = vld [vmem:[#allocation8 + $0x20] sm:$0xf] }
  0x2a   :  { %268 = vmatpush.bf16.msra.mxu0 %v1544_v3  ;;  %1628 = vmatpush.bf16.msra.mxu1 %v1544_v3  ;;  %v1555_v44 = vld [vmem:[#allocation8 + $0x34] sm:$0xf0]  ;;  %v1427_v49 = vor.u32 %v1552_v46, %v1424_v47  ;;  %v1553_v50 = vld [vmem:[#allocation8 + $0x24] sm:$0xf0]  ;;  %v1550_v52 = vld [vmem:[#allocation8 + $0x14] sm:$0xf] }
  0x2b   :  { %1629 = vmatpush.bf16.msra.mxu2 %v1544_v3  ;;  %1630 = vmatpush.bf16.msra.mxu3 %v1544_v3  ;;  %v1431_v45 = vor.u32 %v1555_v44, %v1430_v43  ;;  %v1423_v51 = vor.u32 %v1553_v50, %v1422_v48  ;;  %v1416_v53 = vld [vmem:[#allocation8 + $0x18] sm:$0xf0]  ;;  %v1414_v55 = vld [vmem:[#allocation8 + $0x10] sm:$0xf]  ;;  %v1551_v56 = vld [vmem:[#allocation8 + $0x14] sm:$0xf0] }
  0x2c   :  { %v1419_v54 = vor.u32 %v1550_v52, %v1416_v53  ;;  %v1415_v57 = vor.u32 %v1551_v56, %v1414_v55  ;;  %v1548_v58 = vld [vmem:[#allocation8 + $0x4] sm:$0xf]  ;;  %v1408_v59 = vld [vmem:[#allocation8 + $0x8] sm:$0xf0]  ;;  %v1406_v60 = vld [vmem:[#allocation8] sm:$0xf] }
  0x2d   :  { %v1411_v61 = vor.u32 %v1548_v58, %v1408_v59  ;;  %v1549_v62 = vld [vmem:[#allocation8 + $0x4] sm:$0xf0]  ;;  %v2137_v1 = vld [vmem:[%s2354_s3] ss:$0 sm:$0xff]  ;;  %v1571_v59 = vld [vmem:[#allocation10 + $0x38] sm:$0xff] }
  0x2e   :  { %269 = vmatpush.bf16.msra.mxu0 %v1543_v4  ;;  %1631 = vmatpush.bf16.msra.mxu1 %v1543_v4  ;;  %v1407_v63 = vor.u32 %v1549_v62, %v1406_v60  ;;  %v1570_v62 = vld [vmem:[#allocation10 + $0x30] sm:$0xff] }
  0x2f   :  { %1632 = vmatpush.bf16.msra.mxu2 %v1543_v4  ;;  %1633 = vmatpush.bf16.msra.mxu3 %v1543_v4 }
  0x32   :  { %270 = vmatpush.bf16.msra.mxu0 %v1542_v5  ;;  %1634 = vmatpush.bf16.msra.mxu1 %v1542_v5 }
  0x33   :  { %1635 = vmatpush.bf16.msra.mxu2 %v1542_v5  ;;  %1636 = vmatpush.bf16.msra.mxu3 %v1542_v5 }
  0x36   :  { %271 = vmatpush.bf16.msra.mxu0 %v1541_v6  ;;  %1637 = vmatpush.bf16.msra.mxu1 %v1541_v6 }
  0x37   :  { %1638 = vmatpush.bf16.msra.mxu2 %v1541_v6  ;;  %1639 = vmatpush.bf16.msra.mxu3 %v1541_v6 }
  0x3a   :  { %272 = vmatpush.bf16.msra.mxu0 %v1540_v11  ;;  %1640 = vmatpush.bf16.msra.mxu1 %v1540_v11 }
  0x3b   :  { %1641 = vmatpush.bf16.msra.mxu2 %v1540_v11  ;;  %1642 = vmatpush.bf16.msra.mxu3 %v1540_v11 }
  0x3d   :  { %273 = vmatmul.bf16.vlgmr.msra.gmra.mxu0 %v1532_v12  ;;  %283 = vmatmul.bf16.vlgmr.msra.gmra.mxu1 %v1534_v13 }
  0x3e   :  { %440 = vmatpush.bf16.msrb.mxu1 %v1463_v15  ;;  %293 = vmatmul.bf16.vlgmr.msra.gmra.mxu2 %v1536_v20 }
  0x3f   :  { %489 = vmatpush.bf16.msrb.mxu2 %v1467_v14  ;;  %303 = vmatmul.bf16.vlgmr.msra.gmra.mxu3 %v1538_v21 }
  0x40   :  { %966 = vmatpush.bf16.msrb.mxu3 %v1571_v59 }
  0x42   :  { %441 = vmatpush.bf16.msrb.mxu1 %v1455_v23 }
  0x43   :  { %490 = vmatpush.bf16.msrb.mxu2 %v1459_v22 }
  0x44   :  { %967 = vmatpush.bf16.msrb.mxu3 %v1570_v62 }
  0x46   :  { %442 = vmatpush.bf16.msrb.mxu1 %v1447_v29 }
  0x47   :  { %491 = vmatpush.bf16.msrb.mxu2 %v1451_v28 }
  0x4a   :  { %443 = vmatpush.bf16.msrb.mxu1 %v1439_v35 }
  0x4b   :  { %492 = vmatpush.bf16.msrb.mxu2 %v1443_v34 }
  0x4d   :  { %278 = vmatmul.bf16.gmra.mxu0 %v1533_v39  ;;  %288 = vmatmul.bf16.gmra.mxu1 %v1535_v40 }
  0x4e   :  { %298 = vmatmul.bf16.gmra.mxu2 %v1537_v41  ;;  %444 = vmatpush.bf16.msrb.mxu1 %v1431_v45 }
  0x4f   :  { %493 = vmatpush.bf16.msrb.mxu2 %v1435_v38  ;;  %308 = vmatmul.bf16.gmra.mxu3 %v1539_v42 }
  0x52   :  { %445 = vmatpush.bf16.msrb.mxu1 %v1423_v51 }
  0x53   :  { %494 = vmatpush.bf16.msrb.mxu2 %v1427_v49 }
  0x56   :  { %446 = vmatpush.bf16.msrb.mxu1 %v1415_v57  ;;  %v354_v57 = vld [vmem:[%s2356_s5] sm:$0x3] }
  0x57   :  { %495 = vmatpush.bf16.msrb.mxu2 %v1419_v54  ;;  %v2158_v58 = vperm.slane %v354_v57, 0 }
  0x5a   :  { %447 = vmatpush.bf16.msrb.mxu1 %v1407_v63  ;;  %v2164_v63 = vperm.slane %v354_v57, 1 }
  0x5b   :  { %496 = vmatpush.bf16.msrb.mxu2 %v1411_v61 }
  0xba   :  { %v274_v0 = vpop.f32.mrf.mxu0  ;;  %v284_v9 = vpop.f32.mrf.mxu1 }
  0xbb   :  { %v275_v2 = vadd.f32 %v2137_v1, %v274_v0  ;;  %v285_v17 = vadd.f32 %v2137_v1, %v284_v9  ;;  %v1569_v0 = vld [vmem:[#allocation10 + $0x28] sm:$0xff] }
  0xbc   :  { %968 = vmatpush.bf16.msrb.mxu3 %v1569_v0 }
  0xbd   :  { %v314_v5 = vmax.f32 %v275_v2, 0.0  ;;  %v318_v20 = vmax.f32 %v285_v17, 0.0 }
  0xc1   :  { %v294_v24 = vpop.f32.mrf.mxu2 }
  0xc2   :  { %v276_v3 = vpop.f32.mrf.mxu0  ;;  %v286_v16 = vpop.f32.mrf.mxu1  ;;  %v295_v31 = vadd.f32 %v2137_v1, %v294_v24 }
  0xc3   :  { %v277_v4 = vadd.f32 %v2137_v1, %v276_v3  ;;  %v287_v18 = vadd.f32 %v2137_v1, %v286_v16  ;;  %v304_v38 = vpop.f32.mrf.mxu3 }
  0xc4   :  { %v322_v34 = vmax.f32 %v295_v31, 0.0  ;;  %v305_v45 = vadd.f32 %v2137_v1, %v304_v38 }
  0xc5   :  { %v315_v6 = vmax.f32 %v277_v4, 0.0  ;;  %v319_v21 = vmax.f32 %v287_v18, 0.0 }
  0xc6   :  { %v326_v48 = vmax.f32 %v305_v45, 0.0 }
  0xc7   :  { %v330_v7 = vpack.c.bf16 %v315_v6, %v314_v5  ;;  %v332_v22 = vpack.c.bf16 %v319_v21, %v318_v20  ;;  %v1568_v6 = vld [vmem:[#allocation10 + $0x20] sm:$0xff] }
  0xc8   :  { %969 = vmatpush.bf16.msrb.mxu3 %v1568_v6 }
  0xc9   :  { %448 = vmatmul.bf16.vlgmr.msrb.gmra.mxu1 %v330_v7  ;;  %497 = vmatmul.bf16.vlgmr.msrb.gmra.mxu2 %v330_v7  ;;  %v296_v30 = vpop.f32.mrf.mxu2 }
  0xca   :  { %v279_v8 = vpop.f32.mrf.mxu0  ;;  %v289_v19 = vpop.f32.mrf.mxu1  ;;  %v297_v32 = vadd.f32 %v2137_v1, %v296_v30 }
  0xcb   :  { %v280_v10 = vadd.f32 %v2137_v1, %v279_v8  ;;  %v290_v25 = vadd.f32 %v2137_v1, %v289_v19  ;;  %v306_v44 = vpop.f32.mrf.mxu3 }
  0xcc   :  { %v323_v35 = vmax.f32 %v297_v32, 0.0  ;;  %v307_v46 = vadd.f32 %v2137_v1, %v306_v44 }
  0xcd   :  { %v316_v13 = vmax.f32 %v280_v10, 0.0  ;;  %v320_v27 = vmax.f32 %v290_v25, 0.0  ;;  %v1567_v10 = vld [vmem:[#allocation10 + $0x18] sm:$0xff] }
  0xce   :  { %v334_v36 = vpack.c.bf16 %v323_v35, %v322_v34  ;;  %v327_v49 = vmax.f32 %v307_v46, 0.0  ;;  %970 = vmatpush.bf16.msrb.mxu3 %v1567_v10 }
  0xd0   :  { %v336_v50 = vpack.c.bf16 %v327_v49, %v326_v48 }
  0xd1   :  { %v299_v33 = vpop.f32.mrf.mxu2 }
  0xd2   :  { %v281_v11 = vpop.f32.mrf.mxu0  ;;  %v291_v23 = vpop.f32.mrf.mxu1  ;;  %v300_v39 = vadd.f32 %v2137_v1, %v299_v33 }
  0xd3   :  { %v282_v12 = vadd.f32 %v2137_v1, %v281_v11  ;;  %v292_v26 = vadd.f32 %v2137_v1, %v291_v23  ;;  %v309_v47 = vpop.f32.mrf.mxu3 }
  0xd4   :  { %v324_v41 = vmax.f32 %v300_v39, 0.0  ;;  %v310_v52 = vadd.f32 %v2137_v1, %v309_v47 }
  0xd5   :  { %v317_v14 = vmax.f32 %v282_v12, 0.0  ;;  %v321_v28 = vmax.f32 %v292_v26, 0.0 }
  0xd6   :  { %v328_v54 = vmax.f32 %v310_v52, 0.0 }
  0xd7   :  { %v331_v15 = vpack.c.bf16 %v317_v14, %v316_v13  ;;  %v333_v29 = vpack.c.bf16 %v321_v28, %v320_v27  ;;  %v1564_v28 = vld [vmem:[#allocation10] sm:$0xff] }
  0xd9   :  { %453 = vmatmul.bf16.gmra.mxu1 %v331_v15  ;;  %502 = vmatmul.bf16.gmra.mxu2 %v331_v15  ;;  %v301_v37 = vpop.f32.mrf.mxu2  ;;  %v1566_v15 = vld [vmem:[#allocation10 + $0x10] sm:$0xff] }
  0xda   :  { %v302_v40 = vadd.f32 %v2137_v1, %v301_v37  ;;  %971 = vmatpush.bf16.msrb.mxu3 %v1566_v15 }
  0xdb   :  { %v311_v51 = vpop.f32.mrf.mxu3 }
  0xdc   :  { %v325_v42 = vmax.f32 %v302_v40, 0.0  ;;  %v312_v53 = vadd.f32 %v2137_v1, %v311_v51 }
  0xde   :  { %v335_v43 = vpack.c.bf16 %v325_v42, %v324_v41  ;;  %v329_v55 = vmax.f32 %v312_v53, 0.0 }
  0xe0   :  { %v337_v56 = vpack.c.bf16 %v329_v55, %v328_v54 }
  0xe9   :  { %458 = vmatmul.bf16.gmra.mxu1 %v332_v22  ;;  %507 = vmatmul.bf16.gmra.mxu2 %v332_v22  ;;  %v1565_v22 = vld [vmem:[#allocation10 + $0x8] sm:$0xff] }
  0xea   :  { %972 = vmatpush.bf16.msrb.mxu3 %v1565_v22 }
  0xee   :  { %973 = vmatpush.bf16.msrb.mxu3 %v1564_v28 }
  0xf9   :  { %463 = vmatmul.bf16.gmra.mxu1 %v333_v29  ;;  %512 = vmatmul.bf16.gmra.mxu2 %v333_v29 }
 0x109   :  { %468 = vmatmul.bf16.gmra.mxu1 %v334_v36  ;;  %517 = vmatmul.bf16.gmra.mxu2 %v334_v36 }
 0x119   :  { %473 = vmatmul.bf16.gmra.mxu1 %v335_v43  ;;  %522 = vmatmul.bf16.gmra.mxu2 %v335_v43 }
 0x129   :  { %478 = vmatmul.bf16.gmra.mxu1 %v336_v50  ;;  %527 = vmatmul.bf16.gmra.mxu2 %v336_v50 }
 0x139   :  { %483 = vmatmul.bf16.gmra.mxu1 %v337_v56  ;;  %532 = vmatmul.bf16.gmra.mxu2 %v337_v56 }
 0x146   :  { %v449_v60 = vpop.f32.mrf.mxu1 }
 0x147   :  { %v2161_v61 = vadd.f32 %v449_v60, %v2158_v58 }
 0x149   :  { %1236 = vst [vmem:[#allocation13] sm:$0xff] %v2161_v61 }
 0x14c   :  { %v498_v1 = vpop.f32.mrf.mxu2 }
 0x14d   :  { %v499_v2 = vadd.f32 %v498_v1, %v2164_v63  ;;  %v1581_v1 = vld [vmem:[#allocation5] sm:$0xff]  }
 0x14e   :  { %v451_v3 = vpop.f32.mrf.mxu1 }
 0x14f   :  { %v554_v4 = vand.u32 2147483647, %v499_v2  ;;  %v2168_v5 = vadd.f32 %v451_v3, %v2158_v58  ;;  %v538_v40 = vmax.f32 %v499_v2, 0.0 }
 0x151   :  { %v570_v7 = vsub.f32 0.0, %v554_v4  ;;  %1237 = vst [vmem:[#allocation13 + $0x18] sm:$0xff] %v2168_v5 }
 0x153   :  { %v586_v8 = vmul.f32 1.442695, %v570_v7 }
 0x154   :  { %v500_v9 = vpop.f32.mrf.mxu2 }
 0x155   :  { %1660 = vpow2.f32 %v586_v8  ;;  %v2172_v11 = vadd.f32 %v500_v9, %v2164_v63  ;;  %v1582_v8 = vunpack.c.l.bf16 %v1581_v1 }
 0x156   :  { %v454_v12 = vpop.f32.mrf.mxu1 }
 0x157   :  { %v555_v13 = vand.u32 2147483647, %v2172_v11  ;;  %v2176_v14 = vadd.f32 %v454_v12, %v2158_v58  ;;  %v539_v60 = vmax.f32 %v2172_v11, 0.0 }
 0x159   :  { %v571_v16 = vsub.f32 0.0, %v555_v13  ;;  %1238 = vst [vmem:[#allocation13 + $0x30] sm:$0xff] %v2176_v14 }
 0x15b   :  { %v1661_v17 = vpop.eup %1660  ;;  %v588_v18 = vmul.f32 1.442695, %v571_v16 }
 0x15c   :  { %v618_v19 = vadd.f32 1.0, %v1661_v17  ;;  %v621_v20 = vmul.f32 -0.5, %v1661_v17  ;;  %v503_v21 = vpop.f32.mrf.mxu2  ;;  %v624_v30 = vand.u32 2147483647, %v1661_v17 }
 0x15d   :  { %1662 = vpow2.f32 %v588_v18  ;;  %v2180_v23 = vadd.f32 %v503_v21, %v2164_v63 }
 0x15e   :  { %1664 = vlog2.f32 %v618_v19  ;;  %v456_v24 = vpop.f32.mrf.mxu1  ;;  %v622_v27 = vadd.f32 1.0, %v621_v20  ;;  %vm625_vm0 = vcmp.lt.f32.partialorder %v624_v30, 0.0004427343 }
 0x15f   :  { %v556_v25 = vand.u32 2147483647, %v2180_v23  ;;  %v2184_v26 = vadd.f32 %v456_v24, %v2158_v58  ;;  %v540_v20 = vmax.f32 %v2180_v23, 0.0 }
 0x160   :  { %v623_v34 = vmul.f32 %v1661_v17, %v622_v27 }
 0x161   :  { %v572_v29 = vsub.f32 0.0, %v556_v25  ;;  %1239 = vst [vmem:[#allocation13 + $0x48] sm:$0xff] %v2184_v26 }
 0x163   :  { %v1663_v31 = vpop.eup %1662  ;;  %v590_v32 = vmul.f32 1.442695, %v572_v29 }
 0x164   :  { %v1665_v33 = vpop.eup %1664  ;;  %v627_v35 = vadd.f32 1.0, %v1663_v31  ;;  %v505_v36 = vpop.f32.mrf.mxu2  ;;  %v630_v38 = vmul.f32 -0.5, %v1663_v31  ;;  %v633_v49 = vand.u32 2147483647, %v1663_v31 }
 0x165   :  { %v620_v37 = vmul.f32 0.6931472, %v1665_v33  ;;  %1666 = vpow2.f32 %v590_v32  ;;  %v2188_v39 = vadd.f32 %v505_v36, %v2164_v63 }
 0x166   :  { %1668 = vlog2.f32 %v627_v35  ;;  %v459_v41 = vpop.f32.mrf.mxu1  ;;  %v631_v46 = vadd.f32 1.0, %v630_v38  ;;  %vm634_vm1 = vcmp.lt.f32.partialorder %v633_v49, 0.0004427343 }
 0x167   :  { %v626_v42 = vsel %vm625_vm0, %v623_v34, %v620_v37  ;;  %v557_v43 = vand.u32 2147483647, %v2188_v39  ;;  %v2192_v44 = vadd.f32 %v459_v41, %v2158_v58  ;;  %v1583_v34 = vunpack.c.h.bf16 %v1581_v1 }
 0x168   :  { %v762_v45 = vadd.f32 %v626_v42, %v538_v40  ;;  %v632_v57 = vmul.f32 %v1663_v31, %v631_v46  ;;  %v541_v49 = vmax.f32 %v2188_v39, 0.0 }
 0x169   :  { %v573_v47 = vsub.f32 0.0, %v557_v43  ;;  %1240 = vst [vmem:[#allocation13 + $0x60] sm:$0xff] %v2192_v44 }
 0x16a   :  { %v778_v48 = vmul.f32 0.5, %v762_v45  ;;  %1252 = vst [vmem:[#allocation13 + $0x8] sm:$0xff] %v762_v45 }
 0x16b   :  { %v1667_v50 = vpop.eup %1666  ;;  %v592_v51 = vmul.f32 1.442695, %v573_v47 }
 0x16c   :  { %v1669_v52 = vpop.eup %1668  ;;  %v794_v53 = vmul.f32 1.442695, %v778_v48  ;;  %v636_v54 = vadd.f32 1.0, %v1667_v50  ;;  %v508_v55 = vpop.f32.mrf.mxu2  ;;  %v639_v62 = vmul.f32 -0.5, %v1667_v50  ;;  %v642_v13 = vand.u32 2147483647, %v1667_v50 }
 0x16d   :  { %v629_v56 = vmul.f32 0.6931472, %v1669_v52  ;;  %1670 = vpow2.f32 %v592_v51  ;;  %v2196_v59 = vadd.f32 %v508_v55, %v2164_v63  ;;  %v1612_v55 = vld [vmem:[#allocation5 + $0x8] sm:$0xff]  }
 0x16e   :  { %1672 = vpow2.f32 %v794_v53  ;;  %v461_v0 = vpop.f32.mrf.mxu1  ;;  %v640_v10 = vadd.f32 1.0, %v639_v62  ;;  %vm643_vm2 = vcmp.lt.f32.partialorder %v642_v13, 0.0004427343 }
 0x16f   :  { %v635_v2 = vsel %vm634_vm1, %v632_v57, %v629_v56  ;;  %1674 = vlog2.f32 %v636_v54  ;;  %v558_v3 = vand.u32 2147483647, %v2196_v59  ;;  %v2201_v6 = vadd.f32 %v461_v0, %v2158_v58 }
 0x170   :  { %v763_v4 = vadd.f32 %v635_v2, %v539_v60  ;;  %v641_v25 = vmul.f32 %v1667_v50, %v640_v10  ;;  %v1586_v2 = vunpack.c.l.bf16 %v1612_v55 }
 0x171   :  { %v574_v7 = vsub.f32 0.0, %v558_v3  ;;  %1241 = vst [vmem:[#allocation13 + $0x78] sm:$0xff] %v2201_v6 }
 0x172   :  { %v779_v9 = vmul.f32 0.5, %v763_v4  ;;  %1253 = vst [vmem:[#allocation13 + $0x20] sm:$0xff] %v763_v4 }
 0x173   :  { %v1671_v12 = vpop.eup %1670  ;;  %v594_v11 = vmul.f32 1.442695, %v574_v7 }
 0x174   :  { %v1673_v15 = vpop.eup %1672  ;;  %v796_v16 = vmul.f32 1.442695, %v779_v9  ;;  %v645_v17 = vadd.f32 1.0, %v1671_v12  ;;  %v510_v18 = vpop.f32.mrf.mxu2  ;;  %v648_v27 = vmul.f32 -0.5, %v1671_v12  ;;  %v651_v38 = vand.u32 2147483647, %v1671_v12 }
 0x175   :  { %v1675_v19 = vpop.eup %1674  ;;  %1676 = vpow2.f32 %v594_v11  ;;  %v2206_v21 = vadd.f32 %v510_v18, %v2164_v63  ;;  %v858_v22 = vmul.f32 %v1673_v15, %v1582_v8 }
 0x176   :  { %1678 = vpow2.f32 %v796_v16  ;;  %v638_v24 = vmul.f32 0.6931472, %v1675_v19  ;;  %v464_v28 = vpop.f32.mrf.mxu1  ;;  %v649_v35 = vadd.f32 1.0, %v648_v27  ;;  %vm652_vm3 = vcmp.lt.f32.partialorder %v651_v38, 0.0004427343 }
 0x177   :  { %1680 = vlog2.f32 %v645_v17  ;;  %v559_v29 = vand.u32 2147483647, %v2206_v21  ;;  %v2210_v30 = vadd.f32 %v464_v28, %v2158_v58  ;;  %v874_v23 = vadd.f32 %v858_v22, %v2161_v61 }
 0x178   :  { %v644_v31 = vsel %vm643_vm2, %v641_v25, %v638_v24  ;;  %v650_v51 = vmul.f32 %v1671_v12, %v649_v35  ;;  %v542_v17 = vmax.f32 %v2196_v59, 0.0  ;;  %v1587_v59 = vunpack.c.h.bf16 %v1612_v55 }
 0x179   :  { %v764_v32 = vadd.f32 %v644_v31, %v540_v20  ;;  %v575_v33 = vsub.f32 0.0, %v559_v29  ;;  %1242 = vst [vmem:[#allocation13 + $0x90] sm:$0xff] %v2210_v30 }
 0x17a   :  { %1268 = vst [vmem:[#allocation13 + $0x10] sm:$0xff] %v874_v23 }
 0x17b   :  { %v1677_v36 = vpop.eup %1676  ;;  %v780_v37 = vmul.f32 0.5, %v764_v32  ;;  %1254 = vst [vmem:[#allocation13 + $0x38] sm:$0xff] %v764_v32  ;;  %v596_v40 = vmul.f32 1.442695, %v575_v33 }
 0x17c   :  { %v1679_v41 = vpop.eup %1678  ;;  %v654_v42 = vadd.f32 1.0, %v1677_v36  ;;  %v657_v43 = vmul.f32 -0.5, %v1677_v36  ;;  %v513_v45 = vpop.f32.mrf.mxu2  ;;  %v660_v39 = vand.u32 2147483647, %v1677_v36 }
 0x17d   :  { %v1681_v46 = vpop.eup %1680  ;;  %v798_v47 = vmul.f32 1.442695, %v780_v37  ;;  %1682 = vpow2.f32 %v596_v40  ;;  %v2215_v61 = vadd.f32 %v513_v45, %v2164_v63  ;;  %v859_v48 = vmul.f32 %v1679_v41, %v1583_v34 }
 0x17e   :  { %v647_v50 = vmul.f32 0.6931472, %v1681_v46  ;;  %1684 = vlog2.f32 %v654_v42  ;;  %v466_v52 = vpop.f32.mrf.mxu1  ;;  %v658_v57 = vadd.f32 1.0, %v657_v43  ;;  %vm661_vm4 = vcmp.lt.f32.partialorder %v660_v39, 0.0004427343 }
 0x17f   :  { %1686 = vpow2.f32 %v798_v47  ;;  %v560_v53 = vand.u32 2147483647, %v2215_v61  ;;  %v2220_v54 = vadd.f32 %v466_v52, %v2158_v58  ;;  %v875_v60 = vadd.f32 %v859_v48, %v2168_v5  ;;  %v1613_v47 = vld [vmem:[#allocation5 + $0x10] sm:$0xff]  }
 0x180   :  { %v653_v56 = vsel %vm652_vm3, %v650_v51, %v647_v50  ;;  %v659_v9 = vmul.f32 %v1677_v36, %v658_v57  ;;  %v543_v36 = vmax.f32 %v2206_v21, 0.0 }
 0x181   :  { %v765_v62 = vadd.f32 %v653_v56, %v541_v49  ;;  %v576_v0 = vsub.f32 0.0, %v560_v53  ;;  %1243 = vst [vmem:[#allocation13 + $0xa8] sm:$0xff] %v2220_v54  ;;  %v890_v1 = vpack.c.bf16 %v875_v60, %v874_v23  ;;  %v1590_v53 = vunpack.c.l.bf16 %v1613_v47 }
 0x182   :  { %1269 = vst [vmem:[#allocation13 + $0x28] sm:$0xff] %v875_v60 }
 0x183   :  { %v1683_v3 = vpop.eup %1682  ;;  %v781_v4 = vmul.f32 0.5, %v765_v62  ;;  %1255 = vst [vmem:[#allocation13 + $0x50] sm:$0xff] %v765_v62  ;;  %v598_v7 = vmul.f32 1.442695, %v576_v0  ;;  %974 = vmatmul.bf16.vlgmr.msrb.gmra.mxu3 %v890_v1 }
 0x184   :  { %v1685_v8 = vpop.eup %1684  ;;  %v663_v10 = vadd.f32 1.0, %v1683_v3  ;;  %v666_v12 = vmul.f32 -0.5, %v1683_v3  ;;  %v515_v13 = vpop.f32.mrf.mxu2  ;;  %v669_v23 = vand.u32 2147483647, %v1683_v3 }
 0x185   :  { %v1687_v11 = vpop.eup %1686  ;;  %v800_v5 = vmul.f32 1.442695, %v781_v4  ;;  %v656_v15 = vmul.f32 0.6931472, %v1685_v8  ;;  %1688 = vpow2.f32 %v598_v7  ;;  %v2225_v16 = vadd.f32 %v515_v13, %v2164_v63 }
 0x186   :  { %1690 = vlog2.f32 %v663_v10  ;;  %v469_v18 = vpop.f32.mrf.mxu1  ;;  %v860_v19 = vmul.f32 %v1687_v11, %v1586_v2  ;;  %v667_v27 = vadd.f32 1.0, %v666_v12  ;;  %vm670_vm5 = vcmp.lt.f32.partialorder %v669_v23, 0.0004427343 }
 0x187   :  { %1692 = vpow2.f32 %v800_v5  ;;  %v662_v20 = vsel %vm661_vm4, %v659_v9, %v656_v15  ;;  %v561_v22 = vand.u32 2147483647, %v2225_v16  ;;  %v2230_v25 = vadd.f32 %v469_v18, %v2158_v58 }
 0x188   :  { %v766_v24 = vadd.f32 %v662_v20, %v542_v17  ;;  %v876_v29 = vadd.f32 %v860_v19, %v2176_v14  ;;  %v668_v42 = vmul.f32 %v1683_v3, %v667_v27  ;;  %v544_v7 = vmax.f32 %v2215_v61, 0.0 }
 0x189   :  { %v577_v28 = vsub.f32 0.0, %v561_v22  ;;  %1244 = vst [vmem:[#allocation13 + $0xc0] sm:$0xff] %v2230_v25  ;;  %v1591_v19 = vunpack.c.h.bf16 %v1613_v47 }
 0x18a   :  { %v782_v31 = vmul.f32 0.5, %v766_v24  ;;  %1256 = vst [vmem:[#allocation13 + $0x68] sm:$0xff] %v766_v24 }
 0x18b   :  { %v1689_v32 = vpop.eup %1688  ;;  %v600_v33 = vmul.f32 1.442695, %v577_v28  ;;  %1270 = vst [vmem:[#allocation13 + $0x40] sm:$0xff] %v876_v29 }
 0x18c   :  { %v1691_v34 = vpop.eup %1690  ;;  %v802_v35 = vmul.f32 1.442695, %v782_v31  ;;  %v672_v37 = vadd.f32 1.0, %v1689_v32  ;;  %v518_v38 = vpop.f32.mrf.mxu2  ;;  %v675_v43 = vmul.f32 -0.5, %v1689_v32  ;;  %v678_v62 = vand.u32 2147483647, %v1689_v32 }
 0x18d   :  { %v1693_v40 = vpop.eup %1692  ;;  %v665_v41 = vmul.f32 0.6931472, %v1691_v34  ;;  %1694 = vpow2.f32 %v600_v33  ;;  %v2236_v14 = vadd.f32 %v518_v38, %v2164_v63 }
 0x18e   :  { %1696 = vpow2.f32 %v802_v35  ;;  %v471_v45 = vpop.f32.mrf.mxu1  ;;  %v861_v46 = vmul.f32 %v1693_v40, %v1587_v59  ;;  %v676_v56 = vadd.f32 1.0, %v675_v43  ;;  %vm679_vm6 = vcmp.lt.f32.partialorder %v678_v62, 0.0004427343 }
 0x18f   :  { %v671_v48 = vsel %vm670_vm5, %v668_v42, %v665_v41  ;;  %1698 = vlog2.f32 %v672_v37  ;;  %v562_v21 = vand.u32 2147483647, %v2236_v14  ;;  %v2240_v50 = vadd.f32 %v471_v45, %v2158_v58  ;;  %v1614_v42 = vld [vmem:[#allocation5 + $0x18] sm:$0xff]  }
 0x190   :  { %v767_v49 = vadd.f32 %v671_v48, %v543_v36  ;;  %v877_v51 = vadd.f32 %v861_v46, %v2184_v26  ;;  %v677_v10 = vmul.f32 %v1689_v32, %v676_v56  ;;  %v545_v35 = vmax.f32 %v2225_v16, 0.0 }
 0x191   :  { %v578_v52 = vsub.f32 0.0, %v562_v21  ;;  %1245 = vst [vmem:[#allocation13 + $0xd8] sm:$0xff] %v2240_v50 }
 0x192   :  { %v783_v55 = vmul.f32 0.5, %v767_v49  ;;  %1257 = vst [vmem:[#allocation13 + $0x80] sm:$0xff] %v767_v49  ;;  %v891_v57 = vpack.c.bf16 %v877_v51, %v876_v29  ;;  %v1594_v49 = vunpack.c.l.bf16 %v1614_v42 }
 0x193   :  { %v1695_v60 = vpop.eup %1694  ;;  %v602_v0 = vmul.f32 1.442695, %v578_v52  ;;  %1271 = vst [vmem:[#allocation13 + $0x58] sm:$0xff] %v877_v51 }
 0x194   :  { %v1697_v39 = vpop.eup %1696  ;;  %v804_v1 = vmul.f32 1.442695, %v783_v55  ;;  %v681_v2 = vadd.f32 1.0, %v1695_v60  ;;  %979 = vmatmul.bf16.gmra.mxu3 %v891_v57  ;;  %v520_v3 = vpop.f32.mrf.mxu2  ;;  %v684_v12 = vmul.f32 -0.5, %v1695_v60  ;;  %v687_v27 = vand.u32 2147483647, %v1695_v60 }
 0x195   :  { %v1699_v4 = vpop.eup %1698  ;;  %1700 = vpow2.f32 %v602_v0  ;;  %v2246_v26 = vadd.f32 %v520_v3, %v2164_v63  ;;  %v862_v8 = vmul.f32 %v1697_v39, %v1590_v53 }
 0x196   :  { %1702 = vpow2.f32 %v804_v1  ;;  %v674_v9 = vmul.f32 0.6931472, %v1699_v4  ;;  %v474_v13 = vpop.f32.mrf.mxu1  ;;  %v685_v20 = vadd.f32 1.0, %v684_v12  ;;  %vm688_vm7 = vcmp.lt.f32.partialorder %v687_v27, 0.0004427343 }
 0x197   :  { %1704 = vlog2.f32 %v681_v2  ;;  %v563_v11 = vand.u32 2147483647, %v2246_v26  ;;  %v2250_v5 = vadd.f32 %v474_v13, %v2158_v58  ;;  %v878_v61 = vadd.f32 %v862_v8, %v2192_v44 }
 0x198   :  { %v680_v15 = vsel %vm679_vm6, %v677_v10, %v674_v9  ;;  %v686_v37 = vmul.f32 %v1695_v60, %v685_v20  ;;  %v546_v2 = vmax.f32 %v2236_v14, 0.0  ;;  %v1595_v14 = vunpack.c.h.bf16 %v1614_v42 }
 0x199   :  { %v768_v17 = vadd.f32 %v680_v15, %v544_v7  ;;  %v579_v18 = vsub.f32 0.0, %v563_v11  ;;  %1246 = vst [vmem:[#allocation13 + $0xf0] sm:$0xff] %v2250_v5 }
 0x19a   :  { %1272 = vst [vmem:[#allocation13 + $0x70] sm:$0xff] %v878_v61 }
 0x19b   :  { %v1701_v22 = vpop.eup %1700  ;;  %v784_v24 = vmul.f32 0.5, %v768_v17  ;;  %1258 = vst [vmem:[#allocation13 + $0x98] sm:$0xff] %v768_v17  ;;  %v604_v28 = vmul.f32 1.442695, %v579_v18 }
 0x19c   :  { %v1703_v29 = vpop.eup %1702  ;;  %v690_v31 = vadd.f32 1.0, %v1701_v22  ;;  %v693_v23 = vmul.f32 -0.5, %v1701_v22  ;;  %v523_v59 = vpop.f32.mrf.mxu2  ;;  %v696_v16 = vand.u32 2147483647, %v1701_v22 }
 0x19d   :  { %v1705_v32 = vpop.eup %1704  ;;  %v806_v33 = vmul.f32 1.442695, %v784_v24  ;;  %1706 = vpow2.f32 %v604_v28  ;;  %v2255_v44 = vadd.f32 %v523_v59, %v2164_v63  ;;  %v863_v34 = vmul.f32 %v1703_v29, %v1591_v19 }
 0x19e   :  { %v683_v36 = vmul.f32 0.6931472, %v1705_v32  ;;  %1708 = vlog2.f32 %v690_v31  ;;  %v476_v38 = vpop.f32.mrf.mxu1  ;;  %v694_v45 = vadd.f32 1.0, %v693_v23  ;;  %vm697_vm8 = vcmp.lt.f32.partialorder %v696_v16, 0.0004427343 }
 0x19f   :  { %1710 = vpow2.f32 %v806_v33  ;;  %v564_v40 = vand.u32 2147483647, %v2255_v44  ;;  %v2260_v41 = vadd.f32 %v476_v38, %v2158_v58  ;;  %v879_v46 = vadd.f32 %v863_v34, %v2201_v6  ;;  %v1615_v33 = vld [vmem:[#allocation5 + $0x20] sm:$0xff]  }
 0x1a0   :  { %v689_v43 = vsel %vm688_vm7, %v686_v37, %v683_v36  ;;  %v695_v56 = vmul.f32 %v1701_v22, %v694_v45  ;;  %v547_v22 = vmax.f32 %v2246_v26, 0.0 }
 0x1a1   :  { %v769_v47 = vadd.f32 %v689_v43, %v545_v35  ;;  %v580_v48 = vsub.f32 0.0, %v564_v40  ;;  %1247 = vst [vmem:[#allocation13 + $0x108] sm:$0xff] %v2260_v41  ;;  %v892_v21 = vpack.c.bf16 %v879_v46, %v878_v61  ;;  %v1598_v40 = vunpack.c.l.bf16 %v1615_v33 }
 0x1a2   :  { %1273 = vst [vmem:[#allocation13 + $0x88] sm:$0xff] %v879_v46 }
 0x1a3   :  { %v1707_v51 = vpop.eup %1706  ;;  %v785_v52 = vmul.f32 0.5, %v769_v47  ;;  %1259 = vst [vmem:[#allocation13 + $0xb0] sm:$0xff] %v769_v47  ;;  %v606_v53 = vmul.f32 1.442695, %v580_v48 }
 0x1a4   :  { %v1709_v55 = vpop.eup %1708  ;;  %v699_v57 = vadd.f32 1.0, %v1707_v51  ;;  %v702_v60 = vmul.f32 -0.5, %v1707_v51  ;;  %984 = vmatmul.bf16.gmra.mxu3 %v892_v21  ;;  %v525_v62 = vpop.f32.mrf.mxu2  ;;  %v705_v61 = vand.u32 2147483647, %v1707_v51 }
 0x1a5   :  { %v1711_v0 = vpop.eup %1710  ;;  %v808_v6 = vmul.f32 1.442695, %v785_v52  ;;  %v692_v39 = vmul.f32 0.6931472, %v1709_v55  ;;  %1712 = vpow2.f32 %v606_v53  ;;  %v2265_v1 = vadd.f32 %v525_v62, %v2164_v63 }
 0x1a6   :  { %1714 = vlog2.f32 %v699_v57  ;;  %v479_v3 = vpop.f32.mrf.mxu1  ;;  %v864_v4 = vmul.f32 %v1711_v0, %v1594_v49  ;;  %v703_v12 = vadd.f32 1.0, %v702_v60  ;;  %vm706_vm9 = vcmp.lt.f32.partialorder %v705_v61, 0.0004427343 }
 0x1a7   :  { %1716 = vpow2.f32 %v808_v6  ;;  %v698_v7 = vsel %vm697_vm8, %v695_v56, %v692_v39  ;;  %v565_v8 = vand.u32 2147483647, %v2265_v1  ;;  %v2270_v10 = vadd.f32 %v479_v3, %v2158_v58 }
 0x1a8   :  { %v770_v9 = vadd.f32 %v698_v7, %v546_v2  ;;  %v880_v11 = vadd.f32 %v864_v4, %v2210_v30  ;;  %v704_v31 = vmul.f32 %v1707_v51, %v703_v12  ;;  %v548_v53 = vmax.f32 %v2255_v44, 0.0 }
 0x1a9   :  { %v581_v13 = vsub.f32 0.0, %v565_v8  ;;  %1248 = vst [vmem:[#allocation13 + $0x120] sm:$0xff] %v2270_v10  ;;  %v1599_v4 = vunpack.c.h.bf16 %v1615_v33 }
 0x1aa   :  { %v786_v15 = vmul.f32 0.5, %v770_v9  ;;  %1260 = vst [vmem:[#allocation13 + $0xc8] sm:$0xff] %v770_v9 }
 0x1ab   :  { %v1713_v17 = vpop.eup %1712  ;;  %v608_v18 = vmul.f32 1.442695, %v581_v13  ;;  %1274 = vst [vmem:[#allocation13 + $0xa0] sm:$0xff] %v880_v11 }
 0x1ac   :  { %v1715_v19 = vpop.eup %1714  ;;  %v810_v20 = vmul.f32 1.442695, %v786_v15  ;;  %v708_v24 = vadd.f32 1.0, %v1713_v17  ;;  %v528_v27 = vpop.f32.mrf.mxu2  ;;  %v711_v23 = vmul.f32 -0.5, %v1713_v17  ;;  %v714_v47 = vand.u32 2147483647, %v1713_v17 }
 0x1ad   :  { %v1717_v28 = vpop.eup %1716  ;;  %v701_v29 = vmul.f32 0.6931472, %v1715_v19  ;;  %1718 = vpow2.f32 %v608_v18  ;;  %v2276_v30 = vadd.f32 %v528_v27, %v2164_v63 }
 0x1ae   :  { %1720 = vpow2.f32 %v810_v20  ;;  %v481_v59 = vpop.f32.mrf.mxu1  ;;  %v865_v32 = vmul.f32 %v1717_v28, %v1595_v14  ;;  %v712_v43 = vadd.f32 1.0, %v711_v23  ;;  %vm715_vm10 = vcmp.lt.f32.partialorder %v714_v47, 0.0004427343 }
 0x1af   :  { %v707_v34 = vsel %vm706_vm9, %v704_v31, %v701_v29  ;;  %1722 = vlog2.f32 %v708_v24  ;;  %v566_v26 = vand.u32 2147483647, %v2276_v30  ;;  %v2280_v36 = vadd.f32 %v481_v59, %v2158_v58  ;;  %v1616_v31 = vld [vmem:[#allocation5 + $0x28] sm:$0xff]  }
 0x1b0   :  { %v771_v35 = vadd.f32 %v707_v34, %v547_v22  ;;  %v881_v37 = vadd.f32 %v865_v32, %v2220_v54  ;;  %v713_v57 = vmul.f32 %v1713_v17, %v712_v43  ;;  %v549_v20 = vmax.f32 %v2265_v1, 0.0 }
 0x1b1   :  { %v582_v38 = vsub.f32 0.0, %v566_v26  ;;  %1249 = vst [vmem:[#allocation13 + $0x138] sm:$0xff] %v2280_v36 }
 0x1b2   :  { %v787_v42 = vmul.f32 0.5, %v771_v35  ;;  %1261 = vst [vmem:[#allocation13 + $0xe0] sm:$0xff] %v771_v35  ;;  %v893_v45 = vpack.c.bf16 %v881_v37, %v880_v11  ;;  %v1602_v35 = vunpack.c.l.bf16 %v1616_v31 }
 0x1b3   :  { %v1719_v46 = vpop.eup %1718  ;;  %v610_v48 = vmul.f32 1.442695, %v582_v38  ;;  %1275 = vst [vmem:[#allocation13 + $0xb8] sm:$0xff] %v881_v37 }
 0x1b4   :  { %v1721_v16 = vpop.eup %1720  ;;  %v812_v21 = vmul.f32 1.442695, %v787_v42  ;;  %v717_v49 = vadd.f32 1.0, %v1719_v46  ;;  %989 = vmatmul.bf16.gmra.mxu3 %v893_v45  ;;  %v530_v51 = vpop.f32.mrf.mxu2  ;;  %v720_v60 = vmul.f32 -0.5, %v1719_v46  ;;  %v723_v12 = vand.u32 2147483647, %v1719_v46 }
 0x1b5   :  { %v1723_v52 = vpop.eup %1722  ;;  %1724 = vpow2.f32 %v610_v48  ;;  %v2286_v54 = vadd.f32 %v530_v51, %v2164_v63  ;;  %v866_v55 = vmul.f32 %v1721_v16, %v1598_v40 }
 0x1b6   :  { %1726 = vpow2.f32 %v812_v21  ;;  %v710_v56 = vmul.f32 0.6931472, %v1723_v52  ;;  %v484_v62 = vpop.f32.mrf.mxu1  ;;  %v721_v7 = vadd.f32 1.0, %v720_v60  ;;  %vm724_vm11 = vcmp.lt.f32.partialorder %v723_v12, 0.0004427343  ;;  %v1617_v12 = vld [vmem:[#allocation5 + $0x30] sm:$0xff]  }
 0x1b7   :  { %1728 = vlog2.f32 %v717_v49  ;;  %v567_v0 = vand.u32 2147483647, %v2286_v54  ;;  %v2290_v6 = vadd.f32 %v484_v62, %v2158_v58  ;;  %v882_v44 = vadd.f32 %v866_v55, %v2230_v25 }
 0x1b8   :  { %v716_v39 = vsel %vm715_vm10, %v713_v57, %v710_v56  ;;  %v722_v24 = vmul.f32 %v1719_v46, %v721_v7  ;;  %v550_v21 = vmax.f32 %v2276_v30, 0.0 }
 0x1b9   :  { %v772_v2 = vadd.f32 %v716_v39, %v548_v53  ;;  %v583_v3 = vsub.f32 0.0, %v567_v0  ;;  %1250 = vst [vmem:[#allocation13 + $0x150] sm:$0xff] %v2290_v6  ;;  %v1603_v0 = vunpack.c.h.bf16 %v1616_v31  ;;  %v1579_v31 = vld [vmem:[#allocation11 + $0x38] sm:$0xff] }
 0x1ba   :  { %1276 = vst [vmem:[#allocation13 + $0xd0] sm:$0xff] %v882_v44  ;;  %1107 = vmatpush.bf16.msrb.mxu0 %v1579_v31 }
 0x1bb   :  { %v1725_v8 = vpop.eup %1724  ;;  %v788_v9 = vmul.f32 0.5, %v772_v2  ;;  %1262 = vst [vmem:[#allocation13 + $0xf8] sm:$0xff] %v772_v2  ;;  %v612_v13 = vmul.f32 1.442695, %v583_v3 }
 0x1bc   :  { %v1727_v11 = vpop.eup %1726  ;;  %v726_v15 = vadd.f32 1.0, %v1725_v8  ;;  %v729_v61 = vmul.f32 -0.5, %v1725_v8  ;;  %v533_v14 = vpop.f32.mrf.mxu2  ;;  %v732_v1 = vand.u32 2147483647, %v1725_v8 }
 0x1bd   :  { %v1729_v17 = vpop.eup %1728  ;;  %v814_v18 = vmul.f32 1.442695, %v788_v9  ;;  %1730 = vpow2.f32 %v612_v13  ;;  %v2295_v25 = vadd.f32 %v533_v14, %v2164_v63  ;;  %v867_v19 = vmul.f32 %v1727_v11, %v1599_v4 }
 0x1be   :  { %v719_v22 = vmul.f32 0.6931472, %v1729_v17  ;;  %1732 = vlog2.f32 %v726_v15  ;;  %v486_v27 = vpop.f32.mrf.mxu1  ;;  %v730_v59 = vadd.f32 1.0, %v729_v61  ;;  %vm733_vm12 = vcmp.lt.f32.partialorder %v732_v1, 0.0004427343 }
 0x1bf   :  { %1734 = vpow2.f32 %v814_v18  ;;  %v568_v28 = vand.u32 2147483647, %v2295_v25  ;;  %v2300_v29 = vadd.f32 %v486_v27, %v2158_v58  ;;  %v883_v32 = vadd.f32 %v867_v19, %v2240_v50 }
 0x1c0   :  { %v725_v23 = vsel %vm724_vm11, %v722_v24, %v719_v22  ;;  %v731_v58 = vmul.f32 %v1725_v8, %v730_v59  ;;  %v551_v4 = vmax.f32 %v2286_v54, 0.0  ;;  %v1606_v61 = vunpack.c.l.bf16 %v1617_v12 }
 0x1c1   :  { %v773_v33 = vadd.f32 %v725_v23, %v549_v20  ;;  %v584_v34 = vsub.f32 0.0, %v568_v28  ;;  %1251 = vst [vmem:[#allocation13 + $0x168] sm:$0xff] %v2300_v29  ;;  %v894_v26 = vpack.c.bf16 %v883_v32, %v882_v44 }
 0x1c2   :  { %1277 = vst [vmem:[#allocation13 + $0xe8] sm:$0xff] %v883_v32 }
 0x1c3   :  { %v1731_v37 = vpop.eup %1730  ;;  %v789_v38 = vmul.f32 0.5, %v773_v33  ;;  %1263 = vst [vmem:[#allocation13 + $0x110] sm:$0xff] %v773_v33  ;;  %v614_v40 = vmul.f32 1.442695, %v584_v34  ;;  %v1578_v34 = vld [vmem:[#allocation11 + $0x30] sm:$0xff] }
 0x1c4   :  { %v1733_v42 = vpop.eup %1732  ;;  %v735_v43 = vadd.f32 1.0, %v1731_v37  ;;  %v738_v45 = vmul.f32 -0.5, %v1731_v37  ;;  %994 = vmatmul.bf16.gmra.mxu3 %v894_v26  ;;  %v535_v46 = vpop.f32.mrf.mxu2  ;;  %v741_v62 = vand.u32 2147483647, %v1731_v37  ;;  %1108 = vmatpush.bf16.msrb.mxu0 %v1578_v34 }
 0x1c5   :  { %v1735_v47 = vpop.eup %1734  ;;  %v816_v50 = vmul.f32 1.442695, %v789_v38  ;;  %v728_v48 = vmul.f32 0.6931472, %v1733_v42  ;;  %1736 = vpow2.f32 %v614_v40  ;;  %v2305_v16 = vadd.f32 %v535_v46, %v2164_v63  ;;  %v1577_v42 = vld [vmem:[#allocation11 + $0x28] sm:$0xff] }
 0x1c6   :  { %1738 = vlog2.f32 %v735_v43  ;;  %v868_v49 = vmul.f32 %v1735_v47, %v1602_v35  ;;  %v739_v56 = vadd.f32 1.0, %v738_v45  ;;  %vm742_vm13 = vcmp.lt.f32.partialorder %v741_v62, 0.0004427343 }
 0x1c7   :  { %1740 = vpow2.f32 %v816_v50  ;;  %v734_v51 = vsel %vm733_vm12, %v731_v58, %v728_v48  ;;  %v569_v52 = vand.u32 2147483647, %v2305_v16  ;;  %v1607_v35 = vunpack.c.h.bf16 %v1617_v12  ;;  %v1618_v48 = vld [vmem:[#allocation5 + $0x38] sm:$0xff]  }
 0x1c8   :  { %v774_v53 = vadd.f32 %v734_v51, %v550_v21  ;;  %v884_v55 = vadd.f32 %v868_v49, %v2250_v5  ;;  %v740_v8 = vmul.f32 %v1731_v37, %v739_v56  ;;  %1109 = vmatpush.bf16.msrb.mxu0 %v1577_v42  ;;  %v1576_v21 = vld [vmem:[#allocation11 + $0x20] sm:$0xff]  ;;  %v1575_v56 = vld [vmem:[#allocation11 + $0x18] sm:$0xff] }
 0x1c9   :  { %v585_v57 = vsub.f32 0.0, %v569_v52 }
 0x1ca   :  { %v790_v60 = vmul.f32 0.5, %v774_v53  ;;  %1264 = vst [vmem:[#allocation13 + $0x128] sm:$0xff] %v774_v53  ;;  %v1610_v53 = vunpack.c.l.bf16 %v1618_v48 }
 0x1cb   :  { %v1737_v63 = vpop.eup %1736  ;;  %v616_v39 = vmul.f32 1.442695, %v585_v57  ;;  %1278 = vst [vmem:[#allocation13 + $0x100] sm:$0xff] %v884_v55 }
 0x1cc   :  { %v1739_v30 = vpop.eup %1738  ;;  %v818_v44 = vmul.f32 1.442695, %v790_v60  ;;  %v744_v2 = vadd.f32 1.0, %v1737_v63  ;;  %v747_v5 = vmul.f32 -0.5, %v1737_v63  ;;  %v750_v54 = vand.u32 2147483647, %v1737_v63  ;;  %1110 = vmatpush.bf16.msrb.mxu0 %v1576_v21 }
 0x1cd   :  { %v1741_v3 = vpop.eup %1740  ;;  %v737_v7 = vmul.f32 0.6931472, %v1739_v30  ;;  %1742 = vpow2.f32 %v616_v39 }
 0x1ce   :  { %1744 = vpow2.f32 %v818_v44  ;;  %v869_v9 = vmul.f32 %v1741_v3, %v1603_v0  ;;  %v748_v17 = vadd.f32 1.0, %v747_v5  ;;  %vm751_vm14 = vcmp.lt.f32.partialorder %v750_v54, 0.0004427343  ;;  %v1574_v0 = vld [vmem:[#allocation11 + $0x10] sm:$0xff]  ;;  %v1572_v3 = vld [vmem:[#allocation11] sm:$0xff] }
 0x1cf   :  { %v743_v13 = vsel %vm742_vm13, %v740_v8, %v737_v7  ;;  %1746 = vlog2.f32 %v744_v2 }
 0x1d0   :  { %v775_v11 = vadd.f32 %v743_v13, %v551_v4  ;;  %v885_v15 = vadd.f32 %v869_v9, %v2260_v41  ;;  %v749_v59 = vmul.f32 %v1737_v63, %v748_v17  ;;  %v552_v41 = vmax.f32 %v2295_v25, 0.0  ;;  %1111 = vmatpush.bf16.msrb.mxu0 %v1575_v56  ;;  %v1573_v63 = vld [vmem:[#allocation11 + $0x8] sm:$0xff] }
 0x1d2   :  { %v791_v14 = vmul.f32 0.5, %v775_v11  ;;  %1265 = vst [vmem:[#allocation13 + $0x140] sm:$0xff] %v775_v11  ;;  %v895_v18 = vpack.c.bf16 %v885_v15, %v884_v55 }
 0x1d3   :  { %v1743_v19 = vpop.eup %1742  ;;  %1279 = vst [vmem:[#allocation13 + $0x118] sm:$0xff] %v885_v15 }
 0x1d4   :  { %v1745_v20 = vpop.eup %1744  ;;  %v820_v22 = vmul.f32 1.442695, %v791_v14  ;;  %v753_v24 = vadd.f32 1.0, %v1743_v19  ;;  %999 = vmatmul.bf16.gmra.mxu3 %v895_v18  ;;  %v756_v32 = vmul.f32 -0.5, %v1743_v19  ;;  %v759_v40 = vand.u32 2147483647, %v1743_v19  ;;  %1112 = vmatpush.bf16.msrb.mxu0 %v1574_v0 }
 0x1d5   :  { %v1747_v27 = vpop.eup %1746  ;;  %v870_v28 = vmul.f32 %v1745_v20, %v1606_v61  ;;  %v2324_v0 = vld [vmem:[%s2360_s9] ss:$0 sm:$0xff]  ;;  %s2034_s9 = smov [#allocation13]  }
 0x1d6   :  { %1748 = vpow2.f32 %v820_v22  ;;  %v746_v23 = vmul.f32 0.6931472, %v1747_v27  ;;  %v757_v37 = vadd.f32 1.0, %v756_v32  ;;  %vm760_vm15 = vcmp.lt.f32.partialorder %v759_v40, 0.0004427343  ;;  %s1304_s15 = sshll.u32 %s2034_s9, 4  ;;  %s1305_s15 = int_to_ptr.vmem [resolvable:$true] %s1304_s15 }
 0x1d7   :  { %1750 = vlog2.f32 %v753_v24  ;;  %v886_v33 = vadd.f32 %v870_v28, %v2270_v10  ;;  %v553_v10 = vmax.f32 %v2305_v16, 0.0  ;;  %v1611_v16 = vunpack.c.h.bf16 %v1618_v48 }
 0x1d8   :  { %v752_v1 = vsel %vm751_vm14, %v749_v59, %v746_v23  ;;  %v758_v47 = vmul.f32 %v1743_v19, %v757_v37  ;;  %1113 = vmatpush.bf16.msrb.mxu0 %v1573_v63 }
 0x1d9   :  { %v776_v26 = vadd.f32 %v752_v1, %v552_v41  ;;  %1280 = vst [vmem:[#allocation13 + $0x130] sm:$0xff] %v886_v33 }
 0x1db   :  { %v792_v38 = vmul.f32 0.5, %v776_v26  ;;  %1266 = vst [vmem:[#allocation13 + $0x158] sm:$0xff] %v776_v26 }
 0x1dc   :  { %v1749_v58 = vpop.eup %1748  ;;  %1114 = vmatpush.bf16.msrb.mxu0 %v1572_v3 }
 0x1dd   :  { %v1751_v43 = vpop.eup %1750  ;;  %v822_v45 = vmul.f32 1.442695, %v792_v38  ;;  %v871_v25 = vmul.f32 %v1749_v58, %v1607_v35 }
 0x1de   :  { %v755_v46 = vmul.f32 0.6931472, %v1751_v43 }
 0x1df   :  { %1752 = vpow2.f32 %v822_v45  ;;  %v887_v50 = vadd.f32 %v871_v25, %v2280_v36 }
 0x1e0   :  { %v761_v49 = vsel %vm760_vm15, %v758_v47, %v755_v46 }
 0x1e1   :  { %v777_v51 = vadd.f32 %v761_v49, %v553_v10  ;;  %v896_v52 = vpack.c.bf16 %v887_v50, %v886_v33  ;;  %1281 = vst [vmem:[#allocation13 + $0x148] sm:$0xff] %v887_v50 }
 0x1e3   :  { %v793_v55 = vmul.f32 0.5, %v777_v51  ;;  %1267 = vst [vmem:[#allocation13 + $0x170] sm:$0xff] %v777_v51 }
 0x1e4   :  { %1004 = vmatmul.bf16.gmra.mxu3 %v896_v52 }
 0x1e5   :  { %v1753_v57 = vpop.eup %1752  ;;  %v824_v60 = vmul.f32 1.442695, %v793_v55 }
 0x1e6   :  { %v872_v62 = vmul.f32 %v1753_v57, %v1610_v53 }
 0x1e7   :  { %1754 = vpow2.f32 %v824_v60 }
 0x1e8   :  { %v888_v36 = vadd.f32 %v872_v62, %v2290_v6  ;;  %v1658_v6 = vld [vmem:[%s2358_s7] ss:$0 sm:$0xff] }
 0x1ea   :  { %1282 = vst [vmem:[#allocation13 + $0x160] sm:$0xff] %v888_v36 }
 0x1ed   :  { %v1755_v39 = vpop.eup %1754 }
 0x1ee   :  { %v873_v30 = vmul.f32 %v1755_v39, %v1611_v16 }
 0x1f0   :  { %v889_v44 = vadd.f32 %v873_v30, %v2300_v29 }
 0x1f2   :  { %v897_v2 = vpack.c.bf16 %v889_v44, %v888_v36  ;;  %1283 = vst [vmem:[#allocation13 + $0x178] sm:$0xff] %v889_v44 }
 0x1f3   :  { %1312 = dma.vmem_to_hbm [thread:$0]  %s1305_s15, 6144, %s1307_s14, [#allocation4], %s2035_s16, %s2035_s16, %s2036_s17  }
 0x1f4   :  { %1009 = vmatmul.bf16.gmra.mxu3 %v897_v2 }
 0x206   :  { %v975_v4 = vpop.f32.mrf.mxu3 }
 0x207   :  { %v976_v7 = vadd.f32 %v1658_v6, %v975_v4 }
 0x209   :  { %v1015_v9 = vmax.f32 %v976_v7, 0.0 }
 0x20e   :  { %v977_v8 = vpop.f32.mrf.mxu3 }
 0x20f   :  { %v978_v5 = vadd.f32 %v1658_v6, %v977_v8 }
 0x211   :  { %v1016_v12 = vmax.f32 %v978_v5, 0.0 }
 0x213   :  { %v1031_v13 = vpack.c.bf16 %v1016_v12, %v1015_v9 }
 0x215   :  { %1115 = vmatmul.bf16.vlgmr.msrb.gmra.mxu0 %v1031_v13 }
 0x217   :  { %v980_v11 = vpop.f32.mrf.mxu3 }
 0x218   :  { %v981_v29 = vadd.f32 %v1658_v6, %v980_v11 }
 0x21a   :  { %v1017_v14 = vmax.f32 %v981_v29, 0.0 }
 0x21f   :  { %v982_v15 = vpop.f32.mrf.mxu3 }
 0x220   :  { %v983_v61 = vadd.f32 %v1658_v6, %v982_v15 }
 0x222   :  { %v1018_v17 = vmax.f32 %v983_v61, 0.0 }
 0x224   :  { %v1032_v18 = vpack.c.bf16 %v1018_v17, %v1017_v14 }
 0x226   :  { %1120 = vmatmul.bf16.gmra.mxu0 %v1032_v18 }
 0x227   :  { %v985_v19 = vpop.f32.mrf.mxu3 }
 0x228   :  { %v986_v54 = vadd.f32 %v1658_v6, %v985_v19 }
 0x22a   :  { %v1019_v24 = vmax.f32 %v986_v54, 0.0 }
 0x22f   :  { %v987_v20 = vpop.f32.mrf.mxu3 }
 0x230   :  { %v988_v22 = vadd.f32 %v1658_v6, %v987_v20 }
 0x232   :  { %v1020_v27 = vmax.f32 %v988_v22, 0.0 }
 0x234   :  { %v1033_v28 = vpack.c.bf16 %v1020_v27, %v1019_v24 }
 0x236   :  { %1125 = vmatmul.bf16.gmra.mxu0 %v1033_v28 }
 0x237   :  { %v990_v31 = vpop.f32.mrf.mxu3 }
 0x238   :  { %v991_v23 = vadd.f32 %v1658_v6, %v990_v31 }
 0x23a   :  { %v1021_v41 = vmax.f32 %v991_v23, 0.0 }
 0x23f   :  { %v992_v59 = vpop.f32.mrf.mxu3 }
 0x240   :  { %v993_v32 = vadd.f32 %v1658_v6, %v992_v59 }
 0x242   :  { %v1022_v33 = vmax.f32 %v993_v32, 0.0 }
 0x244   :  { %v1034_v34 = vpack.c.bf16 %v1022_v33, %v1021_v41 }
 0x246   :  { %1130 = vmatmul.bf16.gmra.mxu0 %v1034_v34 }
 0x247   :  { %v995_v1 = vpop.f32.mrf.mxu3 }
 0x248   :  { %v996_v26 = vadd.f32 %v1658_v6, %v995_v1 }
 0x24a   :  { %v1023_v38 = vmax.f32 %v996_v26, 0.0 }
 0x24f   :  { %v997_v35 = vpop.f32.mrf.mxu3 }
 0x250   :  { %v998_v37 = vadd.f32 %v1658_v6, %v997_v35 }
 0x252   :  { %v1024_v40 = vmax.f32 %v998_v37, 0.0 }
 0x254   :  { %v1035_v42 = vpack.c.bf16 %v1024_v40, %v1023_v38 }
 0x256   :  { %1135 = vmatmul.bf16.gmra.mxu0 %v1035_v42 }
 0x257   :  { %v1000_v58 = vpop.f32.mrf.mxu3 }
 0x258   :  { %v1001_v43 = vadd.f32 %v1658_v6, %v1000_v58 }
 0x25a   :  { %v1025_v46 = vmax.f32 %v1001_v43, 0.0 }
 0x25f   :  { %v1002_v45 = vpop.f32.mrf.mxu3 }
 0x260   :  { %v1003_v25 = vadd.f32 %v1658_v6, %v1002_v45 }
 0x262   :  { %v1026_v47 = vmax.f32 %v1003_v25, 0.0 }
 0x264   :  { %v1036_v10 = vpack.c.bf16 %v1026_v47, %v1025_v46 }
 0x266   :  { %1140 = vmatmul.bf16.gmra.mxu0 %v1036_v10 }
 0x267   :  { %v1005_v50 = vpop.f32.mrf.mxu3 }
 0x268   :  { %v1006_v48 = vadd.f32 %v1658_v6, %v1005_v50 }
 0x26a   :  { %v1027_v51 = vmax.f32 %v1006_v48, 0.0 }
 0x26f   :  { %v1007_v21 = vpop.f32.mrf.mxu3 }
 0x270   :  { %v1008_v49 = vadd.f32 %v1658_v6, %v1007_v21 }
 0x272   :  { %v1028_v52 = vmax.f32 %v1008_v49, 0.0 }
 0x274   :  { %v1037_v53 = vpack.c.bf16 %v1028_v52, %v1027_v51 }
 0x276   :  { %1145 = vmatmul.bf16.gmra.mxu0 %v1037_v53 }
 0x277   :  { %v1010_v55 = vpop.f32.mrf.mxu3 }
 0x278   :  { %v1011_v56 = vadd.f32 %v1658_v6, %v1010_v55 }
 0x27a   :  { %v1029_v62 = vmax.f32 %v1011_v56, 0.0 }
 0x27f   :  { %v1012_v57 = vpop.f32.mrf.mxu3 }
 0x280   :  { %v1013_v60 = vadd.f32 %v1658_v6, %v1012_v57 }
 0x282   :  { %v1030_v36 = vmax.f32 %v1013_v60, 0.0 }
 0x284   :  { %v1038_v16 = vpack.c.bf16 %v1030_v36, %v1029_v62 }
 0x286   :  { %1150 = vmatmul.bf16.gmra.mxu0 %v1038_v16 }
 0x292   :  { %v1116_v63 = vpop.f32.mrf.mxu0 }
 0x293   :  { %v1117_v39 = vadd.f32 %v2324_v0, %v1116_v63 }
 0x295   :  { %v1156_v30 = vsub.f32 0.0, %v1117_v39 }
 0x297   :  { %v1172_v44 = vmul.f32 1.442695, %v1156_v30 }
 0x299   :  { %1756 = vpow2.f32 %v1172_v44 }
 0x29a   :  { %v1118_v2 = vpop.f32.mrf.mxu0 }
 0x29b   :  { %v1119_v3 = vadd.f32 %v2324_v0, %v1118_v2 }
 0x29d   :  { %v1157_v4 = vsub.f32 0.0, %v1119_v3 }
 0x29f   :  { %v1757_v6 = vpop.eup %1756  ;;  %v1174_v7 = vmul.f32 1.442695, %v1157_v4 }
 0x2a0   :  { %v1204_v8 = vadd.f32 1.0, %v1757_v6 }
 0x2a1   :  { %1758 = vpow2.f32 %v1174_v7 }
 0x2a2   :  { %1760 = vrcp.f32 %v1204_v8 }
 0x2a3   :  { %v1121_v5 = vpop.f32.mrf.mxu0 }
 0x2a4   :  { %v1122_v9 = vadd.f32 %v2324_v0, %v1121_v5 }
 0x2a6   :  { %v1158_v12 = vsub.f32 0.0, %v1122_v9 }
 0x2a7   :  { %v1759_v13 = vpop.eup %1758 }
 0x2a8   :  { %v1176_v11 = vmul.f32 1.442695, %v1158_v12  ;;  %v1761_v29 = vpop.eup %1760  ;;  %v1205_v15 = vadd.f32 1.0, %v1759_v13 }
 0x2a9   :  { %1284 = vst [vmem:[#allocation14] sm:$0xff] %v1761_v29 }
 0x2aa   :  { %1762 = vpow2.f32 %v1176_v11 }
 0x2ab   :  { %1764 = vrcp.f32 %v1205_v15  ;;  %v1123_v61 = vpop.f32.mrf.mxu0 }
 0x2ac   :  { %v1124_v14 = vadd.f32 %v2324_v0, %v1123_v61 }
 0x2ae   :  { %v1159_v17 = vsub.f32 0.0, %v1124_v14 }
 0x2b0   :  { %v1763_v18 = vpop.eup %1762  ;;  %v1178_v19 = vmul.f32 1.442695, %v1159_v17 }
 0x2b1   :  { %v1765_v54 = vpop.eup %1764  ;;  %v1206_v20 = vadd.f32 1.0, %v1763_v18 }
 0x2b2   :  { %1285 = vst [vmem:[#allocation14 + $0x8] sm:$0xff] %v1765_v54  ;;  %1766 = vpow2.f32 %v1178_v19 }
 0x2b3   :  { %1768 = vrcp.f32 %v1206_v20  ;;  %v1126_v22 = vpop.f32.mrf.mxu0 }
 0x2b4   :  { %v1127_v24 = vadd.f32 %v2324_v0, %v1126_v22 }
 0x2b6   :  { %v1160_v27 = vsub.f32 0.0, %v1127_v24 }
 0x2b8   :  { %v1767_v28 = vpop.eup %1766  ;;  %v1180_v31 = vmul.f32 1.442695, %v1160_v27 }
 0x2b9   :  { %v1769_v23 = vpop.eup %1768  ;;  %v1207_v59 = vadd.f32 1.0, %v1767_v28 }
 0x2ba   :  { %1286 = vst [vmem:[#allocation14 + $0x10] sm:$0xff] %v1769_v23  ;;  %1770 = vpow2.f32 %v1180_v31 }
 0x2bb   :  { %1772 = vrcp.f32 %v1207_v59  ;;  %v1128_v32 = vpop.f32.mrf.mxu0 }
 0x2bc   :  { %v1129_v41 = vadd.f32 %v2324_v0, %v1128_v32 }
 0x2be   :  { %v1161_v33 = vsub.f32 0.0, %v1129_v41 }
 0x2c0   :  { %v1771_v34 = vpop.eup %1770  ;;  %v1182_v1 = vmul.f32 1.442695, %v1161_v33 }
 0x2c1   :  { %v1773_v26 = vpop.eup %1772  ;;  %v1208_v35 = vadd.f32 1.0, %v1771_v34 }
 0x2c2   :  { %1287 = vst [vmem:[#allocation14 + $0x18] sm:$0xff] %v1773_v26  ;;  %1774 = vpow2.f32 %v1182_v1 }
 0x2c3   :  { %1776 = vrcp.f32 %v1208_v35  ;;  %v1131_v37 = vpop.f32.mrf.mxu0 }
 0x2c4   :  { %v1132_v38 = vadd.f32 %v2324_v0, %v1131_v37 }
 0x2c6   :  { %v1162_v40 = vsub.f32 0.0, %v1132_v38 }
 0x2c8   :  { %v1775_v42 = vpop.eup %1774  ;;  %v1184_v58 = vmul.f32 1.442695, %v1162_v40 }
 0x2c9   :  { %v1777_v43 = vpop.eup %1776  ;;  %v1209_v45 = vadd.f32 1.0, %v1775_v42 }
 0x2ca   :  { %1288 = vst [vmem:[#allocation14 + $0x20] sm:$0xff] %v1777_v43  ;;  %1778 = vpow2.f32 %v1184_v58 }
 0x2cb   :  { %1780 = vrcp.f32 %v1209_v45  ;;  %v1133_v25 = vpop.f32.mrf.mxu0 }
 0x2cc   :  { %v1134_v46 = vadd.f32 %v2324_v0, %v1133_v25 }
 0x2ce   :  { %v1163_v47 = vsub.f32 0.0, %v1134_v46 }
 0x2d0   :  { %v1779_v10 = vpop.eup %1778  ;;  %v1186_v50 = vmul.f32 1.442695, %v1163_v47 }
 0x2d1   :  { %v1781_v48 = vpop.eup %1780  ;;  %v1210_v21 = vadd.f32 1.0, %v1779_v10 }
 0x2d2   :  { %1289 = vst [vmem:[#allocation14 + $0x28] sm:$0xff] %v1781_v48  ;;  %1782 = vpow2.f32 %v1186_v50 }
 0x2d3   :  { %1784 = vrcp.f32 %v1210_v21  ;;  %v1136_v49 = vpop.f32.mrf.mxu0 }
 0x2d4   :  { %v1137_v51 = vadd.f32 %v2324_v0, %v1136_v49 }
 0x2d6   :  { %v1164_v52 = vsub.f32 0.0, %v1137_v51 }
 0x2d8   :  { %v1783_v53 = vpop.eup %1782  ;;  %v1188_v55 = vmul.f32 1.442695, %v1164_v52 }
 0x2d9   :  { %v1785_v56 = vpop.eup %1784  ;;  %v1211_v57 = vadd.f32 1.0, %v1783_v53 }
 0x2da   :  { %1290 = vst [vmem:[#allocation14 + $0x30] sm:$0xff] %v1785_v56  ;;  %1786 = vpow2.f32 %v1188_v55 }
 0x2db   :  { %1788 = vrcp.f32 %v1211_v57  ;;  %v1138_v60 = vpop.f32.mrf.mxu0 }
 0x2dc   :  { %v1139_v62 = vadd.f32 %v2324_v0, %v1138_v60 }
 0x2de   :  { %v1165_v36 = vsub.f32 0.0, %v1139_v62 }
 0x2e0   :  { %v1787_v16 = vpop.eup %1786  ;;  %v1190_v63 = vmul.f32 1.442695, %v1165_v36 }
 0x2e1   :  { %v1789_v39 = vpop.eup %1788  ;;  %v1212_v30 = vadd.f32 1.0, %v1787_v16 }
 0x2e2   :  { %1291 = vst [vmem:[#allocation14 + $0x38] sm:$0xff] %v1789_v39  ;;  %1790 = vpow2.f32 %v1190_v63 }
 0x2e3   :  { %1792 = vrcp.f32 %v1212_v30  ;;  %v1141_v44 = vpop.f32.mrf.mxu0 }
 0x2e4   :  { %v1142_v2 = vadd.f32 %v2324_v0, %v1141_v44 }
 0x2e6   :  { %v1166_v3 = vsub.f32 0.0, %v1142_v2 }
 0x2e8   :  { %v1791_v4 = vpop.eup %1790  ;;  %v1192_v6 = vmul.f32 1.442695, %v1166_v3 }
 0x2e9   :  { %v1793_v7 = vpop.eup %1792  ;;  %v1213_v8 = vadd.f32 1.0, %v1791_v4 }
 0x2ea   :  { %1292 = vst [vmem:[#allocation14 + $0x40] sm:$0xff] %v1793_v7  ;;  %1794 = vpow2.f32 %v1192_v6 }
 0x2eb   :  { %1796 = vrcp.f32 %v1213_v8  ;;  %v1143_v5 = vpop.f32.mrf.mxu0 }
 0x2ec   :  { %v1144_v9 = vadd.f32 %v2324_v0, %v1143_v5 }
 0x2ee   :  { %v1167_v12 = vsub.f32 0.0, %v1144_v9 }
 0x2f0   :  { %v1795_v13 = vpop.eup %1794  ;;  %v1194_v11 = vmul.f32 1.442695, %v1167_v12 }
 0x2f1   :  { %v1797_v29 = vpop.eup %1796  ;;  %v1214_v15 = vadd.f32 1.0, %v1795_v13 }
 0x2f2   :  { %1293 = vst [vmem:[#allocation14 + $0x48] sm:$0xff] %v1797_v29  ;;  %1798 = vpow2.f32 %v1194_v11 }
 0x2f3   :  { %1800 = vrcp.f32 %v1214_v15  ;;  %v1146_v61 = vpop.f32.mrf.mxu0 }
 0x2f4   :  { %v1147_v14 = vadd.f32 %v2324_v0, %v1146_v61 }
 0x2f6   :  { %v1168_v17 = vsub.f32 0.0, %v1147_v14 }
 0x2f8   :  { %v1799_v18 = vpop.eup %1798  ;;  %v1196_v19 = vmul.f32 1.442695, %v1168_v17 }
 0x2f9   :  { %v1801_v54 = vpop.eup %1800  ;;  %v1215_v20 = vadd.f32 1.0, %v1799_v18 }
 0x2fa   :  { %1294 = vst [vmem:[#allocation14 + $0x50] sm:$0xff] %v1801_v54  ;;  %1802 = vpow2.f32 %v1196_v19 }
 0x2fb   :  { %1804 = vrcp.f32 %v1215_v20  ;;  %v1148_v22 = vpop.f32.mrf.mxu0 }
 0x2fc   :  { %v1149_v24 = vadd.f32 %v2324_v0, %v1148_v22 }
 0x2fe   :  { %v1169_v27 = vsub.f32 0.0, %v1149_v24 }
 0x300   :  { %v1803_v28 = vpop.eup %1802  ;;  %v1198_v31 = vmul.f32 1.442695, %v1169_v27 }
 0x301   :  { %v1805_v23 = vpop.eup %1804  ;;  %v1216_v59 = vadd.f32 1.0, %v1803_v28 }
 0x302   :  { %1295 = vst [vmem:[#allocation14 + $0x58] sm:$0xff] %v1805_v23  ;;  %1806 = vpow2.f32 %v1198_v31 }
 0x303   :  { %1808 = vrcp.f32 %v1216_v59  ;;  %v1151_v32 = vpop.f32.mrf.mxu0 }
 0x304   :  { %v1152_v41 = vadd.f32 %v2324_v0, %v1151_v32 }
 0x306   :  { %v1170_v33 = vsub.f32 0.0, %v1152_v41 }
 0x308   :  { %v1807_v34 = vpop.eup %1806  ;;  %v1200_v1 = vmul.f32 1.442695, %v1170_v33 }
 0x309   :  { %v1809_v26 = vpop.eup %1808  ;;  %v1217_v35 = vadd.f32 1.0, %v1807_v34 }
 0x30a   :  { %1296 = vst [vmem:[#allocation14 + $0x60] sm:$0xff] %v1809_v26  ;;  %1810 = vpow2.f32 %v1200_v1 }
 0x30b   :  { %1812 = vrcp.f32 %v1217_v35  ;;  %v1153_v37 = vpop.f32.mrf.mxu0 }
 0x30c   :  { %v1154_v38 = vadd.f32 %v2324_v0, %v1153_v37 }
 0x30e   :  { %v1171_v40 = vsub.f32 0.0, %v1154_v38 }
 0x310   :  { %v1811_v42 = vpop.eup %1810  ;;  %v1202_v58 = vmul.f32 1.442695, %v1171_v40 }
 0x311   :  { %v1813_v43 = vpop.eup %1812  ;;  %v1218_v45 = vadd.f32 1.0, %v1811_v42 }
 0x312   :  { %1297 = vst [vmem:[#allocation14 + $0x68] sm:$0xff] %v1813_v43  ;;  %1814 = vpow2.f32 %v1202_v58 }
 0x313   :  { %1816 = vrcp.f32 %v1218_v45 }
 0x318   :  { %v1815_v25 = vpop.eup %1814 }
 0x319   :  { %v1817_v46 = vpop.eup %1816  ;;  %v1219_v47 = vadd.f32 1.0, %v1815_v25 }
 0x31a   :  { %1298 = vst [vmem:[#allocation14 + $0x70] sm:$0xff] %v1817_v46 }
 0x31b   :  { %1818 = vrcp.f32 %v1219_v47 }
 0x321   :  { %v1819_v0 = vpop.eup %1818 }
 0x322   :  { %1299 = vst [vmem:[#allocation14 + $0x78] sm:$0xff] %v1819_v0 }
 0x323   :  { %1325 = dma.vmem_to_hbm [thread:$0]  %s1318_s18, 2048, %s1320_s21, [#allocation15], %s2028_s29, %s2028_s29, %s2029_s1  }
 0x324   :  { %2020 = dma.done.wait [#allocation4], 6144  }
 0x325   :  { %2021 = vsyncadd [#allocation4], 4294961152 }
 0x326   :  { %2022 = dma.done.wait [#allocation15], 2048  }
 0x327   :  { %2023 = vsyncadd [#allocation15], 4294965248 }
 0x328   :  { %1334 = vsyncpa [#allocation3], 1 }
 0x329   :  { %1335 = vsyncpa [#allocation6], 1 }
 0x32a   :  { %1336 = vsyncpa [#allocation9], 1 }
 0x32b   :  { %1337 = vsyncpa [#allocation12], 1 }
 0x32c   :  { %1338 = vsyncpa [#allocation4], 1 }
 0x32d   :  { %1339 = vsyncpa [#allocation15], 1 }

// kernel: tpu_custom_call.1
= control target key start
LH: loop header
LB: loop body
LE: loop exit
PB: predicated region body
PF: predicated region fallthrough
CT: control target
= control target key end

     0   :  { %17 = vsyncpa [#allocation3], 0  ;;  %s2351_s0 = inlined_call_operand.hbm [shape: bf16[128,128], index: 0, kind: input, shape index: {}]   ;;  %s2352_s1 = inlined_call_operand.hbm [shape: bf16[128,128], index: 1, kind: input, shape index: {}]   ;;  %s2353_s2 = inlined_call_operand.hbm [shape: bf16[128,128], index: 2, kind: input, shape index: {}]   ;;  %s2354_s3 = inlined_call_operand.vmem [shape: f32[1,128], index: 3, kind: input, shape index: {}]   ;;  %s2355_s4 = inlined_call_operand.hbm [shape: bf16[128,256], index: 4, kind: input, shape index: {}]   ;;  %s2356_s5 = inlined_call_operand.vmem [shape: f32[1,256], index: 5, kind: input, shape index: {}]   ;;  %s2357_s6 = inlined_call_operand.hbm [shape: bf16[128,128], index: 6, kind: input, shape index: {}]   ;;  %s2358_s7 = inlined_call_operand.vmem [shape: f32[1,128], index: 7, kind: input, shape index: {}]   ;;  %s2359_s8 = inlined_call_operand.hbm [shape: bf16[128,128], index: 8, kind: input, shape index: {}]   ;;  %s2360_s9 = inlined_call_operand.vmem [shape: f32[1,128], index: 9, kind: input, shape index: {}]   ;;  %s2361_s10 = inlined_call_operand.hbm [shape: f32[128,384], index: 10, kind: output, shape index: {0}]   ;;  %s2362_s11 = inlined_call_operand.hbm [shape: f32[128,128], index: 11, kind: output, shape index: {1}]  }
   0x1   :  { %18 = vsyncpa [#allocation6], 0 }
   0x2   :  { %19 = vsyncpa [#allocation9], 0 }
   0x3   :  { %20 = vsyncpa [#allocation12], 0 }
   0x4   :  { %21 = vsyncpa [#allocation4], 0 }
   0x5   :  { %22 = vsyncpa [#allocation15], 0  ;;  %s40_s19 = sshll.u32 %s2352_s1, 4  ;;  %s2024_s20 = smov [#allocation5]   ;;  %s41_s19 = int_to_ptr.hbm [resolvable:$true] %s40_s19 }
   0x6   :  { %s42_s21 = sshll.u32 %s2024_s20, 4  ;;  %s68_s24 = sshll.u32 %s2355_s4, 4  ;;  %s43_s21 = int_to_ptr.vmem [resolvable:$true] %s42_s21  ;;  %s69_s24 = int_to_ptr.hbm [resolvable:$true] %s68_s24 }
   0x7   :  { %s2025_s25 = smov 64   ;;  %s2026_s26 = smov 4  }
   0x8   :  { %48 = dma.hbm_to_vmem [thread:$0]  %s41_s19, 1024, %s43_s21, [#allocation6], %s2025_s25, %s2025_s25, %s2026_s26  }
   0x9   :  { %s2027_s27 = smov [#allocation8]   ;;  %s2028_s29 = smov 128  }
   0xa   :  { %s70_s28 = sshll.u32 %s2027_s27, 4  ;;  %s2029_s1 = smov 8   ;;  %s71_s28 = int_to_ptr.vmem [resolvable:$true] %s70_s28 }
   0xb   :  { %76 = dma.hbm_to_vmem [thread:$0]  %s69_s24, 2048, %s71_s28, [#allocation9], %s2028_s29, %s2028_s29, %s2029_s1  }
   0xc   :  { %s27_s4 = sshll.u32 %s2351_s0, 4  ;;  %s2030_s13 = smov [#allocation2]   ;;  %s28_s4 = int_to_ptr.hbm [resolvable:$true] %s27_s4 }
   0xd   :  { %s29_s14 = sshll.u32 %s2030_s13, 4  ;;  %s53_s17 = sshll.u32 %s2353_s2, 4  ;;  %s30_s14 = int_to_ptr.vmem [resolvable:$true] %s29_s14  ;;  %s54_s17 = int_to_ptr.hbm [resolvable:$true] %s53_s17 }
   0xe   :  { %35 = dma.hbm_to_vmem [thread:$0]  %s28_s4, 1024, %s30_s14, [#allocation3], %s2025_s25, %s2025_s25, %s2026_s26  }
   0xf   :  { %s2031_s18 = smov [#allocation7]   ;;  %s83_s22 = sshll.u32 %s2357_s6, 4  ;;  %s84_s22 = int_to_ptr.hbm [resolvable:$true] %s83_s22 }
  0x10   :  { %s55_s19 = sshll.u32 %s2031_s18, 4  ;;  %s98_s2 = sshll.u32 %s2359_s8, 4  ;;  %s56_s19 = int_to_ptr.vmem [resolvable:$true] %s55_s19  ;;  %s99_s2 = int_to_ptr.hbm [resolvable:$true] %s98_s2 }
  0x11   :  { %61 = dma.hbm_to_vmem [thread:$0]  %s54_s17, 1024, %s56_s19, [#allocation6], %s2025_s25, %s2025_s25, %s2026_s26  }
  0x12   :  { %s2032_s24 = smov [#allocation10]   ;;  %s2033_s28 = smov [#allocation11]  }
  0x13   :  { %s85_s27 = sshll.u32 %s2032_s24, 4  ;;  %s100_s6 = sshll.u32 %s2033_s28, 4  ;;  %s86_s27 = int_to_ptr.vmem [resolvable:$true] %s85_s27  ;;  %s101_s6 = int_to_ptr.vmem [resolvable:$true] %s100_s6 }
  0x14   :  { %91 = dma.hbm_to_vmem [thread:$0]  %s84_s22, 1024, %s86_s27, [#allocation9], %s2025_s25, %s2025_s25, %s2026_s26  }
  0x15   :  { %106 = dma.hbm_to_vmem [thread:$0]  %s99_s2, 1024, %s101_s6, [#allocation12], %s2025_s25, %s2025_s25, %s2026_s26  }
  0x16   :  { %2012 = dma.done.wait [#allocation3], 1024  }
  0x17   :  { %2013 = vsyncadd [#allocation3], 4294966272 }
  0x18   :  { %2014 = dma.done.wait [#allocation6], 2048  }
  0x19   :  { %2015 = vsyncadd [#allocation6], 4294965248 }
  0x1a   :  { %2016 = dma.done.wait [#allocation9], 3072  }
  0x1b   :  { %2017 = vsyncadd [#allocation9], 4294964224 }
  0x1c   :  { %2018 = dma.done.wait [#allocation12], 1024  }
  0x1d   :  { %2019 = vsyncadd [#allocation12], 4294966272  ;;  %v1547_v0 = vld [vmem:[#allocation7 + $0x38] sm:$0xff]  ;;  %v1546_v1 = vld [vmem:[#allocation7 + $0x30] sm:$0xff]  ;;  %s1306_s14 = sshll.u32 %s2361_s10, 4  ;;  %s2035_s16 = smov 384   ;;  %s1307_s14 = int_to_ptr.hbm [resolvable:$true] %s1306_s14 }
  0x1e   :  { %265 = vmatpush.bf16.msra.mxu0 %v1547_v0  ;;  %1619 = vmatpush.bf16.msra.mxu1 %v1547_v0  ;;  %v1545_v2 = vld [vmem:[#allocation7 + $0x28] sm:$0xff]  ;;  %v1544_v3 = vld [vmem:[#allocation7 + $0x20] sm:$0xff]  ;;  %v1543_v4 = vld [vmem:[#allocation7 + $0x18] sm:$0xff]  ;;  %s2036_s17 = smov 24   ;;  %s2037_s10 = smov [#allocation14]  }
  0x1f   :  { %1620 = vmatpush.bf16.msra.mxu2 %v1547_v0  ;;  %1621 = vmatpush.bf16.msra.mxu3 %v1547_v0  ;;  %v1542_v5 = vld [vmem:[#allocation7 + $0x10] sm:$0xff]  ;;  %v1541_v6 = vld [vmem:[#allocation7 + $0x8] sm:$0xff]  ;;  %v1464_v8 = vld [vmem:[#allocation8 + $0x78] sm:$0xf0]  ;;  %s1317_s18 = sshll.u32 %s2037_s10, 4  ;;  %s1319_s21 = sshll.u32 %s2362_s11, 4  ;;  %s1318_s18 = int_to_ptr.vmem [resolvable:$true] %s1317_s18  ;;  %s1320_s21 = int_to_ptr.hbm [resolvable:$true] %s1319_s21 }
  0x20   :  { %v1562_v7 = vld [vmem:[#allocation8 + $0x74] sm:$0xf]  ;;  %v1462_v9 = vld [vmem:[#allocation8 + $0x70] sm:$0xf]  ;;  %v1563_v10 = vld [vmem:[#allocation8 + $0x74] sm:$0xf0] }
  0x21   :  { %v1540_v11 = vld [vmem:[#allocation7] sm:$0xff]  ;;  %v1534_v13 = vld [vmem:[#allocation2 + $0x10] sm:$0xff]  ;;  %v1467_v14 = vor.u32 %v1562_v7, %v1464_v8  ;;  %v1463_v15 = vor.u32 %v1563_v10, %v1462_v9  ;;  %v1456_v17 = vld [vmem:[#allocation8 + $0x68] sm:$0xf0] }
  0x22   :  { %266 = vmatpush.bf16.msra.mxu0 %v1546_v1  ;;  %1622 = vmatpush.bf16.msra.mxu1 %v1546_v1  ;;  %v1532_v12 = vld [vmem:[#allocation2] sm:$0xff]  ;;  %v1561_v19 = vld [vmem:[#allocation8 + $0x64] sm:$0xf0]  ;;  %v1538_v21 = vld [vmem:[#allocation2 + $0x30] sm:$0xff] }
  0x23   :  { %1623 = vmatpush.bf16.msra.mxu2 %v1546_v1  ;;  %1624 = vmatpush.bf16.msra.mxu3 %v1546_v1  ;;  %v1560_v16 = vld [vmem:[#allocation8 + $0x64] sm:$0xf]  ;;  %v1454_v18 = vld [vmem:[#allocation8 + $0x60] sm:$0xf]  ;;  %v1558_v24 = vld [vmem:[#allocation8 + $0x54] sm:$0xf] }
  0x24   :  { %v1536_v20 = vld [vmem:[#allocation2 + $0x20] sm:$0xff]  ;;  %v1459_v22 = vor.u32 %v1560_v16, %v1456_v17  ;;  %v1455_v23 = vor.u32 %v1561_v19, %v1454_v18  ;;  %v1448_v25 = vld [vmem:[#allocation8 + $0x58] sm:$0xf0]  ;;  %v1446_v26 = vld [vmem:[#allocation8 + $0x50] sm:$0xf] }
  0x25   :  { %v1559_v27 = vld [vmem:[#allocation8 + $0x54] sm:$0xf0]  ;;  %v1451_v28 = vor.u32 %v1558_v24, %v1448_v25  ;;  %v1556_v30 = vld [vmem:[#allocation8 + $0x44] sm:$0xf]  ;;  %v1440_v31 = vld [vmem:[#allocation8 + $0x48] sm:$0xf0] }
  0x26   :  { %267 = vmatpush.bf16.msra.mxu0 %v1545_v2  ;;  %1625 = vmatpush.bf16.msra.mxu1 %v1545_v2  ;;  %v1447_v29 = vor.u32 %v1559_v27, %v1446_v26  ;;  %v1438_v32 = vld [vmem:[#allocation8 + $0x40] sm:$0xf]  ;;  %v1557_v33 = vld [vmem:[#allocation8 + $0x44] sm:$0xf0]  ;;  %v1443_v34 = vor.u32 %v1556_v30, %v1440_v31  ;;  %v1554_v36 = vld [vmem:[#allocation8 + $0x34] sm:$0xf] }
  0x27   :  { %1626 = vmatpush.bf16.msra.mxu2 %v1545_v2  ;;  %1627 = vmatpush.bf16.msra.mxu3 %v1545_v2  ;;  %v1439_v35 = vor.u32 %v1557_v33, %v1438_v32  ;;  %v1432_v37 = vld [vmem:[#allocation8 + $0x38] sm:$0xf0]  ;;  %v1533_v39 = vld [vmem:[#allocation2 + $0x8] sm:$0xff]  ;;  %v1430_v43 = vld [vmem:[#allocation8 + $0x30] sm:$0xf] }
  0x28   :  { %v1435_v38 = vor.u32 %v1554_v36, %v1432_v37  ;;  %v1535_v40 = vld [vmem:[#allocation2 + $0x18] sm:$0xff]  ;;  %v1537_v41 = vld [vmem:[#allocation2 + $0x28] sm:$0xff]  ;;  %v1552_v46 = vld [vmem:[#allocation8 + $0x24] sm:$0xf] }
  0x29   :  { %v1539_v42 = vld [vmem:[#allocation2 + $0x38] sm:$0xff]  ;;  %v1424_v47 = vld [vmem:[#allocation8 + $0x28] sm:$0xf0]  ;;  %v1422_v48 = vld [vmem:[#allocation8 + $0x20] sm:$0xf] }
  0x2a   :  { %268 = vmatpush.bf16.msra.mxu0 %v1544_v3  ;;  %1628 = vmatpush.bf16.msra.mxu1 %v1544_v3  ;;  %v1555_v44 = vld [vmem:[#allocation8 + $0x34] sm:$0xf0]  ;;  %v1427_v49 = vor.u32 %v1552_v46, %v1424_v47  ;;  %v1553_v50 = vld [vmem:[#allocation8 + $0x24] sm:$0xf0]  ;;  %v1550_v52 = vld [vmem:[#allocation8 + $0x14] sm:$0xf] }
  0x2b   :  { %1629 = vmatpush.bf16.msra.mxu2 %v1544_v3  ;;  %1630 = vmatpush.bf16.msra.mxu3 %v1544_v3  ;;  %v1431_v45 = vor.u32 %v1555_v44, %v1430_v43  ;;  %v1423_v51 = vor.u32 %v1553_v50, %v1422_v48  ;;  %v1416_v53 = vld [vmem:[#allocation8 + $0x18] sm:$0xf0]  ;;  %v1414_v55 = vld [vmem:[#allocation8 + $0x10] sm:$0xf]  ;;  %v1551_v56 = vld [vmem:[#allocation8 + $0x14] sm:$0xf0] }
  0x2c   :  { %v1419_v54 = vor.u32 %v1550_v52, %v1416_v53  ;;  %v1415_v57 = vor.u32 %v1551_v56, %v1414_v55  ;;  %v1548_v58 = vld [vmem:[#allocation8 + $0x4] sm:$0xf]  ;;  %v1408_v59 = vld [vmem:[#allocation8 + $0x8] sm:$0xf0]  ;;  %v1406_v60 = vld [vmem:[#allocation8] sm:$0xf] }
  0x2d   :  { %v1411_v61 = vor.u32 %v1548_v58, %v1408_v59  ;;  %v1549_v62 = vld [vmem:[#allocation8 + $0x4] sm:$0xf0]  ;;  %v2137_v1 = vld [vmem:[%s2354_s3] ss:$0 sm:$0xff]  ;;  %v1571_v59 = vld [vmem:[#allocation10 + $0x38] sm:$0xff] }
  0x2e   :  { %269 = vmatpush.bf16.msra.mxu0 %v1543_v4  ;;  %1631 = vmatpush.bf16.msra.mxu1 %v1543_v4  ;;  %v1407_v63 = vor.u32 %v1549_v62, %v1406_v60  ;;  %v1570_v62 = vld [vmem:[#allocation10 + $0x30] sm:$0xff] }
  0x2f   :  { %1632 = vmatpush.bf16.msra.mxu2 %v1543_v4  ;;  %1633 = vmatpush.bf16.msra.mxu3 %v1543_v4 }
  0x32   :  { %270 = vmatpush.bf16.msra.mxu0 %v1542_v5  ;;  %1634 = vmatpush.bf16.msra.mxu1 %v1542_v5 }
  0x33   :  { %1635 = vmatpush.bf16.msra.mxu2 %v1542_v5  ;;  %1636 = vmatpush.bf16.msra.mxu3 %v1542_v5 }
  0x36   :  { %271 = vmatpush.bf16.msra.mxu0 %v1541_v6  ;;  %1637 = vmatpush.bf16.msra.mxu1 %v1541_v6 }
  0x37   :  { %1638 = vmatpush.bf16.msra.mxu2 %v1541_v6  ;;  %1639 = vmatpush.bf16.msra.mxu3 %v1541_v6 }
  0x3a   :  { %272 = vmatpush.bf16.msra.mxu0 %v1540_v11  ;;  %1640 = vmatpush.bf16.msra.mxu1 %v1540_v11 }
  0x3b   :  { %1641 = vmatpush.bf16.msra.mxu2 %v1540_v11  ;;  %1642 = vmatpush.bf16.msra.mxu3 %v1540_v11 }
  0x3d   :  { %273 = vmatmul.bf16.vlgmr.msra.gmra.mxu0 %v1532_v12  ;;  %283 = vmatmul.bf16.vlgmr.msra.gmra.mxu1 %v1534_v13 }
  0x3e   :  { %440 = vmatpush.bf16.msrb.mxu1 %v1463_v15  ;;  %293 = vmatmul.bf16.vlgmr.msra.gmra.mxu2 %v1536_v20 }
  0x3f   :  { %489 = vmatpush.bf16.msrb.mxu2 %v1467_v14  ;;  %303 = vmatmul.bf16.vlgmr.msra.gmra.mxu3 %v1538_v21 }
  0x40   :  { %966 = vmatpush.bf16.msrb.mxu3 %v1571_v59 }
  0x42   :  { %441 = vmatpush.bf16.msrb.mxu1 %v1455_v23 }
  0x43   :  { %490 = vmatpush.bf16.msrb.mxu2 %v1459_v22 }
  0x44   :  { %967 = vmatpush.bf16.msrb.mxu3 %v1570_v62 }
  0x46   :  { %442 = vmatpush.bf16.msrb.mxu1 %v1447_v29 }
  0x47   :  { %491 = vmatpush.bf16.msrb.mxu2 %v1451_v28 }
  0x4a   :  { %443 = vmatpush.bf16.msrb.mxu1 %v1439_v35 }
  0x4b   :  { %492 = vmatpush.bf16.msrb.mxu2 %v1443_v34 }
  0x4d   :  { %278 = vmatmul.bf16.gmra.mxu0 %v1533_v39  ;;  %288 = vmatmul.bf16.gmra.mxu1 %v1535_v40 }
  0x4e   :  { %298 = vmatmul.bf16.gmra.mxu2 %v1537_v41  ;;  %444 = vmatpush.bf16.msrb.mxu1 %v1431_v45 }
  0x4f   :  { %493 = vmatpush.bf16.msrb.mxu2 %v1435_v38  ;;  %308 = vmatmul.bf16.gmra.mxu3 %v1539_v42 }
  0x52   :  { %445 = vmatpush.bf16.msrb.mxu1 %v1423_v51 }
  0x53   :  { %494 = vmatpush.bf16.msrb.mxu2 %v1427_v49 }
  0x56   :  { %446 = vmatpush.bf16.msrb.mxu1 %v1415_v57  ;;  %v354_v57 = vld [vmem:[%s2356_s5] sm:$0x3] }
  0x57   :  { %495 = vmatpush.bf16.msrb.mxu2 %v1419_v54  ;;  %v2158_v58 = vperm.slane %v354_v57, 0 }
  0x5a   :  { %447 = vmatpush.bf16.msrb.mxu1 %v1407_v63  ;;  %v2164_v63 = vperm.slane %v354_v57, 1 }
  0x5b   :  { %496 = vmatpush.bf16.msrb.mxu2 %v1411_v61 }
  0xba   :  { %v274_v0 = vpop.f32.mrf.mxu0  ;;  %v284_v9 = vpop.f32.mrf.mxu1 }
  0xbb   :  { %v275_v2 = vadd.f32 %v2137_v1, %v274_v0  ;;  %v285_v17 = vadd.f32 %v2137_v1, %v284_v9  ;;  %v1569_v0 = vld [vmem:[#allocation10 + $0x28] sm:$0xff] }
  0xbc   :  { %968 = vmatpush.bf16.msrb.mxu3 %v1569_v0 }
  0xbd   :  { %v314_v5 = vmax.f32 %v275_v2, 0.0  ;;  %v318_v20 = vmax.f32 %v285_v17, 0.0 }
  0xc1   :  { %v294_v24 = vpop.f32.mrf.mxu2 }
  0xc2   :  { %v276_v3 = vpop.f32.mrf.mxu0  ;;  %v286_v16 = vpop.f32.mrf.mxu1  ;;  %v295_v31 = vadd.f32 %v2137_v1, %v294_v24 }
  0xc3   :  { %v277_v4 = vadd.f32 %v2137_v1, %v276_v3  ;;  %v287_v18 = vadd.f32 %v2137_v1, %v286_v16  ;;  %v304_v38 = vpop.f32.mrf.mxu3 }
  0xc4   :  { %v322_v34 = vmax.f32 %v295_v31, 0.0  ;;  %v305_v45 = vadd.f32 %v2137_v1, %v304_v38 }
  0xc5   :  { %v315_v6 = vmax.f32 %v277_v4, 0.0  ;;  %v319_v21 = vmax.f32 %v287_v18, 0.0 }
  0xc6   :  { %v326_v48 = vmax.f32 %v305_v45, 0.0 }
  0xc7   :  { %v330_v7 = vpack.c.bf16 %v315_v6, %v314_v5  ;;  %v332_v22 = vpack.c.bf16 %v319_v21, %v318_v20  ;;  %v1568_v6 = vld [vmem:[#allocation10 + $0x20] sm:$0xff] }
  0xc8   :  { %969 = vmatpush.bf16.msrb.mxu3 %v1568_v6 }
  0xc9   :  { %448 = vmatmul.bf16.vlgmr.msrb.gmra.mxu1 %v330_v7  ;;  %497 = vmatmul.bf16.vlgmr.msrb.gmra.mxu2 %v330_v7  ;;  %v296_v30 = vpop.f32.mrf.mxu2 }
  0xca   :  { %v279_v8 = vpop.f32.mrf.mxu0  ;;  %v289_v19 = vpop.f32.mrf.mxu1  ;;  %v297_v32 = vadd.f32 %v2137_v1, %v296_v30 }
  0xcb   :  { %v280_v10 = vadd.f32 %v2137_v1, %v279_v8  ;;  %v290_v25 = vadd.f32 %v2137_v1, %v289_v19  ;;  %v306_v44 = vpop.f32.mrf.mxu3 }
  0xcc   :  { %v323_v35 = vmax.f32 %v297_v32, 0.0  ;;  %v307_v46 = vadd.f32 %v2137_v1, %v306_v44 }
  0xcd   :  { %v316_v13 = vmax.f32 %v280_v10, 0.0  ;;  %v320_v27 = vmax.f32 %v290_v25, 0.0  ;;  %v1567_v10 = vld [vmem:[#allocation10 + $0x18] sm:$0xff] }
  0xce   :  { %v334_v36 = vpack.c.bf16 %v323_v35, %v322_v34  ;;  %v327_v49 = vmax.f32 %v307_v46, 0.0  ;;  %970 = vmatpush.bf16.msrb.mxu3 %v1567_v10 }
  0xd0   :  { %v336_v50 = vpack.c.bf16 %v327_v49, %v326_v48 }
  0xd1   :  { %v299_v33 = vpop.f32.mrf.mxu2 }
  0xd2   :  { %v281_v11 = vpop.f32.mrf.mxu0  ;;  %v291_v23 = vpop.f32.mrf.mxu1  ;;  %v300_v39 = vadd.f32 %v2137_v1, %v299_v33 }
  0xd3   :  { %v282_v12 = vadd.f32 %v2137_v1, %v281_v11  ;;  %v292_v26 = vadd.f32 %v2137_v1, %v291_v23  ;;  %v309_v47 = vpop.f32.mrf.mxu3 }
  0xd4   :  { %v324_v41 = vmax.f32 %v300_v39, 0.0  ;;  %v310_v52 = vadd.f32 %v2137_v1, %v309_v47 }
  0xd5   :  { %v317_v14 = vmax.f32 %v282_v12, 0.0  ;;  %v321_v28 = vmax.f32 %v292_v26, 0.0 }
  0xd6   :  { %v328_v54 = vmax.f32 %v310_v52, 0.0 }
  0xd7   :  { %v331_v15 = vpack.c.bf16 %v317_v14, %v316_v13  ;;  %v333_v29 = vpack.c.bf16 %v321_v28, %v320_v27  ;;  %v1564_v28 = vld [vmem:[#allocation10] sm:$0xff] }
  0xd9   :  { %453 = vmatmul.bf16.gmra.mxu1 %v331_v15  ;;  %502 = vmatmul.bf16.gmra.mxu2 %v331_v15  ;;  %v301_v37 = vpop.f32.mrf.mxu2  ;;  %v1566_v15 = vld [vmem:[#allocation10 + $0x10] sm:$0xff] }
  0xda   :  { %v302_v40 = vadd.f32 %v2137_v1, %v301_v37  ;;  %971 = vmatpush.bf16.msrb.mxu3 %v1566_v15 }
  0xdb   :  { %v311_v51 = vpop.f32.mrf.mxu3 }
  0xdc   :  { %v325_v42 = vmax.f32 %v302_v40, 0.0  ;;  %v312_v53 = vadd.f32 %v2137_v1, %v311_v51 }
  0xde   :  { %v335_v43 = vpack.c.bf16 %v325_v42, %v324_v41  ;;  %v329_v55 = vmax.f32 %v312_v53, 0.0 }
  0xe0   :  { %v337_v56 = vpack.c.bf16 %v329_v55, %v328_v54 }
  0xe9   :  { %458 = vmatmul.bf16.gmra.mxu1 %v332_v22  ;;  %507 = vmatmul.bf16.gmra.mxu2 %v332_v22  ;;  %v1565_v22 = vld [vmem:[#allocation10 + $0x8] sm:$0xff] }
  0xea   :  { %972 = vmatpush.bf16.msrb.mxu3 %v1565_v22 }
  0xee   :  { %973 = vmatpush.bf16.msrb.mxu3 %v1564_v28 }
  0xf9   :  { %463 = vmatmul.bf16.gmra.mxu1 %v333_v29  ;;  %512 = vmatmul.bf16.gmra.mxu2 %v333_v29 }
 0x109   :  { %468 = vmatmul.bf16.gmra.mxu1 %v334_v36  ;;  %517 = vmatmul.bf16.gmra.mxu2 %v334_v36 }
 0x119   :  { %473 = vmatmul.bf16.gmra.mxu1 %v335_v43  ;;  %522 = vmatmul.bf16.gmra.mxu2 %v335_v43 }
 0x129   :  { %478 = vmatmul.bf16.gmra.mxu1 %v336_v50  ;;  %527 = vmatmul.bf16.gmra.mxu2 %v336_v50 }
 0x139   :  { %483 = vmatmul.bf16.gmra.mxu1 %v337_v56  ;;  %532 = vmatmul.bf16.gmra.mxu2 %v337_v56 }
 0x146   :  { %v449_v60 = vpop.f32.mrf.mxu1 }
 0x147   :  { %v2161_v61 = vadd.f32 %v449_v60, %v2158_v58 }
 0x149   :  { %1236 = vst [vmem:[#allocation13] sm:$0xff] %v2161_v61 }
 0x14c   :  { %v498_v1 = vpop.f32.mrf.mxu2 }
 0x14d   :  { %v499_v2 = vadd.f32 %v498_v1, %v2164_v63  ;;  %v1581_v1 = vld [vmem:[#allocation5] sm:$0xff]  }
 0x14e   :  { %v451_v3 = vpop.f32.mrf.mxu1 }
 0x14f   :  { %v554_v4 = vand.u32 2147483647, %v499_v2  ;;  %v2168_v5 = vadd.f32 %v451_v3, %v2158_v58  ;;  %v538_v40 = vmax.f32 %v499_v2, 0.0 }
 0x151   :  { %v570_v7 = vsub.f32 0.0, %v554_v4  ;;  %1237 = vst [vmem:[#allocation13 + $0x18] sm:$0xff] %v2168_v5 }
 0x153   :  { %v586_v8 = vmul.f32 1.442695, %v570_v7 }
 0x154   :  { %v500_v9 = vpop.f32.mrf.mxu2 }
 0x155   :  { %1660 = vpow2.f32 %v586_v8  ;;  %v2172_v11 = vadd.f32 %v500_v9, %v2164_v63  ;;  %v1582_v8 = vunpack.c.l.bf16 %v1581_v1 }
 0x156   :  { %v454_v12 = vpop.f32.mrf.mxu1 }
 0x157   :  { %v555_v13 = vand.u32 2147483647, %v2172_v11  ;;  %v2176_v14 = vadd.f32 %v454_v12, %v2158_v58  ;;  %v539_v60 = vmax.f32 %v2172_v11, 0.0 }
 0x159   :  { %v571_v16 = vsub.f32 0.0, %v555_v13  ;;  %1238 = vst [vmem:[#allocation13 + $0x30] sm:$0xff] %v2176_v14 }
 0x15b   :  { %v1661_v17 = vpop.eup %1660  ;;  %v588_v18 = vmul.f32 1.442695, %v571_v16 }
 0x15c   :  { %v618_v19 = vadd.f32 1.0, %v1661_v17  ;;  %v621_v20 = vmul.f32 -0.5, %v1661_v17  ;;  %v503_v21 = vpop.f32.mrf.mxu2  ;;  %v624_v30 = vand.u32 2147483647, %v1661_v17 }
 0x15d   :  { %1662 = vpow2.f32 %v588_v18  ;;  %v2180_v23 = vadd.f32 %v503_v21, %v2164_v63 }
 0x15e   :  { %1664 = vlog2.f32 %v618_v19  ;;  %v456_v24 = vpop.f32.mrf.mxu1  ;;  %v622_v27 = vadd.f32 1.0, %v621_v20  ;;  %vm625_vm0 = vcmp.lt.f32.partialorder %v624_v30, 0.0004427343 }
 0x15f   :  { %v556_v25 = vand.u32 2147483647, %v2180_v23  ;;  %v2184_v26 = vadd.f32 %v456_v24, %v2158_v58  ;;  %v540_v20 = vmax.f32 %v2180_v23, 0.0 }
 0x160   :  { %v623_v34 = vmul.f32 %v1661_v17, %v622_v27 }
 0x161   :  { %v572_v29 = vsub.f32 0.0, %v556_v25  ;;  %1239 = vst [vmem:[#allocation13 + $0x48] sm:$0xff] %v2184_v26 }
 0x163   :  { %v1663_v31 = vpop.eup %1662  ;;  %v590_v32 = vmul.f32 1.442695, %v572_v29 }
 0x164   :  { %v1665_v33 = vpop.eup %1664  ;;  %v627_v35 = vadd.f32 1.0, %v1663_v31  ;;  %v505_v36 = vpop.f32.mrf.mxu2  ;;  %v630_v38 = vmul.f32 -0.5, %v1663_v31  ;;  %v633_v49 = vand.u32 2147483647, %v1663_v31 }
 0x165   :  { %v620_v37 = vmul.f32 0.6931472, %v1665_v33  ;;  %1666 = vpow2.f32 %v590_v32  ;;  %v2188_v39 = vadd.f32 %v505_v36, %v2164_v63 }
 0x166   :  { %1668 = vlog2.f32 %v627_v35  ;;  %v459_v41 = vpop.f32.mrf.mxu1  ;;  %v631_v46 = vadd.f32 1.0, %v630_v38  ;;  %vm634_vm1 = vcmp.lt.f32.partialorder %v633_v49, 0.0004427343 }
 0x167   :  { %v626_v42 = vsel %vm625_vm0, %v623_v34, %v620_v37  ;;  %v557_v43 = vand.u32 2147483647, %v2188_v39  ;;  %v2192_v44 = vadd.f32 %v459_v41, %v2158_v58  ;;  %v1583_v34 = vunpack.c.h.bf16 %v1581_v1 }
 0x168   :  { %v762_v45 = vadd.f32 %v626_v42, %v538_v40  ;;  %v632_v57 = vmul.f32 %v1663_v31, %v631_v46  ;;  %v541_v49 = vmax.f32 %v2188_v39, 0.0 }
 0x169   :  { %v573_v47 = vsub.f32 0.0, %v557_v43  ;;  %1240 = vst [vmem:[#allocation13 + $0x60] sm:$0xff] %v2192_v44 }
 0x16a   :  { %v778_v48 = vmul.f32 0.5, %v762_v45  ;;  %1252 = vst [vmem:[#allocation13 + $0x8] sm:$0xff] %v762_v45 }
 0x16b   :  { %v1667_v50 = vpop.eup %1666  ;;  %v592_v51 = vmul.f32 1.442695, %v573_v47 }
 0x16c   :  { %v1669_v52 = vpop.eup %1668  ;;  %v794_v53 = vmul.f32 1.442695, %v778_v48  ;;  %v636_v54 = vadd.f32 1.0, %v1667_v50  ;;  %v508_v55 = vpop.f32.mrf.mxu2  ;;  %v639_v62 = vmul.f32 -0.5, %v1667_v50  ;;  %v642_v13 = vand.u32 2147483647, %v1667_v50 }
 0x16d   :  { %v629_v56 = vmul.f32 0.6931472, %v1669_v52  ;;  %1670 = vpow2.f32 %v592_v51  ;;  %v2196_v59 = vadd.f32 %v508_v55, %v2164_v63  ;;  %v1612_v55 = vld [vmem:[#allocation5 + $0x8] sm:$0xff]  }
 0x16e   :  { %1672 = vpow2.f32 %v794_v53  ;;  %v461_v0 = vpop.f32.mrf.mxu1  ;;  %v640_v10 = vadd.f32 1.0, %v639_v62  ;;  %vm643_vm2 = vcmp.lt.f32.partialorder %v642_v13, 0.0004427343 }
 0x16f   :  { %v635_v2 = vsel %vm634_vm1, %v632_v57, %v629_v56  ;;  %1674 = vlog2.f32 %v636_v54  ;;  %v558_v3 = vand.u32 2147483647, %v2196_v59  ;;  %v2201_v6 = vadd.f32 %v461_v0, %v2158_v58 }
 0x170   :  { %v763_v4 = vadd.f32 %v635_v2, %v539_v60  ;;  %v641_v25 = vmul.f32 %v1667_v50, %v640_v10  ;;  %v1586_v2 = vunpack.c.l.bf16 %v1612_v55 }
 0x171   :  { %v574_v7 = vsub.f32 0.0, %v558_v3  ;;  %1241 = vst [vmem:[#allocation13 + $0x78] sm:$0xff] %v2201_v6 }
 0x172   :  { %v779_v9 = vmul.f32 0.5, %v763_v4  ;;  %1253 = vst [vmem:[#allocation13 + $0x20] sm:$0xff] %v763_v4 }
 0x173   :  { %v1671_v12 = vpop.eup %1670  ;;  %v594_v11 = vmul.f32 1.442695, %v574_v7 }
 0x174   :  { %v1673_v15 = vpop.eup %1672  ;;  %v796_v16 = vmul.f32 1.442695, %v779_v9  ;;  %v645_v17 = vadd.f32 1.0, %v1671_v12  ;;  %v510_v18 = vpop.f32.mrf.mxu2  ;;  %v648_v27 = vmul.f32 -0.5, %v1671_v12  ;;  %v651_v38 = vand.u32 2147483647, %v1671_v12 }
 0x175   :  { %v1675_v19 = vpop.eup %1674  ;;  %1676 = vpow2.f32 %v594_v11  ;;  %v2206_v21 = vadd.f32 %v510_v18, %v2164_v63  ;;  %v858_v22 = vmul.f32 %v1673_v15, %v1582_v8 }
 0x176   :  { %1678 = vpow2.f32 %v796_v16  ;;  %v638_v24 = vmul.f32 0.6931472, %v1675_v19  ;;  %v464_v28 = vpop.f32.mrf.mxu1  ;;  %v649_v35 = vadd.f32 1.0, %v648_v27  ;;  %vm652_vm3 = vcmp.lt.f32.partialorder %v651_v38, 0.0004427343 }
 0x177   :  { %1680 = vlog2.f32 %v645_v17  ;;  %v559_v29 = vand.u32 2147483647, %v2206_v21  ;;  %v2210_v30 = vadd.f32 %v464_v28, %v2158_v58  ;;  %v874_v23 = vadd.f32 %v858_v22, %v2161_v61 }
 0x178   :  { %v644_v31 = vsel %vm643_vm2, %v641_v25, %v638_v24  ;;  %v650_v51 = vmul.f32 %v1671_v12, %v649_v35  ;;  %v542_v17 = vmax.f32 %v2196_v59, 0.0  ;;  %v1587_v59 = vunpack.c.h.bf16 %v1612_v55 }
 0x179   :  { %v764_v32 = vadd.f32 %v644_v31, %v540_v20  ;;  %v575_v33 = vsub.f32 0.0, %v559_v29  ;;  %1242 = vst [vmem:[#allocation13 + $0x90] sm:$0xff] %v2210_v30 }
 0x17a   :  { %1268 = vst [vmem:[#allocation13 + $0x10] sm:$0xff] %v874_v23 }
 0x17b   :  { %v1677_v36 = vpop.eup %1676  ;;  %v780_v37 = vmul.f32 0.5, %v764_v32  ;;  %1254 = vst [vmem:[#allocation13 + $0x38] sm:$0xff] %v764_v32  ;;  %v596_v40 = vmul.f32 1.442695, %v575_v33 }
 0x17c   :  { %v1679_v41 = vpop.eup %1678  ;;  %v654_v42 = vadd.f32 1.0, %v1677_v36  ;;  %v657_v43 = vmul.f32 -0.5, %v1677_v36  ;;  %v513_v45 = vpop.f32.mrf.mxu2  ;;  %v660_v39 = vand.u32 2147483647, %v1677_v36 }
 0x17d   :  { %v1681_v46 = vpop.eup %1680  ;;  %v798_v47 = vmul.f32 1.442695, %v780_v37  ;;  %1682 = vpow2.f32 %v596_v40  ;;  %v2215_v61 = vadd.f32 %v513_v45, %v2164_v63  ;;  %v859_v48 = vmul.f32 %v1679_v41, %v1583_v34 }
 0x17e   :  { %v647_v50 = vmul.f32 0.6931472, %v1681_v46  ;;  %1684 = vlog2.f32 %v654_v42  ;;  %v466_v52 = vpop.f32.mrf.mxu1  ;;  %v658_v57 = vadd.f32 1.0, %v657_v43  ;;  %vm661_vm4 = vcmp.lt.f32.partialorder %v660_v39, 0.0004427343 }
 0x17f   :  { %1686 = vpow2.f32 %v798_v47  ;;  %v560_v53 = vand.u32 2147483647, %v2215_v61  ;;  %v2220_v54 = vadd.f32 %v466_v52, %v2158_v58  ;;  %v875_v60 = vadd.f32 %v859_v48, %v2168_v5  ;;  %v1613_v47 = vld [vmem:[#allocation5 + $0x10] sm:$0xff]  }
 0x180   :  { %v653_v56 = vsel %vm652_vm3, %v650_v51, %v647_v50  ;;  %v659_v9 = vmul.f32 %v1677_v36, %v658_v57  ;;  %v543_v36 = vmax.f32 %v2206_v21, 0.0 }
 0x181   :  { %v765_v62 = vadd.f32 %v653_v56, %v541_v49  ;;  %v576_v0 = vsub.f32 0.0, %v560_v53  ;;  %1243 = vst [vmem:[#allocation13 + $0xa8] sm:$0xff] %v2220_v54  ;;  %v890_v1 = vpack.c.bf16 %v875_v60, %v874_v23  ;;  %v1590_v53 = vunpack.c.l.bf16 %v1613_v47 }
 0x182   :  { %1269 = vst [vmem:[#allocation13 + $0x28] sm:$0xff] %v875_v60 }
 0x183   :  { %v1683_v3 = vpop.eup %1682  ;;  %v781_v4 = vmul.f32 0.5, %v765_v62  ;;  %1255 = vst [vmem:[#allocation13 + $0x50] sm:$0xff] %v765_v62  ;;  %v598_v7 = vmul.f32 1.442695, %v576_v0  ;;  %974 = vmatmul.bf16.vlgmr.msrb.gmra.mxu3 %v890_v1 }
 0x184   :  { %v1685_v8 = vpop.eup %1684  ;;  %v663_v10 = vadd.f32 1.0, %v1683_v3  ;;  %v666_v12 = vmul.f32 -0.5, %v1683_v3  ;;  %v515_v13 = vpop.f32.mrf.mxu2  ;;  %v669_v23 = vand.u32 2147483647, %v1683_v3 }
 0x185   :  { %v1687_v11 = vpop.eup %1686  ;;  %v800_v5 = vmul.f32 1.442695, %v781_v4  ;;  %v656_v15 = vmul.f32 0.6931472, %v1685_v8  ;;  %1688 = vpow2.f32 %v598_v7  ;;  %v2225_v16 = vadd.f32 %v515_v13, %v2164_v63 }
 0x186   :  { %1690 = vlog2.f32 %v663_v10  ;;  %v469_v18 = vpop.f32.mrf.mxu1  ;;  %v860_v19 = vmul.f32 %v1687_v11, %v1586_v2  ;;  %v667_v27 = vadd.f32 1.0, %v666_v12  ;;  %vm670_vm5 = vcmp.lt.f32.partialorder %v669_v23, 0.0004427343 }
 0x187   :  { %1692 = vpow2.f32 %v800_v5  ;;  %v662_v20 = vsel %vm661_vm4, %v659_v9, %v656_v15  ;;  %v561_v22 = vand.u32 2147483647, %v2225_v16  ;;  %v2230_v25 = vadd.f32 %v469_v18, %v2158_v58 }
 0x188   :  { %v766_v24 = vadd.f32 %v662_v20, %v542_v17  ;;  %v876_v29 = vadd.f32 %v860_v19, %v2176_v14  ;;  %v668_v42 = vmul.f32 %v1683_v3, %v667_v27  ;;  %v544_v7 = vmax.f32 %v2215_v61, 0.0 }
 0x189   :  { %v577_v28 = vsub.f32 0.0, %v561_v22  ;;  %1244 = vst [vmem:[#allocation13 + $0xc0] sm:$0xff] %v2230_v25  ;;  %v1591_v19 = vunpack.c.h.bf16 %v1613_v47 }
 0x18a   :  { %v782_v31 = vmul.f32 0.5, %v766_v24  ;;  %1256 = vst [vmem:[#allocation13 + $0x68] sm:$0xff] %v766_v24 }
 0x18b   :  { %v1689_v32 = vpop.eup %1688  ;;  %v600_v33 = vmul.f32 1.442695, %v577_v28  ;;  %1270 = vst [vmem:[#allocation13 + $0x40] sm:$0xff] %v876_v29 }
 0x18c   :  { %v1691_v34 = vpop.eup %1690  ;;  %v802_v35 = vmul.f32 1.442695, %v782_v31  ;;  %v672_v37 = vadd.f32 1.0, %v1689_v32  ;;  %v518_v38 = vpop.f32.mrf.mxu2  ;;  %v675_v43 = vmul.f32 -0.5, %v1689_v32  ;;  %v678_v62 = vand.u32 2147483647, %v1689_v32 }
 0x18d   :  { %v1693_v40 = vpop.eup %1692  ;;  %v665_v41 = vmul.f32 0.6931472, %v1691_v34  ;;  %1694 = vpow2.f32 %v600_v33  ;;  %v2236_v14 = vadd.f32 %v518_v38, %v2164_v63 }
 0x18e   :  { %1696 = vpow2.f32 %v802_v35  ;;  %v471_v45 = vpop.f32.mrf.mxu1  ;;  %v861_v46 = vmul.f32 %v1693_v40, %v1587_v59  ;;  %v676_v56 = vadd.f32 1.0, %v675_v43  ;;  %vm679_vm6 = vcmp.lt.f32.partialorder %v678_v62, 0.0004427343 }
 0x18f   :  { %v671_v48 = vsel %vm670_vm5, %v668_v42, %v665_v41  ;;  %1698 = vlog2.f32 %v672_v37  ;;  %v562_v21 = vand.u32 2147483647, %v2236_v14  ;;  %v2240_v50 = vadd.f32 %v471_v45, %v2158_v58  ;;  %v1614_v42 = vld [vmem:[#allocation5 + $0x18] sm:$0xff]  }
 0x190   :  { %v767_v49 = vadd.f32 %v671_v48, %v543_v36  ;;  %v877_v51 = vadd.f32 %v861_v46, %v2184_v26  ;;  %v677_v10 = vmul.f32 %v1689_v32, %v676_v56  ;;  %v545_v35 = vmax.f32 %v2225_v16, 0.0 }
 0x191   :  { %v578_v52 = vsub.f32 0.0, %v562_v21  ;;  %1245 = vst [vmem:[#allocation13 + $0xd8] sm:$0xff] %v2240_v50 }
 0x192   :  { %v783_v55 = vmul.f32 0.5, %v767_v49  ;;  %1257 = vst [vmem:[#allocation13 + $0x80] sm:$0xff] %v767_v49  ;;  %v891_v57 = vpack.c.bf16 %v877_v51, %v876_v29  ;;  %v1594_v49 = vunpack.c.l.bf16 %v1614_v42 }
 0x193   :  { %v1695_v60 = vpop.eup %1694  ;;  %v602_v0 = vmul.f32 1.442695, %v578_v52  ;;  %1271 = vst [vmem:[#allocation13 + $0x58] sm:$0xff] %v877_v51 }
 0x194   :  { %v1697_v39 = vpop.eup %1696  ;;  %v804_v1 = vmul.f32 1.442695, %v783_v55  ;;  %v681_v2 = vadd.f32 1.0, %v1695_v60  ;;  %979 = vmatmul.bf16.gmra.mxu3 %v891_v57  ;;  %v520_v3 = vpop.f32.mrf.mxu2  ;;  %v684_v12 = vmul.f32 -0.5, %v1695_v60  ;;  %v687_v27 = vand.u32 2147483647, %v1695_v60 }
 0x195   :  { %v1699_v4 = vpop.eup %1698  ;;  %1700 = vpow2.f32 %v602_v0  ;;  %v2246_v26 = vadd.f32 %v520_v3, %v2164_v63  ;;  %v862_v8 = vmul.f32 %v1697_v39, %v1590_v53 }
 0x196   :  { %1702 = vpow2.f32 %v804_v1  ;;  %v674_v9 = vmul.f32 0.6931472, %v1699_v4  ;;  %v474_v13 = vpop.f32.mrf.mxu1  ;;  %v685_v20 = vadd.f32 1.0, %v684_v12  ;;  %vm688_vm7 = vcmp.lt.f32.partialorder %v687_v27, 0.0004427343 }
 0x197   :  { %1704 = vlog2.f32 %v681_v2  ;;  %v563_v11 = vand.u32 2147483647, %v2246_v26  ;;  %v2250_v5 = vadd.f32 %v474_v13, %v2158_v58  ;;  %v878_v61 = vadd.f32 %v862_v8, %v2192_v44 }
 0x198   :  { %v680_v15 = vsel %vm679_vm6, %v677_v10, %v674_v9  ;;  %v686_v37 = vmul.f32 %v1695_v60, %v685_v20  ;;  %v546_v2 = vmax.f32 %v2236_v14, 0.0  ;;  %v1595_v14 = vunpack.c.h.bf16 %v1614_v42 }
 0x199   :  { %v768_v17 = vadd.f32 %v680_v15, %v544_v7  ;;  %v579_v18 = vsub.f32 0.0, %v563_v11  ;;  %1246 = vst [vmem:[#allocation13 + $0xf0] sm:$0xff] %v2250_v5 }
 0x19a   :  { %1272 = vst [vmem:[#allocation13 + $0x70] sm:$0xff] %v878_v61 }
 0x19b   :  { %v1701_v22 = vpop.eup %1700  ;;  %v784_v24 = vmul.f32 0.5, %v768_v17  ;;  %1258 = vst [vmem:[#allocation13 + $0x98] sm:$0xff] %v768_v17  ;;  %v604_v28 = vmul.f32 1.442695, %v579_v18 }
 0x19c   :  { %v1703_v29 = vpop.eup %1702  ;;  %v690_v31 = vadd.f32 1.0, %v1701_v22  ;;  %v693_v23 = vmul.f32 -0.5, %v1701_v22  ;;  %v523_v59 = vpop.f32.mrf.mxu2  ;;  %v696_v16 = vand.u32 2147483647, %v1701_v22 }
 0x19d   :  { %v1705_v32 = vpop.eup %1704  ;;  %v806_v33 = vmul.f32 1.442695, %v784_v24  ;;  %1706 = vpow2.f32 %v604_v28  ;;  %v2255_v44 = vadd.f32 %v523_v59, %v2164_v63  ;;  %v863_v34 = vmul.f32 %v1703_v29, %v1591_v19 }
 0x19e   :  { %v683_v36 = vmul.f32 0.6931472, %v1705_v32  ;;  %1708 = vlog2.f32 %v690_v31  ;;  %v476_v38 = vpop.f32.mrf.mxu1  ;;  %v694_v45 = vadd.f32 1.0, %v693_v23  ;;  %vm697_vm8 = vcmp.lt.f32.partialorder %v696_v16, 0.0004427343 }
 0x19f   :  { %1710 = vpow2.f32 %v806_v33  ;;  %v564_v40 = vand.u32 2147483647, %v2255_v44  ;;  %v2260_v41 = vadd.f32 %v476_v38, %v2158_v58  ;;  %v879_v46 = vadd.f32 %v863_v34, %v2201_v6  ;;  %v1615_v33 = vld [vmem:[#allocation5 + $0x20] sm:$0xff]  }
 0x1a0   :  { %v689_v43 = vsel %vm688_vm7, %v686_v37, %v683_v36  ;;  %v695_v56 = vmul.f32 %v1701_v22, %v694_v45  ;;  %v547_v22 = vmax.f32 %v2246_v26, 0.0 }
 0x1a1   :  { %v769_v47 = vadd.f32 %v689_v43, %v545_v35  ;;  %v580_v48 = vsub.f32 0.0, %v564_v40  ;;  %1247 = vst [vmem:[#allocation13 + $0x108] sm:$0xff] %v2260_v41  ;;  %v892_v21 = vpack.c.bf16 %v879_v46, %v878_v61  ;;  %v1598_v40 = vunpack.c.l.bf16 %v1615_v33 }
 0x1a2   :  { %1273 = vst [vmem:[#allocation13 + $0x88] sm:$0xff] %v879_v46 }
 0x1a3   :  { %v1707_v51 = vpop.eup %1706  ;;  %v785_v52 = vmul.f32 0.5, %v769_v47  ;;  %1259 = vst [vmem:[#allocation13 + $0xb0] sm:$0xff] %v769_v47  ;;  %v606_v53 = vmul.f32 1.442695, %v580_v48 }
 0x1a4   :  { %v1709_v55 = vpop.eup %1708  ;;  %v699_v57 = vadd.f32 1.0, %v1707_v51  ;;  %v702_v60 = vmul.f32 -0.5, %v1707_v51  ;;  %984 = vmatmul.bf16.gmra.mxu3 %v892_v21  ;;  %v525_v62 = vpop.f32.mrf.mxu2  ;;  %v705_v61 = vand.u32 2147483647, %v1707_v51 }
 0x1a5   :  { %v1711_v0 = vpop.eup %1710  ;;  %v808_v6 = vmul.f32 1.442695, %v785_v52  ;;  %v692_v39 = vmul.f32 0.6931472, %v1709_v55  ;;  %1712 = vpow2.f32 %v606_v53  ;;  %v2265_v1 = vadd.f32 %v525_v62, %v2164_v63 }
 0x1a6   :  { %1714 = vlog2.f32 %v699_v57  ;;  %v479_v3 = vpop.f32.mrf.mxu1  ;;  %v864_v4 = vmul.f32 %v1711_v0, %v1594_v49  ;;  %v703_v12 = vadd.f32 1.0, %v702_v60  ;;  %vm706_vm9 = vcmp.lt.f32.partialorder %v705_v61, 0.0004427343 }
 0x1a7   :  { %1716 = vpow2.f32 %v808_v6  ;;  %v698_v7 = vsel %vm697_vm8, %v695_v56, %v692_v39  ;;  %v565_v8 = vand.u32 2147483647, %v2265_v1  ;;  %v2270_v10 = vadd.f32 %v479_v3, %v2158_v58 }
 0x1a8   :  { %v770_v9 = vadd.f32 %v698_v7, %v546_v2  ;;  %v880_v11 = vadd.f32 %v864_v4, %v2210_v30  ;;  %v704_v31 = vmul.f32 %v1707_v51, %v703_v12  ;;  %v548_v53 = vmax.f32 %v2255_v44, 0.0 }
 0x1a9   :  { %v581_v13 = vsub.f32 0.0, %v565_v8  ;;  %1248 = vst [vmem:[#allocation13 + $0x120] sm:$0xff] %v2270_v10  ;;  %v1599_v4 = vunpack.c.h.bf16 %v1615_v33 }
 0x1aa   :  { %v786_v15 = vmul.f32 0.5, %v770_v9  ;;  %1260 = vst [vmem:[#allocation13 + $0xc8] sm:$0xff] %v770_v9 }
 0x1ab   :  { %v1713_v17 = vpop.eup %1712  ;;  %v608_v18 = vmul.f32 1.442695, %v581_v13  ;;  %1274 = vst [vmem:[#allocation13 + $0xa0] sm:$0xff] %v880_v11 }
 0x1ac   :  { %v1715_v19 = vpop.eup %1714  ;;  %v810_v20 = vmul.f32 1.442695, %v786_v15  ;;  %v708_v24 = vadd.f32 1.0, %v1713_v17  ;;  %v528_v27 = vpop.f32.mrf.mxu2  ;;  %v711_v23 = vmul.f32 -0.5, %v1713_v17  ;;  %v714_v47 = vand.u32 2147483647, %v1713_v17 }
 0x1ad   :  { %v1717_v28 = vpop.eup %1716  ;;  %v701_v29 = vmul.f32 0.6931472, %v1715_v19  ;;  %1718 = vpow2.f32 %v608_v18  ;;  %v2276_v30 = vadd.f32 %v528_v27, %v2164_v63 }
 0x1ae   :  { %1720 = vpow2.f32 %v810_v20  ;;  %v481_v59 = vpop.f32.mrf.mxu1  ;;  %v865_v32 = vmul.f32 %v1717_v28, %v1595_v14  ;;  %v712_v43 = vadd.f32 1.0, %v711_v23  ;;  %vm715_vm10 = vcmp.lt.f32.partialorder %v714_v47, 0.0004427343 }
 0x1af   :  { %v707_v34 = vsel %vm706_vm9, %v704_v31, %v701_v29  ;;  %1722 = vlog2.f32 %v708_v24  ;;  %v566_v26 = vand.u32 2147483647, %v2276_v30  ;;  %v2280_v36 = vadd.f32 %v481_v59, %v2158_v58  ;;  %v1616_v31 = vld [vmem:[#allocation5 + $0x28] sm:$0xff]  }
 0x1b0   :  { %v771_v35 = vadd.f32 %v707_v34, %v547_v22  ;;  %v881_v37 = vadd.f32 %v865_v32, %v2220_v54  ;;  %v713_v57 = vmul.f32 %v1713_v17, %v712_v43  ;;  %v549_v20 = vmax.f32 %v2265_v1, 0.0 }
 0x1b1   :  { %v582_v38 = vsub.f32 0.0, %v566_v26  ;;  %1249 = vst [vmem:[#allocation13 + $0x138] sm:$0xff] %v2280_v36 }
 0x1b2   :  { %v787_v42 = vmul.f32 0.5, %v771_v35  ;;  %1261 = vst [vmem:[#allocation13 + $0xe0] sm:$0xff] %v771_v35  ;;  %v893_v45 = vpack.c.bf16 %v881_v37, %v880_v11  ;;  %v1602_v35 = vunpack.c.l.bf16 %v1616_v31 }
 0x1b3   :  { %v1719_v46 = vpop.eup %1718  ;;  %v610_v48 = vmul.f32 1.442695, %v582_v38  ;;  %1275 = vst [vmem:[#allocation13 + $0xb8] sm:$0xff] %v881_v37 }
 0x1b4   :  { %v1721_v16 = vpop.eup %1720  ;;  %v812_v21 = vmul.f32 1.442695, %v787_v42  ;;  %v717_v49 = vadd.f32 1.0, %v1719_v46  ;;  %989 = vmatmul.bf16.gmra.mxu3 %v893_v45  ;;  %v530_v51 = vpop.f32.mrf.mxu2  ;;  %v720_v60 = vmul.f32 -0.5, %v1719_v46  ;;  %v723_v12 = vand.u32 2147483647, %v1719_v46 }
 0x1b5   :  { %v1723_v52 = vpop.eup %1722  ;;  %1724 = vpow2.f32 %v610_v48  ;;  %v2286_v54 = vadd.f32 %v530_v51, %v2164_v63  ;;  %v866_v55 = vmul.f32 %v1721_v16, %v1598_v40 }
 0x1b6   :  { %1726 = vpow2.f32 %v812_v21  ;;  %v710_v56 = vmul.f32 0.6931472, %v1723_v52  ;;  %v484_v62 = vpop.f32.mrf.mxu1  ;;  %v721_v7 = vadd.f32 1.0, %v720_v60  ;;  %vm724_vm11 = vcmp.lt.f32.partialorder %v723_v12, 0.0004427343  ;;  %v1617_v12 = vld [vmem:[#allocation5 + $0x30] sm:$0xff]  }
 0x1b7   :  { %1728 = vlog2.f32 %v717_v49  ;;  %v567_v0 = vand.u32 2147483647, %v2286_v54  ;;  %v2290_v6 = vadd.f32 %v484_v62, %v2158_v58  ;;  %v882_v44 = vadd.f32 %v866_v55, %v2230_v25 }
 0x1b8   :  { %v716_v39 = vsel %vm715_vm10, %v713_v57, %v710_v56  ;;  %v722_v24 = vmul.f32 %v1719_v46, %v721_v7  ;;  %v550_v21 = vmax.f32 %v2276_v30, 0.0 }
 0x1b9   :  { %v772_v2 = vadd.f32 %v716_v39, %v548_v53  ;;  %v583_v3 = vsub.f32 0.0, %v567_v0  ;;  %1250 = vst [vmem:[#allocation13 + $0x150] sm:$0xff] %v2290_v6  ;;  %v1603_v0 = vunpack.c.h.bf16 %v1616_v31  ;;  %v1579_v31 = vld [vmem:[#allocation11 + $0x38] sm:$0xff] }
 0x1ba   :  { %1276 = vst [vmem:[#allocation13 + $0xd0] sm:$0xff] %v882_v44  ;;  %1107 = vmatpush.bf16.msrb.mxu0 %v1579_v31 }
 0x1bb   :  { %v1725_v8 = vpop.eup %1724  ;;  %v788_v9 = vmul.f32 0.5, %v772_v2  ;;  %1262 = vst [vmem:[#allocation13 + $0xf8] sm:$0xff] %v772_v2  ;;  %v612_v13 = vmul.f32 1.442695, %v583_v3 }
 0x1bc   :  { %v1727_v11 = vpop.eup %1726  ;;  %v726_v15 = vadd.f32 1.0, %v1725_v8  ;;  %v729_v61 = vmul.f32 -0.5, %v1725_v8  ;;  %v533_v14 = vpop.f32.mrf.mxu2  ;;  %v732_v1 = vand.u32 2147483647, %v1725_v8 }
 0x1bd   :  { %v1729_v17 = vpop.eup %1728  ;;  %v814_v18 = vmul.f32 1.442695, %v788_v9  ;;  %1730 = vpow2.f32 %v612_v13  ;;  %v2295_v25 = vadd.f32 %v533_v14, %v2164_v63  ;;  %v867_v19 = vmul.f32 %v1727_v11, %v1599_v4 }
 0x1be   :  { %v719_v22 = vmul.f32 0.6931472, %v1729_v17  ;;  %1732 = vlog2.f32 %v726_v15  ;;  %v486_v27 = vpop.f32.mrf.mxu1  ;;  %v730_v59 = vadd.f32 1.0, %v729_v61  ;;  %vm733_vm12 = vcmp.lt.f32.partialorder %v732_v1, 0.0004427343 }
 0x1bf   :  { %1734 = vpow2.f32 %v814_v18  ;;  %v568_v28 = vand.u32 2147483647, %v2295_v25  ;;  %v2300_v29 = vadd.f32 %v486_v27, %v2158_v58  ;;  %v883_v32 = vadd.f32 %v867_v19, %v2240_v50 }
 0x1c0   :  { %v725_v23 = vsel %vm724_vm11, %v722_v24, %v719_v22  ;;  %v731_v58 = vmul.f32 %v1725_v8, %v730_v59  ;;  %v551_v4 = vmax.f32 %v2286_v54, 0.0  ;;  %v1606_v61 = vunpack.c.l.bf16 %v1617_v12 }
 0x1c1   :  { %v773_v33 = vadd.f32 %v725_v23, %v549_v20  ;;  %v584_v34 = vsub.f32 0.0, %v568_v28  ;;  %1251 = vst [vmem:[#allocation13 + $0x168] sm:$0xff] %v2300_v29  ;;  %v894_v26 = vpack.c.bf16 %v883_v32, %v882_v44 }
 0x1c2   :  { %1277 = vst [vmem:[#allocation13 + $0xe8] sm:$0xff] %v883_v32 }
 0x1c3   :  { %v1731_v37 = vpop.eup %1730  ;;  %v789_v38 = vmul.f32 0.5, %v773_v33  ;;  %1263 = vst [vmem:[#allocation13 + $0x110] sm:$0xff] %v773_v33  ;;  %v614_v40 = vmul.f32 1.442695, %v584_v34  ;;  %v1578_v34 = vld [vmem:[#allocation11 + $0x30] sm:$0xff] }
 0x1c4   :  { %v1733_v42 = vpop.eup %1732  ;;  %v735_v43 = vadd.f32 1.0, %v1731_v37  ;;  %v738_v45 = vmul.f32 -0.5, %v1731_v37  ;;  %994 = vmatmul.bf16.gmra.mxu3 %v894_v26  ;;  %v535_v46 = vpop.f32.mrf.mxu2  ;;  %v741_v62 = vand.u32 2147483647, %v1731_v37  ;;  %1108 = vmatpush.bf16.msrb.mxu0 %v1578_v34 }
 0x1c5   :  { %v1735_v47 = vpop.eup %1734  ;;  %v816_v50 = vmul.f32 1.442695, %v789_v38  ;;  %v728_v48 = vmul.f32 0.6931472, %v1733_v42  ;;  %1736 = vpow2.f32 %v614_v40  ;;  %v2305_v16 = vadd.f32 %v535_v46, %v2164_v63  ;;  %v1577_v42 = vld [vmem:[#allocation11 + $0x28] sm:$0xff] }
 0x1c6   :  { %1738 = vlog2.f32 %v735_v43  ;;  %v868_v49 = vmul.f32 %v1735_v47, %v1602_v35  ;;  %v739_v56 = vadd.f32 1.0, %v738_v45  ;;  %vm742_vm13 = vcmp.lt.f32.partialorder %v741_v62, 0.0004427343 }
 0x1c7   :  { %1740 = vpow2.f32 %v816_v50  ;;  %v734_v51 = vsel %vm733_vm12, %v731_v58, %v728_v48  ;;  %v569_v52 = vand.u32 2147483647, %v2305_v16  ;;  %v1607_v35 = vunpack.c.h.bf16 %v1617_v12  ;;  %v1618_v48 = vld [vmem:[#allocation5 + $0x38] sm:$0xff]  }
 0x1c8   :  { %v774_v53 = vadd.f32 %v734_v51, %v550_v21  ;;  %v884_v55 = vadd.f32 %v868_v49, %v2250_v5  ;;  %v740_v8 = vmul.f32 %v1731_v37, %v739_v56  ;;  %1109 = vmatpush.bf16.msrb.mxu0 %v1577_v42  ;;  %v1576_v21 = vld [vmem:[#allocation11 + $0x20] sm:$0xff]  ;;  %v1575_v56 = vld [vmem:[#allocation11 + $0x18] sm:$0xff] }
 0x1c9   :  { %v585_v57 = vsub.f32 0.0, %v569_v52 }
 0x1ca   :  { %v790_v60 = vmul.f32 0.5, %v774_v53  ;;  %1264 = vst [vmem:[#allocation13 + $0x128] sm:$0xff] %v774_v53  ;;  %v1610_v53 = vunpack.c.l.bf16 %v1618_v48 }
 0x1cb   :  { %v1737_v63 = vpop.eup %1736  ;;  %v616_v39 = vmul.f32 1.442695, %v585_v57  ;;  %1278 = vst [vmem:[#allocation13 + $0x100] sm:$0xff] %v884_v55 }
 0x1cc   :  { %v1739_v30 = vpop.eup %1738  ;;  %v818_v44 = vmul.f32 1.442695, %v790_v60  ;;  %v744_v2 = vadd.f32 1.0, %v1737_v63  ;;  %v747_v5 = vmul.f32 -0.5, %v1737_v63  ;;  %v750_v54 = vand.u32 2147483647, %v1737_v63  ;;  %1110 = vmatpush.bf16.msrb.mxu0 %v1576_v21 }
 0x1cd   :  { %v1741_v3 = vpop.eup %1740  ;;  %v737_v7 = vmul.f32 0.6931472, %v1739_v30  ;;  %1742 = vpow2.f32 %v616_v39 }
 0x1ce   :  { %1744 = vpow2.f32 %v818_v44  ;;  %v869_v9 = vmul.f32 %v1741_v3, %v1603_v0  ;;  %v748_v17 = vadd.f32 1.0, %v747_v5  ;;  %vm751_vm14 = vcmp.lt.f32.partialorder %v750_v54, 0.0004427343  ;;  %v1574_v0 = vld [vmem:[#allocation11 + $0x10] sm:$0xff]  ;;  %v1572_v3 = vld [vmem:[#allocation11] sm:$0xff] }
 0x1cf   :  { %v743_v13 = vsel %vm742_vm13, %v740_v8, %v737_v7  ;;  %1746 = vlog2.f32 %v744_v2 }
 0x1d0   :  { %v775_v11 = vadd.f32 %v743_v13, %v551_v4  ;;  %v885_v15 = vadd.f32 %v869_v9, %v2260_v41  ;;  %v749_v59 = vmul.f32 %v1737_v63, %v748_v17  ;;  %v552_v41 = vmax.f32 %v2295_v25, 0.0  ;;  %1111 = vmatpush.bf16.msrb.mxu0 %v1575_v56  ;;  %v1573_v63 = vld [vmem:[#allocation11 + $0x8] sm:$0xff] }
 0x1d2   :  { %v791_v14 = vmul.f32 0.5, %v775_v11  ;;  %1265 = vst [vmem:[#allocation13 + $0x140] sm:$0xff] %v775_v11  ;;  %v895_v18 = vpack.c.bf16 %v885_v15, %v884_v55 }
 0x1d3   :  { %v1743_v19 = vpop.eup %1742  ;;  %1279 = vst [vmem:[#allocation13 + $0x118] sm:$0xff] %v885_v15 }
 0x1d4   :  { %v1745_v20 = vpop.eup %1744  ;;  %v820_v22 = vmul.f32 1.442695, %v791_v14  ;;  %v753_v24 = vadd.f32 1.0, %v1743_v19  ;;  %999 = vmatmul.bf16.gmra.mxu3 %v895_v18  ;;  %v756_v32 = vmul.f32 -0.5, %v1743_v19  ;;  %v759_v40 = vand.u32 2147483647, %v1743_v19  ;;  %1112 = vmatpush.bf16.msrb.mxu0 %v1574_v0 }
 0x1d5   :  { %v1747_v27 = vpop.eup %1746  ;;  %v870_v28 = vmul.f32 %v1745_v20, %v1606_v61  ;;  %v2324_v0 = vld [vmem:[%s2360_s9] ss:$0 sm:$0xff]  ;;  %s2034_s9 = smov [#allocation13]  }
 0x1d6   :  { %1748 = vpow2.f32 %v820_v22  ;;  %v746_v23 = vmul.f32 0.6931472, %v1747_v27  ;;  %v757_v37 = vadd.f32 1.0, %v756_v32  ;;  %vm760_vm15 = vcmp.lt.f32.partialorder %v759_v40, 0.0004427343  ;;  %s1304_s15 = sshll.u32 %s2034_s9, 4  ;;  %s1305_s15 = int_to_ptr.vmem [resolvable:$true] %s1304_s15 }
 0x1d7   :  { %1750 = vlog2.f32 %v753_v24  ;;  %v886_v33 = vadd.f32 %v870_v28, %v2270_v10  ;;  %v553_v10 = vmax.f32 %v2305_v16, 0.0  ;;  %v1611_v16 = vunpack.c.h.bf16 %v1618_v48 }
 0x1d8   :  { %v752_v1 = vsel %vm751_vm14, %v749_v59, %v746_v23  ;;  %v758_v47 = vmul.f32 %v1743_v19, %v757_v37  ;;  %1113 = vmatpush.bf16.msrb.mxu0 %v1573_v63 }
 0x1d9   :  { %v776_v26 = vadd.f32 %v752_v1, %v552_v41  ;;  %1280 = vst [vmem:[#allocation13 + $0x130] sm:$0xff] %v886_v33 }
 0x1db   :  { %v792_v38 = vmul.f32 0.5, %v776_v26  ;;  %1266 = vst [vmem:[#allocation13 + $0x158] sm:$0xff] %v776_v26 }
 0x1dc   :  { %v1749_v58 = vpop.eup %1748  ;;  %1114 = vmatpush.bf16.msrb.mxu0 %v1572_v3 }
 0x1dd   :  { %v1751_v43 = vpop.eup %1750  ;;  %v822_v45 = vmul.f32 1.442695, %v792_v38  ;;  %v871_v25 = vmul.f32 %v1749_v58, %v1607_v35 }
 0x1de   :  { %v755_v46 = vmul.f32 0.6931472, %v1751_v43 }
 0x1df   :  { %1752 = vpow2.f32 %v822_v45  ;;  %v887_v50 = vadd.f32 %v871_v25, %v2280_v36 }
 0x1e0   :  { %v761_v49 = vsel %vm760_vm15, %v758_v47, %v755_v46 }
 0x1e1   :  { %v777_v51 = vadd.f32 %v761_v49, %v553_v10  ;;  %v896_v52 = vpack.c.bf16 %v887_v50, %v886_v33  ;;  %1281 = vst [vmem:[#allocation13 + $0x148] sm:$0xff] %v887_v50 }
 0x1e3   :  { %v793_v55 = vmul.f32 0.5, %v777_v51  ;;  %1267 = vst [vmem:[#allocation13 + $0x170] sm:$0xff] %v777_v51 }
 0x1e4   :  { %1004 = vmatmul.bf16.gmra.mxu3 %v896_v52 }
 0x1e5   :  { %v1753_v57 = vpop.eup %1752  ;;  %v824_v60 = vmul.f32 1.442695, %v793_v55 }
 0x1e6   :  { %v872_v62 = vmul.f32 %v1753_v57, %v1610_v53 }
 0x1e7   :  { %1754 = vpow2.f32 %v824_v60 }
 0x1e8   :  { %v888_v36 = vadd.f32 %v872_v62, %v2290_v6  ;;  %v1658_v6 = vld [vmem:[%s2358_s7] ss:$0 sm:$0xff] }
 0x1ea   :  { %1282 = vst [vmem:[#allocation13 + $0x160] sm:$0xff] %v888_v36 }
 0x1ed   :  { %v1755_v39 = vpop.eup %1754 }
 0x1ee   :  { %v873_v30 = vmul.f32 %v1755_v39, %v1611_v16 }
 0x1f0   :  { %v889_v44 = vadd.f32 %v873_v30, %v2300_v29 }
 0x1f2   :  { %v897_v2 = vpack.c.bf16 %v889_v44, %v888_v36  ;;  %1283 = vst [vmem:[#allocation13 + $0x178] sm:$0xff] %v889_v44 }
 0x1f3   :  { %1312 = dma.vmem_to_hbm [thread:$0]  %s1305_s15, 6144, %s1307_s14, [#allocation4], %s2035_s16, %s2035_s16, %s2036_s17  }
 0x1f4   :  { %1009 = vmatmul.bf16.gmra.mxu3 %v897_v2 }
 0x206   :  { %v975_v4 = vpop.f32.mrf.mxu3 }
 0x207   :  { %v976_v7 = vadd.f32 %v1658_v6, %v975_v4 }
 0x209   :  { %v1015_v9 = vmax.f32 %v976_v7, 0.0 }
 0x20e   :  { %v977_v8 = vpop.f32.mrf.mxu3 }
 0x20f   :  { %v978_v5 = vadd.f32 %v1658_v6, %v977_v8 }
 0x211   :  { %v1016_v12 = vmax.f32 %v978_v5, 0.0 }
 0x213   :  { %v1031_v13 = vpack.c.bf16 %v1016_v12, %v1015_v9 }
 0x215   :  { %1115 = vmatmul.bf16.vlgmr.msrb.gmra.mxu0 %v1031_v13 }
 0x217   :  { %v980_v11 = vpop.f32.mrf.mxu3 }
 0x218   :  { %v981_v29 = vadd.f32 %v1658_v6, %v980_v11 }
 0x21a   :  { %v1017_v14 = vmax.f32 %v981_v29, 0.0 }
 0x21f   :  { %v982_v15 = vpop.f32.mrf.mxu3 }
 0x220   :  { %v983_v61 = vadd.f32 %v1658_v6, %v982_v15 }
 0x222   :  { %v1018_v17 = vmax.f32 %v983_v61, 0.0 }
 0x224   :  { %v1032_v18 = vpack.c.bf16 %v1018_v17, %v1017_v14 }
 0x226   :  { %1120 = vmatmul.bf16.gmra.mxu0 %v1032_v18 }
 0x227   :  { %v985_v19 = vpop.f32.mrf.mxu3 }
 0x228   :  { %v986_v54 = vadd.f32 %v1658_v6, %v985_v19 }
 0x22a   :  { %v1019_v24 = vmax.f32 %v986_v54, 0.0 }
 0x22f   :  { %v987_v20 = vpop.f32.mrf.mxu3 }
 0x230   :  { %v988_v22 = vadd.f32 %v1658_v6, %v987_v20 }
 0x232   :  { %v1020_v27 = vmax.f32 %v988_v22, 0.0 }
 0x234   :  { %v1033_v28 = vpack.c.bf16 %v1020_v27, %v1019_v24 }
 0x236   :  { %1125 = vmatmul.bf16.gmra.mxu0 %v1033_v28 }
 0x237   :  { %v990_v31 = vpop.f32.mrf.mxu3 }
 0x238   :  { %v991_v23 = vadd.f32 %v1658_v6, %v990_v31 }
 0x23a   :  { %v1021_v41 = vmax.f32 %v991_v23, 0.0 }
 0x23f   :  { %v992_v59 = vpop.f32.mrf.mxu3 }
 0x240   :  { %v993_v32 = vadd.f32 %v1658_v6, %v992_v59 }
 0x242   :  { %v1022_v33 = vmax.f32 %v993_v32, 0.0 }
 0x244   :  { %v1034_v34 = vpack.c.bf16 %v1022_v33, %v1021_v41 }
 0x246   :  { %1130 = vmatmul.bf16.gmra.mxu0 %v1034_v34 }
 0x247   :  { %v995_v1 = vpop.f32.mrf.mxu3 }
 0x248   :  { %v996_v26 = vadd.f32 %v1658_v6, %v995_v1 }
 0x24a   :  { %v1023_v38 = vmax.f32 %v996_v26, 0.0 }
 0x24f   :  { %v997_v35 = vpop.f32.mrf.mxu3 }
 0x250   :  { %v998_v37 = vadd.f32 %v1658_v6, %v997_v35 }
 0x252   :  { %v1024_v40 = vmax.f32 %v998_v37, 0.0 }
 0x254   :  { %v1035_v42 = vpack.c.bf16 %v1024_v40, %v1023_v38 }
 0x256   :  { %1135 = vmatmul.bf16.gmra.mxu0 %v1035_v42 }
 0x257   :  { %v1000_v58 = vpop.f32.mrf.mxu3 }
 0x258   :  { %v1001_v43 = vadd.f32 %v1658_v6, %v1000_v58 }
 0x25a   :  { %v1025_v46 = vmax.f32 %v1001_v43, 0.0 }
 0x25f   :  { %v1002_v45 = vpop.f32.mrf.mxu3 }
 0x260   :  { %v1003_v25 = vadd.f32 %v1658_v6, %v1002_v45 }
 0x262   :  { %v1026_v47 = vmax.f32 %v1003_v25, 0.0 }
 0x264   :  { %v1036_v10 = vpack.c.bf16 %v1026_v47, %v1025_v46 }
 0x266   :  { %1140 = vmatmul.bf16.gmra.mxu0 %v1036_v10 }
 0x267   :  { %v1005_v50 = vpop.f32.mrf.mxu3 }
 0x268   :  { %v1006_v48 = vadd.f32 %v1658_v6, %v1005_v50 }
 0x26a   :  { %v1027_v51 = vmax.f32 %v1006_v48, 0.0 }
 0x26f   :  { %v1007_v21 = vpop.f32.mrf.mxu3 }
 0x270   :  { %v1008_v49 = vadd.f32 %v1658_v6, %v1007_v21 }
 0x272   :  { %v1028_v52 = vmax.f32 %v1008_v49, 0.0 }
 0x274   :  { %v1037_v53 = vpack.c.bf16 %v1028_v52, %v1027_v51 }
 0x276   :  { %1145 = vmatmul.bf16.gmra.mxu0 %v1037_v53 }
 0x277   :  { %v1010_v55 = vpop.f32.mrf.mxu3 }
 0x278   :  { %v1011_v56 = vadd.f32 %v1658_v6, %v1010_v55 }
 0x27a   :  { %v1029_v62 = vmax.f32 %v1011_v56, 0.0 }
 0x27f   :  { %v1012_v57 = vpop.f32.mrf.mxu3 }
 0x280   :  { %v1013_v60 = vadd.f32 %v1658_v6, %v1012_v57 }
 0x282   :  { %v1030_v36 = vmax.f32 %v1013_v60, 0.0 }
 0x284   :  { %v1038_v16 = vpack.c.bf16 %v1030_v36, %v1029_v62 }
 0x286   :  { %1150 = vmatmul.bf16.gmra.mxu0 %v1038_v16 }
 0x292   :  { %v1116_v63 = vpop.f32.mrf.mxu0 }
 0x293   :  { %v1117_v39 = vadd.f32 %v2324_v0, %v1116_v63 }
 0x295   :  { %v1156_v30 = vsub.f32 0.0, %v1117_v39 }
 0x297   :  { %v1172_v44 = vmul.f32 1.442695, %v1156_v30 }
 0x299   :  { %1756 = vpow2.f32 %v1172_v44 }
 0x29a   :  { %v1118_v2 = vpop.f32.mrf.mxu0 }
 0x29b   :  { %v1119_v3 = vadd.f32 %v2324_v0, %v1118_v2 }
 0x29d   :  { %v1157_v4 = vsub.f32 0.0, %v1119_v3 }
 0x29f   :  { %v1757_v6 = vpop.eup %1756  ;;  %v1174_v7 = vmul.f32 1.442695, %v1157_v4 }
 0x2a0   :  { %v1204_v8 = vadd.f32 1.0, %v1757_v6 }
 0x2a1   :  { %1758 = vpow2.f32 %v1174_v7 }
 0x2a2   :  { %1760 = vrcp.f32 %v1204_v8 }
 0x2a3   :  { %v1121_v5 = vpop.f32.mrf.mxu0 }
 0x2a4   :  { %v1122_v9 = vadd.f32 %v2324_v0, %v1121_v5 }
 0x2a6   :  { %v1158_v12 = vsub.f32 0.0, %v1122_v9 }
 0x2a7   :  { %v1759_v13 = vpop.eup %1758 }
 0x2a8   :  { %v1176_v11 = vmul.f32 1.442695, %v1158_v12  ;;  %v1761_v29 = vpop.eup %1760  ;;  %v1205_v15 = vadd.f32 1.0, %v1759_v13 }
 0x2a9   :  { %1284 = vst [vmem:[#allocation14] sm:$0xff] %v1761_v29 }
 0x2aa   :  { %1762 = vpow2.f32 %v1176_v11 }
 0x2ab   :  { %1764 = vrcp.f32 %v1205_v15  ;;  %v1123_v61 = vpop.f32.mrf.mxu0 }
 0x2ac   :  { %v1124_v14 = vadd.f32 %v2324_v0, %v1123_v61 }
 0x2ae   :  { %v1159_v17 = vsub.f32 0.0, %v1124_v14 }
 0x2b0   :  { %v1763_v18 = vpop.eup %1762  ;;  %v1178_v19 = vmul.f32 1.442695, %v1159_v17 }
 0x2b1   :  { %v1765_v54 = vpop.eup %1764  ;;  %v1206_v20 = vadd.f32 1.0, %v1763_v18 }
 0x2b2   :  { %1285 = vst [vmem:[#allocation14 + $0x8] sm:$0xff] %v1765_v54  ;;  %1766 = vpow2.f32 %v1178_v19 }
 0x2b3   :  { %1768 = vrcp.f32 %v1206_v20  ;;  %v1126_v22 = vpop.f32.mrf.mxu0 }
 0x2b4   :  { %v1127_v24 = vadd.f32 %v2324_v0, %v1126_v22 }
 0x2b6   :  { %v1160_v27 = vsub.f32 0.0, %v1127_v24 }
 0x2b8   :  { %v1767_v28 = vpop.eup %1766  ;;  %v1180_v31 = vmul.f32 1.442695, %v1160_v27 }
 0x2b9   :  { %v1769_v23 = vpop.eup %1768  ;;  %v1207_v59 = vadd.f32 1.0, %v1767_v28 }
 0x2ba   :  { %1286 = vst [vmem:[#allocation14 + $0x10] sm:$0xff] %v1769_v23  ;;  %1770 = vpow2.f32 %v1180_v31 }
 0x2bb   :  { %1772 = vrcp.f32 %v1207_v59  ;;  %v1128_v32 = vpop.f32.mrf.mxu0 }
 0x2bc   :  { %v1129_v41 = vadd.f32 %v2324_v0, %v1128_v32 }
 0x2be   :  { %v1161_v33 = vsub.f32 0.0, %v1129_v41 }
 0x2c0   :  { %v1771_v34 = vpop.eup %1770  ;;  %v1182_v1 = vmul.f32 1.442695, %v1161_v33 }
 0x2c1   :  { %v1773_v26 = vpop.eup %1772  ;;  %v1208_v35 = vadd.f32 1.0, %v1771_v34 }
 0x2c2   :  { %1287 = vst [vmem:[#allocation14 + $0x18] sm:$0xff] %v1773_v26  ;;  %1774 = vpow2.f32 %v1182_v1 }
 0x2c3   :  { %1776 = vrcp.f32 %v1208_v35  ;;  %v1131_v37 = vpop.f32.mrf.mxu0 }
 0x2c4   :  { %v1132_v38 = vadd.f32 %v2324_v0, %v1131_v37 }
 0x2c6   :  { %v1162_v40 = vsub.f32 0.0, %v1132_v38 }
 0x2c8   :  { %v1775_v42 = vpop.eup %1774  ;;  %v1184_v58 = vmul.f32 1.442695, %v1162_v40 }
 0x2c9   :  { %v1777_v43 = vpop.eup %1776  ;;  %v1209_v45 = vadd.f32 1.0, %v1775_v42 }
 0x2ca   :  { %1288 = vst [vmem:[#allocation14 + $0x20] sm:$0xff] %v1777_v43  ;;  %1778 = vpow2.f32 %v1184_v58 }
 0x2cb   :  { %1780 = vrcp.f32 %v1209_v45  ;;  %v1133_v25 = vpop.f32.mrf.mxu0 }
 0x2cc   :  { %v1134_v46 = vadd.f32 %v2324_v0, %v1133_v25 }
 0x2ce   :  { %v1163_v47 = vsub.f32 0.0, %v1134_v46 }
 0x2d0   :  { %v1779_v10 = vpop.eup %1778  ;;  %v1186_v50 = vmul.f32 1.442695, %v1163_v47 }
 0x2d1   :  { %v1781_v48 = vpop.eup %1780  ;;  %v1210_v21 = vadd.f32 1.0, %v1779_v10 }
 0x2d2   :  { %1289 = vst [vmem:[#allocation14 + $0x28] sm:$0xff] %v1781_v48  ;;  %1782 = vpow2.f32 %v1186_v50 }
 0x2d3   :  { %1784 = vrcp.f32 %v1210_v21  ;;  %v1136_v49 = vpop.f32.mrf.mxu0 }
 0x2d4   :  { %v1137_v51 = vadd.f32 %v2324_v0, %v1136_v49 }
 0x2d6   :  { %v1164_v52 = vsub.f32 0.0, %v1137_v51 }
 0x2d8   :  { %v1783_v53 = vpop.eup %1782  ;;  %v1188_v55 = vmul.f32 1.442695, %v1164_v52 }
 0x2d9   :  { %v1785_v56 = vpop.eup %1784  ;;  %v1211_v57 = vadd.f32 1.0, %v1783_v53 }
 0x2da   :  { %1290 = vst [vmem:[#allocation14 + $0x30] sm:$0xff] %v1785_v56  ;;  %1786 = vpow2.f32 %v1188_v55 }
 0x2db   :  { %1788 = vrcp.f32 %v1211_v57  ;;  %v1138_v60 = vpop.f32.mrf.mxu0 }
 0x2dc   :  { %v1139_v62 = vadd.f32 %v2324_v0, %v1138_v60 }
 0x2de   :  { %v1165_v36 = vsub.f32 0.0, %v1139_v62 }
 0x2e0   :  { %v1787_v16 = vpop.eup %1786  ;;  %v1190_v63 = vmul.f32 1.442695, %v1165_v36 }
 0x2e1   :  { %v1789_v39 = vpop.eup %1788  ;;  %v1212_v30 = vadd.f32 1.0, %v1787_v16 }
 0x2e2   :  { %1291 = vst [vmem:[#allocation14 + $0x38] sm:$0xff] %v1789_v39  ;;  %1790 = vpow2.f32 %v1190_v63 }
 0x2e3   :  { %1792 = vrcp.f32 %v1212_v30  ;;  %v1141_v44 = vpop.f32.mrf.mxu0 }
 0x2e4   :  { %v1142_v2 = vadd.f32 %v2324_v0, %v1141_v44 }
 0x2e6   :  { %v1166_v3 = vsub.f32 0.0, %v1142_v2 }
 0x2e8   :  { %v1791_v4 = vpop.eup %1790  ;;  %v1192_v6 = vmul.f32 1.442695, %v1166_v3 }
 0x2e9   :  { %v1793_v7 = vpop.eup %1792  ;;  %v1213_v8 = vadd.f32 1.0, %v1791_v4 }
 0x2ea   :  { %1292 = vst [vmem:[#allocation14 + $0x40] sm:$0xff] %v1793_v7  ;;  %1794 = vpow2.f32 %v1192_v6 }
 0x2eb   :  { %1796 = vrcp.f32 %v1213_v8  ;;  %v1143_v5 = vpop.f32.mrf.mxu0 }
 0x2ec   :  { %v1144_v9 = vadd.f32 %v2324_v0, %v1143_v5 }
 0x2ee   :  { %v1167_v12 = vsub.f32 0.0, %v1144_v9 }
 0x2f0   :  { %v1795_v13 = vpop.eup %1794  ;;  %v1194_v11 = vmul.f32 1.442695, %v1167_v12 }
 0x2f1   :  { %v1797_v29 = vpop.eup %1796  ;;  %v1214_v15 = vadd.f32 1.0, %v1795_v13 }
 0x2f2   :  { %1293 = vst [vmem:[#allocation14 + $0x48] sm:$0xff] %v1797_v29  ;;  %1798 = vpow2.f32 %v1194_v11 }
 0x2f3   :  { %1800 = vrcp.f32 %v1214_v15  ;;  %v1146_v61 = vpop.f32.mrf.mxu0 }
 0x2f4   :  { %v1147_v14 = vadd.f32 %v2324_v0, %v1146_v61 }
 0x2f6   :  { %v1168_v17 = vsub.f32 0.0, %v1147_v14 }
 0x2f8   :  { %v1799_v18 = vpop.eup %1798  ;;  %v1196_v19 = vmul.f32 1.442695, %v1168_v17 }
 0x2f9   :  { %v1801_v54 = vpop.eup %1800  ;;  %v1215_v20 = vadd.f32 1.0, %v1799_v18 }
 0x2fa   :  { %1294 = vst [vmem:[#allocation14 + $0x50] sm:$0xff] %v1801_v54  ;;  %1802 = vpow2.f32 %v1196_v19 }
 0x2fb   :  { %1804 = vrcp.f32 %v1215_v20  ;;  %v1148_v22 = vpop.f32.mrf.mxu0 }
 0x2fc   :  { %v1149_v24 = vadd.f32 %v2324_v0, %v1148_v22 }
 0x2fe   :  { %v1169_v27 = vsub.f32 0.0, %v1149_v24 }
 0x300   :  { %v1803_v28 = vpop.eup %1802  ;;  %v1198_v31 = vmul.f32 1.442695, %v1169_v27 }
 0x301   :  { %v1805_v23 = vpop.eup %1804  ;;  %v1216_v59 = vadd.f32 1.0, %v1803_v28 }
 0x302   :  { %1295 = vst [vmem:[#allocation14 + $0x58] sm:$0xff] %v1805_v23  ;;  %1806 = vpow2.f32 %v1198_v31 }
 0x303   :  { %1808 = vrcp.f32 %v1216_v59  ;;  %v1151_v32 = vpop.f32.mrf.mxu0 }
 0x304   :  { %v1152_v41 = vadd.f32 %v2324_v0, %v1151_v32 }
 0x306   :  { %v1170_v33 = vsub.f32 0.0, %v1152_v41 }
 0x308   :  { %v1807_v34 = vpop.eup %1806  ;;  %v1200_v1 = vmul.f32 1.442695, %v1170_v33 }
 0x309   :  { %v1809_v26 = vpop.eup %1808  ;;  %v1217_v35 = vadd.f32 1.0, %v1807_v34 }
 0x30a   :  { %1296 = vst [vmem:[#allocation14 + $0x60] sm:$0xff] %v1809_v26  ;;  %1810 = vpow2.f32 %v1200_v1 }
 0x30b   :  { %1812 = vrcp.f32 %v1217_v35  ;;  %v1153_v37 = vpop.f32.mrf.mxu0 }
 0x30c   :  { %v1154_v38 = vadd.f32 %v2324_v0, %v1153_v37 }
 0x30e   :  { %v1171_v40 = vsub.f32 0.0, %v1154_v38 }
 0x310   :  { %v1811_v42 = vpop.eup %1810  ;;  %v1202_v58 = vmul.f32 1.442695, %v1171_v40 }
 0x311   :  { %v1813_v43 = vpop.eup %1812  ;;  %v1218_v45 = vadd.f32 1.0, %v1811_v42 }
 0x312   :  { %1297 = vst [vmem:[#allocation14 + $0x68] sm:$0xff] %v1813_v43  ;;  %1814 = vpow2.f32 %v1202_v58 }
 0x313   :  { %1816 = vrcp.f32 %v1218_v45 }
 0x318   :  { %v1815_v25 = vpop.eup %1814 }
 0x319   :  { %v1817_v46 = vpop.eup %1816  ;;  %v1219_v47 = vadd.f32 1.0, %v1815_v25 }
 0x31a   :  { %1298 = vst [vmem:[#allocation14 + $0x70] sm:$0xff] %v1817_v46 }
 0x31b   :  { %1818 = vrcp.f32 %v1219_v47 }
 0x321   :  { %v1819_v0 = vpop.eup %1818 }
 0x322   :  { %1299 = vst [vmem:[#allocation14 + $0x78] sm:$0xff] %v1819_v0 }
 0x323   :  { %1325 = dma.vmem_to_hbm [thread:$0]  %s1318_s18, 2048, %s1320_s21, [#allocation15], %s2028_s29, %s2028_s29, %s2029_s1  }
 0x324   :  { %2020 = dma.done.wait [#allocation4], 6144  }
 0x325   :  { %2021 = vsyncadd [#allocation4], 4294961152 }
 0x326   :  { %2022 = dma.done.wait [#allocation15], 2048  }
 0x327   :  { %2023 = vsyncadd [#allocation15], 4294965248 }
 0x328   :  { %1334 = vsyncpa [#allocation3], 1 }
 0x329   :  { %1335 = vsyncpa [#allocation6], 1 }
 0x32a   :  { %1336 = vsyncpa [#allocation9], 1 }
 0x32b   :  { %1337 = vsyncpa [#allocation12], 1 }
 0x32c   :  { %1338 = vsyncpa [#allocation4], 1 }
 0x32d   :  { %1339 = vsyncpa [#allocation15], 1 }

</bundles_post_ra>
